<compile_context>
chip_gen: v6e
topology: v6e:2x2x1
jax: 0.10.0
libtpu: 0.0.40
codegen_flags: <defaults>
</compile_context>

<pallas_src>
import jax
import jax.numpy as jnp
from jax.experimental import pallas as pl
from jax.experimental.pallas import tpu as pltpu  # noqa: F401  (TPU backend)

# ----- sizes (small, deterministic) -----
N, RAW, HID, OUT, K, P = 16, 8, 32, 16, 4, 8   # nodes, raw_dim, hidden_dim, out_dim, n_kernels, phi_dim
PM1 = P - 1


# --------------------------------------------------------------------------
# Fused kernel: projections + deformable attention + aggregation, all in VMEM.
# --------------------------------------------------------------------------
def _fused_kernel(e_ref, h_ref, adj_ref, we_ref, b1_ref, w2_ref, b2_ref,
                  w_ref, bias_ref, tphi_ref, out_ref, delta_o):
    e = e_ref[...]            # (N, RAW)
    h = h_ref[...]            # (N, HID)
    adj = adj_ref[...]        # (N, N)

    # ---- per-node projections (MXU) ----
    # fused e-path matmul: e @ [W1 | W_phi] -> slice into MLP hidden and phi
    ew = jnp.dot(e, we_ref[...], preferred_element_type=jnp.float32)        # (N, HID+PM1)
    z = jnp.maximum(ew[:, :HID] + b1_ref[...], 0.0)                         # (N, HID)
    phi = ew[:, HID:]                                                       # (N, PM1)
    delta = jnp.dot(z, w2_ref[...], preferred_element_type=jnp.float32) + b2_ref[...]  # (N, K*P)
    hproj = jnp.dot(h, w_ref[...], preferred_element_type=jnp.float32)      # (N, K*OUT)
    delta_o[...] = delta                                                    # for l_focus in glue
    delta_ik = delta + tphi_ref[...]                                        # (N, K*P)

    # ---- pairwise geometry, computed ONCE (not per kernel k) ----
    dist = phi[None, :, :] - phi[:, None, :]                                # (dst, src, PM1)
    zcount = jnp.sum((dist == 0.0).astype(jnp.float32), axis=-1)            # (N, N)
    mask = (zcount == float(PM1)).astype(jnp.float32)                       # exact self-edge mask
    dsq = jnp.sum(dist * dist, axis=-1)                                     # (N, N)
    # 1 / clamp(||[dist, mask]||, 1e-8)  (mask^2 == mask), via EUP rsqrt
    inv_norm = jax.lax.rsqrt(jnp.maximum(dsq + mask, 1e-16))                # (N, N)

    # ---- deformable attention scores, all K kernels with one MXU dot ----
    # rows stacked as r = k*N + j  (kernel-major, destination node j)
    dp_stack = jnp.concatenate(
        [delta_ik[:, k * P:k * P + PM1] for k in range(K)], axis=0)         # (K*N, PM1)
    dm_stack = jnp.concatenate(
        [delta_ik[:, k * P + PM1:(k + 1) * P] for k in range(K)], axis=0)   # (K*N, 1)
    phi_t = jnp.tile(phi, (K, 1))                                           # (K*N, PM1)
    mask_t = jnp.tile(mask, (K, 1))                                         # (K*N, N)
    inv_t = jnp.tile(inv_norm, (K, 1))                                      # (K*N, N)
    edge_t = jnp.tile(adj, (K, 1)) > 0.0                                    # (K*N, N)

    # s_all[kN+j, i] = delta_ik[j,k,:PM1] . phi[i]   (dp_stack @ phi.T, MXU)
    s_all = jax.lax.dot_general(dp_stack, phi, (((1,), (1,)), ((), ())),
                                preferred_element_type=jnp.float32)         # (K*N, N)
    # rowterm[kN+j] = delta_ik[j,k,:PM1] . phi[j]
    rowterm = jnp.sum(dp_stack * phi_t, axis=1, keepdims=True)              # (K*N, 1)
    a_all = (s_all - rowterm + mask_t * dm_stack) * inv_t                   # (K*N, N)

    # ---- batched masked edge-softmax over incoming edges (source axis) ----
    a_m = jnp.where(edge_t, a_all, -1e30)
    m = jnp.max(a_m, axis=1, keepdims=True)
    pexp = jnp.where(edge_t, jnp.exp(a_m - m), 0.0)
    ssum = jnp.sum(pexp, axis=1, keepdims=True)
    att_all = pexp / jnp.where(ssum == 0.0, 1.0, ssum)                      # (K*N, N)

    # ---- aggregation: one MXU dot over the concatenated (kernel, src) axis ----
    att_cat = jnp.concatenate(
        [att_all[k * N:(k + 1) * N, :] for k in range(K)], axis=1)          # (N, K*N)
    h_stack = jnp.concatenate(
        [hproj[:, k * OUT:(k + 1) * OUT] for k in range(K)], axis=0)        # (K*N, OUT)
    out = jnp.dot(att_cat, h_stack, preferred_element_type=jnp.float32) + bias_ref[...]
    out_ref[...] = out * jax.lax.rsqrt(
        jnp.maximum(jnp.sum(out * out, axis=1, keepdims=True), 1e-16))


# --------------------------------------------------------------------------
# Full forward (single Pallas kernel + thin glue)
# --------------------------------------------------------------------------
def deformable_gconv_forward(h_l, e_l, adj, W_phi, W1, b1, W2, b2, W, bias2d, tilde_phi):
    tilde_norm = tilde_phi / jnp.linalg.norm(tilde_phi, axis=1, keepdims=True)   # (K, P)
    tphi_row = tilde_norm.reshape(1, K * P)
    W_e = jnp.concatenate([W1, W_phi], axis=1)        # fused e-path weights (RAW, HID+PM1)

    # Single invocation, no grid: every array (a few KB total) lives whole in VMEM,
    # so all intermediates stay on-chip and there is one kernel launch.
    h_out, delta_flat = pl.pallas_call(
        _fused_kernel,
        out_shape=(
            jax.ShapeDtypeStruct((N, OUT), jnp.float32),
            jax.ShapeDtypeStruct((N, K * P), jnp.float32),
        ),
    )(e_l, h_l, adj, W_e, b1, W2, b2, W, bias2d, tphi_row)

    # loss scalars: tiny reductions on params / the small delta output (glue)
    delta_k = delta_flat.reshape(N, K, P)
    tpk = tilde_norm[None]                                                        # (1, K, P)
    l_sep = 0.0
    for kern in range(K):
        diff = tpk[:, kern:kern + 1, :] - tpk
        l_sep = l_sep + jnp.mean(jnp.sum(diff * diff, axis=2))
    l_focus = jnp.mean(jnp.sum(delta_k * delta_k, axis=2))
    return h_out, l_sep, l_focus


# --------------------------------------------------------------------------
# Pure-JAX reference (mirrors the PyTorch/DGL forward)
# --------------------------------------------------------------------------
def reference_forward(h_l, e_l, adj, W_phi, W1, b1, W2, b2, W, bias2d, tilde_phi):
    hproj = (h_l @ W).reshape(N, K, OUT)
    phi = e_l @ W_phi
    delta_k = (jnp.maximum(e_l @ W1 + b1, 0.0) @ W2 + b2).reshape(N, K, P)
    tilde_norm = tilde_phi / jnp.linalg.norm(tilde_phi, axis=1, keepdims=True)
    delta_ik = tilde_norm[None] + delta_k                                  # (N_dst, K, P)
    dist = phi[None, :, :] - phi[:, None, :]                               # (dst, src, PM1)
    mask = jnp.all(dist == 0.0, axis=-1)
    dist_full = jnp.concatenate([dist, mask[..., None].astype(jnp.float32)], axis=-1)
    dn = jnp.maximum(jnp.linalg.norm(dist_full, axis=-1, keepdims=True), 1e-8)
    dist_hat = dist_full / dn
    a = jnp.einsum('jip,jkp->jik', dist_hat, delta_ik)                     # (dst, src, K)
    edge = adj[:, :, None] > 0.0
    a_m = jnp.where(edge, a, -1e30)
    m = jnp.max(a_m, axis=1, keepdims=True)
    pexp = jnp.where(edge, jnp.exp(a_m - m), 0.0)
    s = jnp.sum(pexp, axis=1, keepdims=True)
    att = pexp / jnp.where(s == 0.0, 1.0, s)
    agg = jnp.einsum('jik,ikd->jkd', att, hproj)
    out = agg.sum(1) + bias2d
    out = out / jnp.maximum(jnp.linalg.norm(out, axis=1, keepdims=True), 1e-8)
    tpk = tilde_norm[None]
    l_sep = 0.0
    for kern in range(K):
        diff = tpk[:, kern:kern + 1, :] - tpk
        l_sep = l_sep + jnp.mean(jnp.sum(diff * diff, axis=2))
    l_focus = jnp.mean(jnp.sum(delta_k * delta_k, axis=2))
    return out, l_sep, l_focus


if __name__ == "__main__":
    # full f32 for the plain-JAX reference dots so both paths agree to ~1e-6
    jax.config.update("jax_default_matmul_precision", "highest")

    key = jax.random.PRNGKey(0)
    ks = jax.random.split(key, 10)

    def xavier(k, shape, gain=1.0):
        fan_in, fan_out = shape
        std = gain * (2.0 / (fan_in + fan_out)) ** 0.5
        return std * jax.random.normal(k, shape, jnp.float32)

    relu_gain = 2.0 ** 0.5
    W_phi = xavier(ks[0], (RAW, PM1), relu_gain)
    W1 = xavier(ks[1], (RAW, HID))                  # delta_mlp[0] weight, stored (in, out)
    b1 = 0.01 * jax.random.normal(ks[2], (1, HID), jnp.float32)
    W2 = xavier(ks[3], (HID, P * K))                # delta_mlp[2] weight, stored (in, out)
    b2 = 0.01 * jax.random.normal(ks[4], (1, P * K), jnp.float32)
    W = xavier(ks[5], (HID, OUT * K), relu_gain)
    bias2d = jnp.zeros((1, OUT), jnp.float32)
    tilde_phi = jnp.eye(P, dtype=jnp.float32)[-K:]  # n_kernels <= phi_dim branch

    # inputs: node features + deterministic graph (self loops + random edges)
    h_l = jax.random.normal(ks[6], (N, HID), jnp.float32)
    e_l = jax.random.normal(ks[7], (N, RAW), jnp.float32)
    rnd = jax.random.uniform(ks[8], (N, N)) < 0.3
    adj = jnp.logical_or(rnd, jnp.eye(N, dtype=bool)).astype(jnp.float32)   # adj[dst, src]

    out, l_sep, l_focus = deformable_gconv_forward(
        h_l, e_l, adj, W_phi, W1, b1, W2, b2, W, bias2d, tilde_phi)
    jax.block_until_ready(out)

    ref_out, ref_sep, ref_focus = reference_forward(
        h_l, e_l, adj, W_phi, W1, b1, W2, b2, W, bias2d, tilde_phi)

    assert jnp.allclose(out, ref_out, rtol=1e-4, atol=1e-4), "h_l mismatch"
    assert jnp.allclose(l_sep, ref_sep, rtol=1e-4, atol=1e-4), "l_sep mismatch"
    assert jnp.allclose(l_focus, ref_focus, rtol=1e-4, atol=1e-4), "l_focus mismatch"
    print("KERNEL_OK")
</pallas_src>

<mosaic_0001>
module attributes {stable_mosaic.version = 11 : i64} {
  func.func @_fused_kernel(%arg0: memref<16x8xf32, #tpu.memory_space<vmem>>, %arg1: memref<16x32xf32, #tpu.memory_space<vmem>>, %arg2: memref<16x16xf32, #tpu.memory_space<vmem>>, %arg3: memref<8x39xf32, #tpu.memory_space<vmem>>, %arg4: memref<1x32xf32, #tpu.memory_space<vmem>>, %arg5: memref<32x32xf32, #tpu.memory_space<vmem>>, %arg6: memref<1x32xf32, #tpu.memory_space<vmem>>, %arg7: memref<32x64xf32, #tpu.memory_space<vmem>>, %arg8: memref<1x16xf32, #tpu.memory_space<vmem>>, %arg9: memref<1x32xf32, #tpu.memory_space<vmem>>, %arg10: memref<16x16xf32, #tpu.memory_space<vmem>>, %arg11: memref<16x32xf32, #tpu.memory_space<vmem>>) attributes {dimension_semantics = [], scalar_prefetch = 0 : i64, scratch_operands = 0 : i64, tpu.core_type = #tpu.core_type<tc>} {
    %c0 = arith.constant 0 : index
    %c0_0 = arith.constant 0 : index
    %0 = vector.load %arg0[%c0, %c0_0] : memref<16x8xf32, #tpu.memory_space<vmem>>, vector<16x8xf32>
    %c0_1 = arith.constant 0 : index
    %c0_2 = arith.constant 0 : index
    %1 = vector.load %arg1[%c0_1, %c0_2] : memref<16x32xf32, #tpu.memory_space<vmem>>, vector<16x32xf32>
    %c0_3 = arith.constant 0 : index
    %c0_4 = arith.constant 0 : index
    %2 = vector.load %arg2[%c0_3, %c0_4] : memref<16x16xf32, #tpu.memory_space<vmem>>, vector<16x16xf32>
    %c0_5 = arith.constant 0 : index
    %c0_6 = arith.constant 0 : index
    %3 = vector.load %arg3[%c0_5, %c0_6] : memref<8x39xf32, #tpu.memory_space<vmem>>, vector<8x39xf32>
    %cst = arith.constant dense<0.000000e+00> : vector<16x39xf32>
    %4 = tpu.matmul %0, %3, %cst {dimension_numbers = #tpu.dot_dimension_numbers<[1], [0], [0], [1], [0, 0, 1, 1], [], []>, precision = #tpu.contract_precision<fp32>} : vector<16x8xf32>, vector<8x39xf32>, vector<16x39xf32> -> vector<16x39xf32>
    %5 = vector.extract_strided_slice %4 {offsets = [0, 0], sizes = [16, 32], strides = [1, 1]} : vector<16x39xf32> to vector<16x32xf32>
    %c0_7 = arith.constant 0 : index
    %c0_8 = arith.constant 0 : index
    %6 = vector.load %arg4[%c0_7, %c0_8] : memref<1x32xf32, #tpu.memory_space<vmem>>, vector<1x32xf32>
    %7 = vector.broadcast %6 : vector<1x32xf32> to vector<16x32xf32>
    %8 = arith.addf %5, %7 : vector<16x32xf32>
    %cst_9 = arith.constant 0.000000e+00 : f32
    %9 = vector.broadcast %cst_9 : f32 to vector<16x32xf32>
    %10 = arith.maximumf %8, %9 : vector<16x32xf32>
    %11 = vector.extract_strided_slice %4 {offsets = [0, 32], sizes = [16, 7], strides = [1, 1]} : vector<16x39xf32> to vector<16x7xf32>
    %c0_10 = arith.constant 0 : index
    %c0_11 = arith.constant 0 : index
    %12 = vector.load %arg5[%c0_10, %c0_11] : memref<32x32xf32, #tpu.memory_space<vmem>>, vector<32x32xf32>
    %cst_12 = arith.constant dense<0.000000e+00> : vector<16x32xf32>
    %13 = tpu.matmul %10, %12, %cst_12 {dimension_numbers = #tpu.dot_dimension_numbers<[1], [0], [0], [1], [0, 0, 1, 1], [], []>, precision = #tpu.contract_precision<fp32>} : vector<16x32xf32>, vector<32x32xf32>, vector<16x32xf32> -> vector<16x32xf32>
    %c0_13 = arith.constant 0 : index
    %c0_14 = arith.constant 0 : index
    %14 = vector.load %arg6[%c0_13, %c0_14] : memref<1x32xf32, #tpu.memory_space<vmem>>, vector<1x32xf32>
    %15 = vector.broadcast %14 : vector<1x32xf32> to vector<16x32xf32>
    %16 = arith.addf %13, %15 : vector<16x32xf32>
    %c0_15 = arith.constant 0 : index
    %c0_16 = arith.constant 0 : index
    %17 = vector.load %arg7[%c0_15, %c0_16] : memref<32x64xf32, #tpu.memory_space<vmem>>, vector<32x64xf32>
    %cst_17 = arith.constant dense<0.000000e+00> : vector<16x64xf32>
    %18 = tpu.matmul %1, %17, %cst_17 {dimension_numbers = #tpu.dot_dimension_numbers<[1], [0], [0], [1], [0, 0, 1, 1], [], []>, precision = #tpu.contract_precision<fp32>} : vector<16x32xf32>, vector<32x64xf32>, vector<16x64xf32> -> vector<16x64xf32>
    %c0_18 = arith.constant 0 : index
    %c0_19 = arith.constant 0 : index
    %19 = vector.load %arg11[%c0_18, %c0_19] : memref<16x32xf32, #tpu.memory_space<vmem>>, vector<16x32xf32>
    tpu.vector_store %arg11[%c0_18, %c0_19], %16 {strides = array<i32>} : memref<16x32xf32, #tpu.memory_space<vmem>>, vector<16x32xf32>,
    %c0_20 = arith.constant 0 : index
    %c0_21 = arith.constant 0 : index
    %20 = vector.load %arg9[%c0_20, %c0_21] : memref<1x32xf32, #tpu.memory_space<vmem>>, vector<1x32xf32>
    %21 = vector.broadcast %20 : vector<1x32xf32> to vector<16x32xf32>
    %22 = arith.addf %16, %21 : vector<16x32xf32>
    %23 = vector.shape_cast %11 : vector<16x7xf32> to vector<1x16x7xf32>
    %24 = vector.shape_cast %11 : vector<16x7xf32> to vector<16x1x7xf32>
    %25 = vector.broadcast %23 : vector<1x16x7xf32> to vector<16x16x7xf32>
    %26 = vector.broadcast %24 : vector<16x1x7xf32> to vector<16x16x7xf32>
    %27 = arith.subf %25, %26 : vector<16x16x7xf32>
    %cst_22 = arith.constant 0.000000e+00 : f32
    %28 = vector.broadcast %cst_22 : f32 to vector<16x16x7xf32>
    %29 = arith.cmpf oeq, %27, %28 : vector<16x16x7xf32>
    %30 = arith.extui %29 : vector<16x16x7xi1> to vector<16x16x7xi32>
    %31 = arith.sitofp %30 : vector<16x16x7xi32> to vector<16x16x7xf32>
    %cst_23 = arith.constant dense<0.000000e+00> : vector<16x16xf32>
    %32 = vector.multi_reduction <add>, %31, %cst_23 [2] : vector<16x16x7xf32> to vector<16x16xf32>
    %cst_24 = arith.constant 7.000000e+00 : f32
    %33 = vector.broadcast %cst_24 : f32 to vector<16x16xf32>
    %34 = arith.cmpf oeq, %32, %33 : vector<16x16xf32>
    %35 = arith.extui %34 : vector<16x16xi1> to vector<16x16xi32>
    %36 = arith.sitofp %35 : vector<16x16xi32> to vector<16x16xf32>
    %37 = arith.mulf %27, %27 : vector<16x16x7xf32>
    %cst_25 = arith.constant dense<0.000000e+00> : vector<16x16xf32>
    %38 = vector.multi_reduction <add>, %37, %cst_25 [2] : vector<16x16x7xf32> to vector<16x16xf32>
    %39 = arith.addf %38, %36 : vector<16x16xf32>
    %cst_26 = arith.constant 1.000000e-16 : f32
    %40 = vector.broadcast %cst_26 : f32 to vector<16x16xf32>
    %41 = arith.maximumf %39, %40 : vector<16x16xf32>
    %42 = math.rsqrt %41 : vector<16x16xf32>
    %43 = vector.extract_strided_slice %22 {offsets = [0, 0], sizes = [16, 7], strides = [1, 1]} : vector<16x32xf32> to vector<16x7xf32>
    %44 = vector.extract_strided_slice %22 {offsets = [0, 8], sizes = [16, 7], strides = [1, 1]} : vector<16x32xf32> to vector<16x7xf32>
    %45 = vector.extract_strided_slice %22 {offsets = [0, 16], sizes = [16, 7], strides = [1, 1]} : vector<16x32xf32> to vector<16x7xf32>
    %46 = vector.extract_strided_slice %22 {offsets = [0, 24], sizes = [16, 7], strides = [1, 1]} : vector<16x32xf32> to vector<16x7xf32>
    %47 = tpu.concatenate %43, %44, %45, %46 in 0 : vector<16x7xf32>, vector<16x7xf32>, vector<16x7xf32>, vector<16x7xf32> -> vector<64x7xf32>
    %48 = vector.extract_strided_slice %22 {offsets = [0, 7], sizes = [16, 1], strides = [1, 1]} : vector<16x32xf32> to vector<16x1xf32>
    %49 = vector.extract_strided_slice %22 {offsets = [0, 15], sizes = [16, 1], strides = [1, 1]} : vector<16x32xf32> to vector<16x1xf32>
    %50 = vector.extract_strided_slice %22 {offsets = [0, 23], sizes = [16, 1], strides = [1, 1]} : vector<16x32xf32> to vector<16x1xf32>
    %51 = vector.extract_strided_slice %22 {offsets = [0, 31], sizes = [16, 1], strides = [1, 1]} : vector<16x32xf32> to vector<16x1xf32>
    %52 = tpu.concatenate %48, %49, %50, %51 in 0 : vector<16x1xf32>, vector<16x1xf32>, vector<16x1xf32>, vector<16x1xf32> -> vector<64x1xf32>
    %53 = tpu.concatenate %11, %11, %11, %11 in 0 : vector<16x7xf32>, vector<16x7xf32>, vector<16x7xf32>, vector<16x7xf32> -> vector<64x7xf32>
    %54 = tpu.concatenate %36, %36, %36, %36 in 0 : vector<16x16xf32>, vector<16x16xf32>, vector<16x16xf32>, vector<16x16xf32> -> vector<64x16xf32>
    %55 = tpu.concatenate %42, %42, %42, %42 in 0 : vector<16x16xf32>, vector<16x16xf32>, vector<16x16xf32>, vector<16x16xf32> -> vector<64x16xf32>
    %56 = tpu.concatenate %2, %2, %2, %2 in 0 : vector<16x16xf32>, vector<16x16xf32>, vector<16x16xf32>, vector<16x16xf32> -> vector<64x16xf32>
    %cst_27 = arith.constant 0.000000e+00 : f32
    %57 = vector.broadcast %cst_27 : f32 to vector<64x16xf32>
    %58 = arith.cmpf ogt, %56, %57 : vector<64x16xf32>
    %cst_28 = arith.constant dense<0.000000e+00> : vector<64x16xf32>
    %59 = tpu.matmul %47, %11, %cst_28 {dimension_numbers = #tpu.dot_dimension_numbers<[1], [1], [0], [0], [0, 0, 1, 0], [], []>, precision = #tpu.contract_precision<fp32>} : vector<64x7xf32>, vector<16x7xf32>, vector<64x16xf32> -> vector<64x16xf32>
    %60 = arith.mulf %47, %53 : vector<64x7xf32>
    %cst_29 = arith.constant dense<0.000000e+00> : vector<64xf32>
    %61 = vector.multi_reduction <add>, %60, %cst_29 [1] : vector<64x7xf32> to vector<64xf32>
    %62 = vector.shape_cast %61 : vector<64xf32> to vector<64x1xf32>
    %63 = vector.broadcast %62 : vector<64x1xf32> to vector<64x16xf32>
    %64 = arith.subf %59, %63 : vector<64x16xf32>
    %65 = vector.broadcast %52 : vector<64x1xf32> to vector<64x16xf32>
    %66 = arith.mulf %54, %65 : vector<64x16xf32>
    %67 = arith.addf %64, %66 : vector<64x16xf32>
    %68 = arith.mulf %67, %55 : vector<64x16xf32>
    %cst_30 = arith.constant -1.000000e+30 : f32
    %69 = vector.broadcast %cst_30 : f32 to vector<64x16xf32>
    %70 = arith.select %58, %68, %69 : vector<64x16xi1>, vector<64x16xf32>
    %cst_31 = arith.constant dense<0xFF800000> : vector<64xf32>
    %71 = vector.multi_reduction <maximumf>, %70, %cst_31 [1] : vector<64x16xf32> to vector<64xf32>
    %72 = vector.shape_cast %71 : vector<64xf32> to vector<64x1xf32>
    %73 = vector.broadcast %72 : vector<64x1xf32> to vector<64x16xf32>
    %74 = arith.subf %70, %73 : vector<64x16xf32>
    %75 = math.exp %74 : vector<64x16xf32>
    %cst_32 = arith.constant 0.000000e+00 : f32
    %76 = vector.broadcast %cst_32 : f32 to vector<64x16xf32>
    %77 = arith.select %58, %75, %76 : vector<64x16xi1>, vector<64x16xf32>
    %cst_33 = arith.constant dense<0.000000e+00> : vector<64xf32>
    %78 = vector.multi_reduction <add>, %77, %cst_33 [1] : vector<64x16xf32> to vector<64xf32>
    %79 = vector.shape_cast %78 : vector<64xf32> to vector<64x1xf32>
    %cst_34 = arith.constant 0.000000e+00 : f32
    %80 = vector.broadcast %cst_34 : f32 to vector<64x1xf32>
    %81 = arith.cmpf oeq, %79, %80 : vector<64x1xf32>
    %cst_35 = arith.constant 1.000000e+00 : f32
    %82 = vector.broadcast %cst_35 : f32 to vector<64x1xf32>
    %83 = arith.select %81, %82, %79 : vector<64x1xi1>, vector<64x1xf32>
    %84 = vector.broadcast %83 : vector<64x1xf32> to vector<64x16xf32>
    %85 = arith.divf %77, %84 : vector<64x16xf32>
    %86 = vector.extract_strided_slice %85 {offsets = [0, 0], sizes = [16, 16], strides = [1, 1]} : vector<64x16xf32> to vector<16x16xf32>
    %87 = vector.extract_strided_slice %85 {offsets = [16, 0], sizes = [16, 16], strides = [1, 1]} : vector<64x16xf32> to vector<16x16xf32>
    %88 = vector.extract_strided_slice %85 {offsets = [32, 0], sizes = [16, 16], strides = [1, 1]} : vector<64x16xf32> to vector<16x16xf32>
    %89 = vector.extract_strided_slice %85 {offsets = [48, 0], sizes = [16, 16], strides = [1, 1]} : vector<64x16xf32> to vector<16x16xf32>
    %90 = tpu.concatenate %86, %87, %88, %89 in 1 : vector<16x16xf32>, vector<16x16xf32>, vector<16x16xf32>, vector<16x16xf32> -> vector<16x64xf32>
    %91 = vector.extract_strided_slice %18 {offsets = [0, 0], sizes = [16, 16], strides = [1, 1]} : vector<16x64xf32> to vector<16x16xf32>
    %92 = vector.extract_strided_slice %18 {offsets = [0, 16], sizes = [16, 16], strides = [1, 1]} : vector<16x64xf32> to vector<16x16xf32>
    %93 = vector.extract_strided_slice %18 {offsets = [0, 32], sizes = [16, 16], strides = [1, 1]} : vector<16x64xf32> to vector<16x16xf32>
    %94 = vector.extract_strided_slice %18 {offsets = [0, 48], sizes = [16, 16], strides = [1, 1]} : vector<16x64xf32> to vector<16x16xf32>
    %95 = tpu.concatenate %91, %92, %93, %94 in 0 : vector<16x16xf32>, vector<16x16xf32>, vector<16x16xf32>, vector<16x16xf32> -> vector<64x16xf32>
    %cst_36 = arith.constant dense<0.000000e+00> : vector<16x16xf32>
    %96 = tpu.matmul %90, %95, %cst_36 {dimension_numbers = #tpu.dot_dimension_numbers<[1], [0], [0], [1], [0, 0, 1, 1], [], []>, precision = #tpu.contract_precision<fp32>} : vector<16x64xf32>, vector<64x16xf32>, vector<16x16xf32> -> vector<16x16xf32>
    %c0_37 = arith.constant 0 : index
    %c0_38 = arith.constant 0 : index
    %97 = vector.load %arg8[%c0_37, %c0_38] : memref<1x16xf32, #tpu.memory_space<vmem>>, vector<1x16xf32>
    %98 = vector.broadcast %97 : vector<1x16xf32> to vector<16x16xf32>
    %99 = arith.addf %96, %98 : vector<16x16xf32>
    %100 = arith.mulf %99, %99 : vector<16x16xf32>
    %cst_39 = arith.constant dense<0.000000e+00> : vector<16xf32>
    %101 = vector.multi_reduction <add>, %100, %cst_39 [1] : vector<16x16xf32> to vector<16xf32>
    %102 = vector.shape_cast %101 : vector<16xf32> to vector<16x1xf32>
    %cst_40 = arith.constant 1.000000e-16 : f32
    %103 = vector.broadcast %cst_40 : f32 to vector<16x1xf32>
    %104 = arith.maximumf %102, %103 : vector<16x1xf32>
    %105 = math.rsqrt %104 : vector<16x1xf32>
    %106 = vector.broadcast %105 : vector<16x1xf32> to vector<16x16xf32>
    %107 = arith.mulf %99, %106 : vector<16x16xf32>
    %c0_41 = arith.constant 0 : index
    %c0_42 = arith.constant 0 : index
    %108 = vector.load %arg10[%c0_41, %c0_42] : memref<16x16xf32, #tpu.memory_space<vmem>>, vector<16x16xf32>
    tpu.vector_store %arg10[%c0_41, %c0_42], %107 {strides = array<i32>} : memref<16x16xf32, #tpu.memory_space<vmem>>, vector<16x16xf32>,
    return
  }
}

</mosaic_0001>

<bundles_post_ra>
// kernel: tpu_custom_call.1
= control target key start
LH: loop header
LB: loop body
LE: loop exit
PB: predicated region body
PF: predicated region fallthrough
CT: control target
= control target key end

     0   :  { %17 = vsyncpa [#allocation3], 0  ;;  %s7628_s0 = inlined_call_operand.vmem [shape: f32[16,8], index: 0, kind: input, shape index: {}]   ;;  %s7629_s1 = inlined_call_operand.hbm [shape: f32[16,32], index: 1, kind: input, shape index: {}]   ;;  %s7630_s2 = inlined_call_operand.hbm [shape: f32[16,16], index: 2, kind: input, shape index: {}]   ;;  %s7631_s3 = inlined_call_operand.hbm [shape: f32[8,39], index: 3, kind: input, shape index: {}]   ;;  %s7632_s4 = inlined_call_operand.vmem [shape: f32[1,32], index: 4, kind: input, shape index: {}]   ;;  %s7633_s5 = inlined_call_operand.vmem [shape: f32[32,32], index: 5, kind: input, shape index: {}]   ;;  %s7634_s6 = inlined_call_operand.vmem [shape: f32[1,32], index: 6, kind: input, shape index: {}]   ;;  %s7635_s7 = inlined_call_operand.hbm [shape: f32[32,64], index: 7, kind: input, shape index: {}]   ;;  %s7636_s8 = inlined_call_operand.vmem [shape: f32[1,16], index: 8, kind: input, shape index: {}]   ;;  %s7637_s9 = inlined_call_operand.vmem [shape: f32[1,32], index: 9, kind: input, shape index: {}]   ;;  %s7638_s10 = inlined_call_operand.hbm [shape: f32[16,16], index: 10, kind: output, shape index: {0}]   ;;  %s7639_s11 = inlined_call_operand.hbm [shape: f32[16,32], index: 11, kind: output, shape index: {1}]  }
   0x1   :  { %18 = vsyncpa [#allocation6], 0 }
   0x2   :  { %19 = vsyncpa [#allocation9], 0 }
   0x3   :  { %20 = vsyncpa [#allocation4], 0 }
   0x4   :  { %21 = vsyncpa [#allocation12], 0  ;;  %s5779_s17 = smov [#allocation5]   ;;  %s5780_s19 = smov [#allocation2]  }
   0x5   :  { %s41_s18 = sshll.u32 %s5779_s17, 4  ;;  %s29_s20 = sshll.u32 %s5780_s19, 4  ;;  %s42_s18 = int_to_ptr.vmem [resolvable:$true] %s41_s18  ;;  %s30_s20 = int_to_ptr.vmem [resolvable:$true] %s29_s20 }
   0x6   :  { %s5657_s21 = scalar_lea.vmem %s42_s18, 256  ;;  %p5662_p1 = scmp.lt.s32.totalorder %s42_s18, %s42_s18 }
   0x7   :  { %p5658_p0 = scmp.ne.s32.totalorder %s42_s18, %s5657_s21  ;;  %p5663_p2 = scmp.lt.s32.totalorder %s5657_s21, %s5657_s21 }
   0x9   :  { %p5664_p3 = por %p5663_p2, %p5662_p1 }
   0xb   :  { %p5665_p4 = pnand %p5664_p3, %p5658_p0 }
   0xd   :  { %5668 = shalt.err (!%p5665_p4)
}
   0xe   :  { %s5781_s22 = smov 128   ;;  %s5782_s23 = smov 8  }
   0xf   :  { %47 = dma.hbm_to_vmem [thread:$0]  %s7630_s2, 256, %s42_s18, [#allocation6], %s5781_s22, %s5781_s22, %s5782_s23  }
  0x10   :  { %s5677_s26 = scalar_lea.vmem %s30_s20, 256  ;;  %p5682_p6 = scmp.lt.s32.totalorder %s30_s20, %s30_s20 }
  0x11   :  { %p5678_p5 = scmp.ne.s32.totalorder %s30_s20, %s5677_s26  ;;  %p5683_p7 = scmp.lt.s32.totalorder %s5677_s26, %s5677_s26 }
  0x13   :  { %p5684_p8 = por %p5683_p7, %p5682_p6 }
  0x15   :  { %p5685_p9 = pnand %p5684_p8, %p5678_p5 }
  0x17   :  { %5688 = shalt.err (!%p5685_p9)
}
  0x18   :  { %35 = dma.hbm_to_vmem [thread:$0]  %s7629_s1, 256, %s30_s20, [#allocation3], %s5781_s22, %s5781_s22, %s5782_s23  }
  0x19   :  { %s5783_s29 = smov [#allocation7]   ;;  %s5784_s12 = smov [#allocation8]  }
  0x1a   :  { %s54_s30 = sshll.u32 %s5783_s29, 4  ;;  %s69_s13 = sshll.u32 %s5784_s12, 4  ;;  %s55_s30 = int_to_ptr.vmem [resolvable:$true] %s54_s30  ;;  %s70_s13 = int_to_ptr.vmem [resolvable:$true] %s69_s13 }
  0x1b   :  { %s5697_s2 = scalar_lea.vmem %s55_s30, 128  ;;  %p5702_p11 = scmp.lt.s32.totalorder %s55_s30, %s55_s30 }
  0x1c   :  { %p5698_p10 = scmp.ne.s32.totalorder %s55_s30, %s5697_s2  ;;  %p5703_p12 = scmp.lt.s32.totalorder %s5697_s2, %s5697_s2 }
  0x1e   :  { %p5704_p13 = por %p5703_p12, %p5702_p11 }
  0x20   :  { %p5705_p0 = pnand %p5704_p13, %p5698_p10 }
  0x22   :  { %5708 = shalt.err (!%p5705_p0)
}
  0x23   :  { %57 = dma.hbm_to_vmem [thread:$0]  %s7631_s3, 128, %s55_s30, [#allocation6]  }
  0x24   :  { %s5717_s16 = scalar_lea.vmem %s70_s13, 512  ;;  %p5722_p2 = scmp.lt.s32.totalorder %s70_s13, %s70_s13 }
  0x25   :  { %p5718_p1 = scmp.ne.s32.totalorder %s70_s13, %s5717_s16  ;;  %p5723_p3 = scmp.lt.s32.totalorder %s5717_s16, %s5717_s16 }
  0x27   :  { %p5724_p4 = por %p5723_p3, %p5722_p2 }
  0x29   :  { %p5725_p5 = pnand %p5724_p4, %p5718_p1 }
  0x2b   :  { %5728 = shalt.err (!%p5725_p5)
}
  0x2c   :  { %75 = dma.hbm_to_vmem [thread:$0]  %s7635_s7, 512, %s70_s13, [#allocation9], %s5781_s22, %s5781_s22, %s5782_s23  }
  0x2d   :  { %5769 = dma.done.wait [#allocation3], 256  }
  0x2e   :  { %5770 = vsyncadd [#allocation3], 4294967040 }
  0x2f   :  { %5771 = dma.done.wait [#allocation6], 384  }
  0x30   :  { %5772 = vsyncadd [#allocation6], 4294966912 }
  0x31   :  { %5773 = dma.done.wait [#allocation9], 512  }
  0x32   :  { %5774 = vsyncadd [#allocation9], 4294966784  ;;  %vm99_vm0 = vcmask 64512   ;;  %v98_v0 = vld [vmem:[#allocation7] sm:$0xff]  ;;  %v93_v2 = vld [vmem:[%s7628_s0 + $0x8] sm:$0xff]  ;;  %v1707_v44 = vlaneseq  ;;  %s5786_s30 = smov 96  }
  0x33   :  { %v92_v1 = vld [vmem:[%s7628_s0] sm:$0xff]  ;;  %v137_v3 = vand.u32 4294901760, %v98_v0  ;;  %v104_v5 = vsel %vm99_vm0, %v93_v2, 0  ;;  %v609_v20 = vld [vmem:[%s7633_s5 + $0x18] sm:$0xff]  ;;  %v608_v22 = vld [vmem:[%s7633_s5 + $0x10] sm:$0xff]  ;;  %vm617_vm1 = vcmask 261120  }
  0x34   :  { %v101_v4 = vsel %vm99_vm0, %v92_v1, 0  ;;  %v182_v7 = vand.u32 4294901760, %v104_v5  ;;  %v5888_v21 = vand.u32 4294901760, %v609_v20  ;;  %v5896_v24 = vand.u32 4294901760, %v608_v22  ;;  %v607_v25 = vld [vmem:[%s7633_s5 + $0x8] sm:$0xff]  ;;  %v606_v29 = vld [vmem:[%s7633_s5] sm:$0xff] }
  0x35   :  { %v172_v6 = vand.u32 4294901760, %v101_v4  ;;  %5076 = vmatprep.subr.mxu0 %v137_v3  ;;  %v224_v8 = vsub.f32 %v98_v0, %v137_v3  ;;  %v5909_v28 = vand.u32 4294901760, %v607_v25  ;;  %v5924_v33 = vand.u32 4294901760, %v606_v29  ;;  %s5788_s2 = smov 120   ;;  %s5790_s14 = smov 104  }
  0x36   :  { %5077 = vmatpush3.msra.mxu0 %v137_v3  ;;  %v183_v10 = vsub.f32 %v104_v5, %v182_v7  ;;  %v5894_v23 = vsub.f32 %v609_v20, %v5888_v21  ;;  %v5907_v27 = vsub.f32 %v608_v22, %v5896_v24  ;;  %v1708_v45 = vshrl.u32 %v1707_v44, 7  ;;  %s5792_s15 = smov 80   ;;  %s5793_s16 = smov 16  }
  0x37   :  { %v173_v9 = vsub.f32 %v101_v4, %v172_v6  ;;  %5083 = vmatprep.mubr.f32.mxu1 %v172_v6  ;;  %v225_v11 = vand.u32 4294901760, %v224_v8  ;;  %5086 = vmatprep.subr.mxu0 %v224_v8  ;;  %v5922_v32 = vsub.f32 %v607_v25, %v5909_v28  ;;  %v5934_v37 = vsub.f32 %v606_v29, %v5924_v33  ;;  %s5794_s1 = smov 32   ;;  %s5795_s17 = smov 48  }
  0x38   :  { %v184_v13 = vand.u32 4294901760, %v183_v10  ;;  %v5904_v26 = vand.u32 4294901760, %v5894_v23  ;;  %v5919_v31 = vand.u32 4294901760, %v5907_v27  ;;  %v2735_v46 = vand.u32 127, %v1707_v44 }
  0x39   :  { %v174_v12 = vand.u32 4294901760, %v173_v9  ;;  %v226_v14 = vsub.f32 %v224_v8, %v225_v11  ;;  %v5931_v36 = vand.u32 4294901760, %v5922_v32  ;;  %v5941_v40 = vand.u32 4294901760, %v5934_v37 }
  0x3a   :  { %v185_v16 = vsub.f32 %v183_v10, %v184_v13  ;;  %v741_v30 = vsub.f32 %v5894_v23, %v5904_v26  ;;  %v748_v35 = vsub.f32 %v5907_v27, %v5919_v31  ;;  %v5947_v47 = vsub.s32 %v2735_v46, %v1708_v45 }
  0x3b   :  { %v175_v15 = vsub.f32 %v173_v9, %v174_v12  ;;  %v227_v17 = vand.u32 4294901760, %v226_v14  ;;  %v755_v39 = vsub.f32 %v5922_v32, %v5931_v36  ;;  %v762_v42 = vsub.f32 %v5934_v37, %v5941_v40 }
  0x3c   :  { %v186_v19 = vand.u32 4294901760, %v185_v16  ;;  %v742_v34 = vand.u32 4294901760, %v741_v30  ;;  %v749_v38 = vand.u32 4294901760, %v748_v35  ;;  %v2740_v48 = vadd.s32 4294967288, %v2735_v46 }
  0x3d   :  { %v176_v18 = vand.u32 4294901760, %v175_v15  ;;  %5081 = vmatprep.subr.mxu1 %v227_v17  ;;  %v756_v41 = vand.u32 4294901760, %v755_v39  ;;  %v763_v43 = vand.u32 4294901760, %v762_v42  ;;  %v5785_v52 = vmov 1966171168  }
  0x3e   :  { %5082 = vmatpush3.msra.mxu1 %v227_v17  ;;  %v5949_v49 = vsub.s32 %v2740_v48, %v1708_v45  ;;  %v1705_v53 = vunpack.c.l.s4 %v5785_v52  ;;  %v5964_v14 = vsub.s32 0, %v1708_v45 }
  0x3f   :  { %5078 = vmatprep.mubr.f32.mxu0 %v176_v18  ;;  %5084 = vmatmul.mubr.f32.vlgmr.msra.gmra.mxu1 %v182_v7 }
  0x40   :  { %5079 = vmatmul.mubr.f32.vlgmr.msra.gmra.mxu0 %v186_v19  ;;  %5091 = vmatprep.subr.mxu1 %v137_v3  ;;  %v1706_v61 = vunpack.c.0.s8 %v1705_v53 }
  0x41   :  { %5087 = vmatpush3.msra.mxu0 %v224_v8  ;;  %5092 = vmatpush3.msra.mxu1 %v137_v3  ;;  %v4798_v8 = vld [vmem:[%s7632_s4] ss:$0 sm:$0xff] }
  0x42   :  { %5088 = vmatprep.mubr.f32.mxu0 %v173_v9  ;;  %5093 = vmatprep.mubr.f32.mxu1 %v174_v12 }
  0x43   :  { %5096 = vmatprep.subr.mxu0 %v225_v11  ;;  %5094 = vmatmul.mubr.f32.vlgmr.msra.gmra.mxu1 %v184_v13 }
  0x44   :  { %5089 = vmatmul.mubr.f32.vlgmr.msra.gmra.mxu0 %v183_v10  ;;  %5101 = vmatprep.subr.mxu1 %v137_v3 }
  0x45   :  { %5097 = vmatpush3.msra.mxu0 %v225_v11  ;;  %5102 = vmatpush3.msra.mxu1 %v137_v3 }
  0x46   :  { %5098 = vmatprep.mubr.f32.mxu0 %v172_v6  ;;  %5103 = vmatprep.mubr.f32.mxu1 %v172_v6  ;;  %v5951_v6 = vsub.s32 %v1706_v61, %v1708_v45 }
  0x47   :  { %5104 = vmatmul.mubr.f32.vlgmr.msra.gmra.mxu1 %v182_v7  ;;  %5106 = vmatprep.subr.mxu0 %v5888_v21 }
  0x48   :  { %5099 = vmatmul.mubr.f32.vlgmr.msra.gmra.mxu0 %v182_v7  ;;  %5117 = vmatprep.subr.mxu1 %v742_v34 }
  0x49   :  { %5107 = vmatpush3.msra.mxu0 %v5888_v21  ;;  %5118 = vmatpush3.msra.mxu1 %v742_v34 }
  0x4a   :  { %5108 = vmatprep.subr.mxu0 %v5896_v24  ;;  %5119 = vmatprep.subr.mxu1 %v749_v38 }
  0x4b   :  { %5109 = vmatpush3.msra.mxu0 %v5896_v24  ;;  %5120 = vmatpush3.msra.mxu1 %v749_v38 }
  0x4c   :  { %5110 = vmatprep.subr.mxu0 %v5909_v28  ;;  %5121 = vmatprep.subr.mxu1 %v756_v41 }
  0x4d   :  { %5111 = vmatpush3.msra.mxu0 %v5909_v28  ;;  %5122 = vmatpush3.msra.mxu1 %v756_v41 }
  0x4e   :  { %5112 = vmatprep.subr.mxu0 %v5924_v33  ;;  %5123 = vmatprep.subr.mxu1 %v763_v43 }
  0x4f   :  { %5113 = vmatpush3.msra.mxu0 %v5924_v33  ;;  %5124 = vmatpush3.msra.mxu1 %v763_v43 }
  0x50   :  { %5128 = vmatprep.subr.mxu0 %v5894_v23  ;;  %5139 = vmatprep.subr.mxu1 %v5888_v21 }
  0xff   :  { %v5085_v51 = vpop.f32.mrf.mxu1 }
 0x100   :  { %v5080_v50 = vpop.f32.mrf.mxu0 }
 0x101   :  { %v264_v55 = vpop.f32.mrf.mxu1  ;;  %v271_v56 = vadd.f32 %v5085_v51, %v5080_v50  ;;  %v1155_v51 = vld [vmem:[#allocation8 + $0x18] sm:$0xff] }
 0x102   :  { %v178_v54 = vpop.f32.mrf.mxu0  ;;  %v6017_v61 = vand.u32 4294901760, %v1155_v51 }
 0x103   :  { %v5095_v58 = vpop.f32.mrf.mxu1  ;;  %v265_v59 = vadd.f32 %v264_v55, %v178_v54  ;;  %v7640_v54 = vmov 0.0  }
 0x104   :  { %v5090_v57 = vpop.f32.mrf.mxu0 }
 0x105   :  { %v352_v60 = vadd.f32 %v5090_v57, %v271_v56  ;;  %v425_v63 = vpop.f32.mrf.mxu1 }
 0x106   :  { %v344_v62 = vpop.f32.mrf.mxu0 }
 0x107   :  { %v434_v0 = vadd.f32 %v5095_v58, %v352_v60  ;;  %v345_v1 = vadd.f32 %v344_v62, %v265_v59  ;;  %v5105_v3 = vpop.f32.mrf.mxu1 }
 0x108   :  { %v5100_v2 = vpop.f32.mrf.mxu0 }
 0x109   :  { %v426_v4 = vadd.f32 %v425_v63, %v345_v1  ;;  %v514_v5 = vadd.f32 %v5100_v2, %v434_v0  ;;  %v585_v11 = vpop.f32.mrf.mxu1 }
 0x10a   :  { %v507_v7 = vpop.f32.mrf.mxu0 }
 0x10b   :  { %v5956_v9 = vadd.f32 %v5105_v3, %v514_v5  ;;  %v508_v10 = vadd.f32 %v507_v7, %v426_v4 }
 0x10d   :  { %v5958_v12 = vadd.f32 %v585_v11, %v508_v10  ;;  %3101 = vrot.lane.b32.xlu0 %v5956_v9, %s5786_s30  ;;  %v1759_v13 = vrot.slane %v5956_v9, %v5951_v6  ;;  %v603_v15 = vadd.f32 %v4798_v8, %v5956_v9  ;;  %v1752_v39 = vcombine.high %v5956_v9, %v5956_v9  ;;  %v1154_v10 = vld [vmem:[#allocation8 + $0x10] sm:$0xff]  ;;  %v94_v11 = vld [vmem:[#allocation2] sm:$0xff] }
 0x10f   :  { %v602_v16 = vadd.f32 %v4798_v8, %v5958_v12  ;;  %v1775_v17 = vrot.slane %v1759_v13, %v5951_v6  ;;  %v605_v18 = vmax.f32 %v603_v15, 0.0  ;;  %v5971_v19 = vrot.slane %v5958_v12, %v5951_v6 }
 0x110   :  { %v1767_v20 = vcombine.high %v1759_v13, %v1759_v13  ;;  %v6034_v4 = vrot.slane %v1752_v39, %v5951_v6 }
 0x111   :  { %3099 = vrot.lane.b32.xlu0 %v5958_v12, %s5786_s30  ;;  %v604_v22 = vmax.f32 %v602_v16, 0.0  ;;  %v1836_v25 = vrot.slane %v1775_v17, %v5964_v14  ;;  %v622_v29 = vsel %vm617_vm1, %v605_v18, 0  ;;  %v5979_v30 = vrot.slane %v5971_v19, %v5951_v6 }
 0x112   :  { %v5981_v34 = vand.u32 4294901760, %v622_v29  ;;  %v5984_v35 = vrot.slane %v1767_v20, %v5951_v6  ;;  %v1797_v38 = vcombine.high %v1775_v17, %v1775_v17  ;;  %v95_v20 = vld [vmem:[#allocation2 + $0x8] sm:$0xff] }
 0x113   :  { %v619_v41 = vsel %vm617_vm1, %v604_v22, 0  ;;  %v1898_v42 = vsub.f32 %v5956_v9, %v1836_v25  ;;  %v1897_v43 = vsub.f32 %v5958_v12, %v1836_v25  ;;  %v1804_v44 = vrot.slane %v5979_v30, %v5964_v14  ;;  %v1153_v25 = vld [vmem:[#allocation8 + $0x8] sm:$0xff] }
 0x114   :  { %v5993_v45 = vand.u32 4294901760, %v619_v41  ;;  %v5996_v46 = vsub.f32 %v622_v29, %v5981_v34  ;;  %v1840_v48 = vrot.slane %v5984_v35, %v5964_v14  ;;  %v1844_v50 = vrot.slane %v1797_v38, %v5964_v14 }
 0x115   :  { %v2347_v52 = vmul.f32 %v1898_v42, %v1898_v42  ;;  %vm1929_vm2 = vcmp.eq.f32.partialorder %v1897_v43, 0.0  ;;  %vm1930_vm3 = vcmp.eq.f32.partialorder %v1898_v42, 0.0  ;;  %v6002_v53 = vsub.f32 %v5958_v12, %v1804_v44  ;;  %v1152_v42 = vld [vmem:[#allocation8] sm:$0xff] }
 0x116   :  { %5125 = vmatprep.mubr.f32.mxu1 %v5993_v45  ;;  %v4817_v55 = vsel %vm1929_vm2, 1.0, %v7640_v54  ;;  %v4818_v56 = vsel %vm1930_vm3, 1.0, %v7640_v54  ;;  %v6008_v57 = vsub.f32 %v619_v41, %v5993_v45  ;;  %v6011_v58 = vsub.f32 %v5956_v9, %v1804_v44 }
 0x117   :  { %2428 = vrot.lane.b32.xlu0 %v2347_v52, %s5786_s30  ;;  %5126 = vmatmul.mubr.f32.vlgmr.msra.gmra.mxu1 %v5981_v34  ;;  %v5467_v59 = vpack.i.bf16 %v4818_v56, %v4817_v55  ;;  %vm1913_vm4 = vcmp.eq.f32.partialorder %v6002_v53, 0.0  ;;  %v705_v60 = vand.u32 4294901760, %v5996_v46  ;;  %v6024_v0 = vsub.f32 %v5958_v12, %v1840_v48 }
 0x118   :  { %5140 = vmatpush3.msra.mxu1 %v5888_v21  ;;  %v695_v62 = vand.u32 4294901760, %v6008_v57  ;;  %vm1914_vm5 = vcmp.eq.f32.partialorder %v6011_v58, 0.0  ;;  %v4801_v63 = vsel %vm1913_vm4, 1.0, %v7640_v54  ;;  %v6030_v2 = vsub.f32 %v5956_v9, %v1840_v48 }
 0x119   :  { %5141 = vmatprep.subr.mxu1 %v5896_v24  ;;  %5468 = vrot.lane.b32.xlu1 %v5467_v59, %s5786_s30  ;;  %v4802_v1 = vsel %vm1914_vm5, 1.0, %v7640_v54  ;;  %v706_v3 = vsub.f32 %v5996_v46, %v705_v60  ;;  %vm1931_vm6 = vcmp.eq.f32.partialorder %v6024_v0, 0.0  ;;  %v6040_v8 = vsub.f32 %v5958_v12, %v1844_v50 }
 0x11a   :  { %5142 = vmatpush3.msra.mxu1 %v5896_v24  ;;  %5147 = vmatprep.mubr.f32.mxu1 %v695_v62  ;;  %v5472_v5 = vpack.i.bf16 %v4802_v1, %v4801_v63  ;;  %v696_v7 = vsub.f32 %v6008_v57, %v695_v62  ;;  %v2346_v13 = vmul.f32 %v1897_v43, %v1897_v43  ;;  %vm1932_vm7 = vcmp.eq.f32.partialorder %v6030_v2, 0.0 }
 0x11b   :  { %5143 = vmatprep.subr.mxu1 %v5909_v28  ;;  %v4819_v15 = vsel %vm1931_vm6, 1.0, %v7640_v54  ;;  %v6046_v16 = vsub.f32 %v5956_v9, %v1844_v50  ;;  %v4820_v18 = vsel %vm1932_vm7, 1.0, %v7640_v54  ;;  %v6053_v22 = vand.u32 4294901760, %v1154_v10 }
 0x11c   :  { %5473 = vrot.lane.b32.xlu0 %v5472_v5, %s5786_s30  ;;  %5144 = vmatpush3.msra.mxu1 %v5909_v28  ;;  %v697_v17 = vand.u32 4294901760, %v696_v7  ;;  %v1157_v29 = vsel %vm617_vm1, %v94_v11, 0  ;;  %v6057_v38 = vsub.f32 %v1155_v51, %v6017_v61  ;;  %v5477_v39 = vpack.i.bf16 %v4820_v18, %v4819_v15 }
 0x11d   :  { %5145 = vmatprep.subr.mxu1 %v5924_v33  ;;  %2426 = vrot.lane.b32.xlu1 %v2346_v13, %s5786_s30  ;;  %v707_v41 = vand.u32 4294901760, %v706_v3  ;;  %vm1933_vm8 = vcmp.eq.f32.partialorder %v6040_v8, 0.0  ;;  %vm1934_vm9 = vcmp.eq.f32.partialorder %v6046_v16, 0.0  ;;  %v6065_v43 = vrot.slane %v6034_v4, %v5951_v6 }
 0x11e   :  { %5146 = vmatpush3.msra.mxu1 %v5924_v33  ;;  %5114 = vmatprep.mubr.f32.mxu0 %v697_v17  ;;  %v1718_v44 = vcombine.high %v5971_v19, %v5971_v19  ;;  %v1703_v48 = vcombine.high %v5958_v12, %v5958_v12  ;;  %v1160_v50 = vsel %vm617_vm1, %v95_v20, 0  ;;  %v6073_v51 = vand.u32 4294901760, %v1153_v25 }
 0x11f   :  { %5148 = vmatmul.mubr.f32.vlgmr.msra.gmra.mxu1 %v705_v60  ;;  %5161 = vmatprep.subr.mxu1 %v5888_v21  ;;  %v6075_v52 = vand.u32 4294901760, %v1157_v29  ;;  %v4821_v55 = vsel %vm1933_vm8, 1.0, %v7640_v54  ;;  %v4822_v19 = vsel %vm1934_vm9, 1.0, %v7640_v54  ;;  %v6084_v59 = vand.u32 4294901760, %v1152_v42 }
 0x120   :  { %5478 = vrot.lane.b32.xlu0 %v5477_v39, %s5786_s30  ;;  %5115 = vmatmul.mubr.f32.vlgmr.msra.gmra.mxu0 %v707_v41  ;;  %v6082_v56 = vrot.slane %v1718_v44, %v5951_v6  ;;  %v2330_v60 = vmul.f32 %v6002_v53, %v6002_v53  ;;  %v1852_v62 = vrot.slane %v6065_v43, %v5964_v14 }
 0x121   :  { %5129 = vmatpush3.msra.mxu0 %v5894_v23  ;;  %5162 = vmatpush3.msra.mxu1 %v5888_v21  ;;  %v6091_v23 = vand.u32 4294901760, %v6057_v38  ;;  %v6093_v21 = vand.u32 4294901760, %v1160_v50  ;;  %v6100_v63 = vrot.slane %v1703_v48, %v5951_v6  ;;  %v6103_v1 = vsub.f32 %v1154_v10, %v6053_v22 }
 0x122   :  { %5169 = vmatprep.mubr.f32.mxu1 %v5993_v45  ;;  %5130 = vmatprep.subr.mxu0 %v5907_v27  ;;  %v5482_v53 = vpack.i.bf16 %v4822_v19, %v4821_v55  ;;  %v6108_v3 = vsub.f32 %v1157_v29, %v6075_v52  ;;  %v1808_v5 = vrot.slane %v6082_v56, %v5964_v14 }
 0x123   :  { %5136 = vmatprep.mubr.f32.mxu0 %v6008_v57  ;;  %5163 = vmatprep.subr.mxu1 %v5896_v24  ;;  %v6111_v57 = vsub.f32 %v1153_v25, %v6073_v51  ;;  %v6118_v7 = vsub.f32 %v1152_v42, %v6084_v59  ;;  %v1279_v10 = vsub.f32 %v6057_v38, %v6091_v23 }
 0x124   :  { %2394 = vrot.lane.b32.xlu1 %v2330_v60, %s5786_s30  ;;  %5131 = vmatpush3.msra.mxu0 %v5907_v27  ;;  %v1748_v27 = vcombine.high %v5979_v30, %v5979_v30  ;;  %v2348_v11 = vmul.f32 %v6024_v0, %v6024_v0  ;;  %v1905_v13 = vsub.f32 %v5958_v12, %v1852_v62  ;;  %v6139_v30 = vand.u32 4294901760, %v6103_v1 }
 0x125   :  { %5164 = vmatpush3.msra.mxu1 %v5896_v24  ;;  %5132 = vmatprep.subr.mxu0 %v5922_v32  ;;  %v6127_v24 = vsub.f32 %v1160_v50, %v6093_v21  ;;  %v6136_v15 = vrot.slane %v6100_v63, %v5951_v6  ;;  %v6148_v0 = vand.u32 4294901760, %v6111_v57  ;;  %v6153_v17 = vsub.f32 %v5958_v12, %v1808_v5 }
 0x126   :  { %5165 = vmatprep.subr.mxu1 %v5909_v28  ;;  %5483 = vrot.lane.b32.xlu0 %v5482_v53, %s5786_s30  ;;  %v6156_v18 = vsub.f32 %v5956_v9, %v1808_v5  ;;  %v2331_v20 = vmul.f32 %v6011_v58, %v6011_v58  ;;  %v1812_v25 = vrot.slane %v1748_v27, %v5964_v14  ;;  %v6165_v39 = vand.u32 4294901760, %v6118_v7 }
 0x127   :  { %5133 = vmatpush3.msra.mxu0 %v5922_v32  ;;  %5166 = vmatpush3.msra.mxu1 %v5909_v28  ;;  %v6144_v32 = vsub.f32 %v5956_v9, %v1852_v62  ;;  %v1233_v28 = vand.u32 4294901760, %v6108_v3  ;;  %v1243_v29 = vand.u32 4294901760, %v6127_v24  ;;  %vm1937_vm10 = vcmp.eq.f32.partialorder %v1905_v13, 0.0 }
 0x128   :  { %5134 = vmatprep.subr.mxu0 %v5934_v37  ;;  %5167 = vmatprep.subr.mxu1 %v5924_v33  ;;  %v2350_v58 = vmul.f32 %v6040_v8, %v6040_v8  ;;  %v1293_v42 = vsub.f32 %v6111_v57, %v6148_v0  ;;  %v2349_v44 = vmul.f32 %v6030_v2, %v6030_v2  ;;  %vm1915_vm12 = vcmp.eq.f32.partialorder %v6153_v17, 0.0 }
 0x129   :  { %2430 = vrot.lane.b32.xlu1 %v2348_v11, %s5786_s30  ;;  %5135 = vmatpush3.msra.mxu0 %v5934_v37  ;;  %v6171_v37 = vand.u32 4294901760, %v1279_v10  ;;  %vm1938_vm11 = vcmp.eq.f32.partialorder %v6144_v32, 0.0  ;;  %v1234_v41 = vsub.f32 %v6108_v3, %v1233_v28  ;;  %vm1916_vm13 = vcmp.eq.f32.partialorder %v6156_v18, 0.0 }
 0x12a   :  { %5168 = vmatpush3.msra.mxu1 %v5924_v33  ;;  %5137 = vmatmul.mubr.f32.vlgmr.msra.gmra.mxu0 %v5996_v46  ;;  %v1820_v33 = vrot.slane %v6136_v15, %v5964_v14  ;;  %v1286_v46 = vsub.f32 %v6103_v1, %v6139_v30  ;;  %v2354_v8 = vmul.f32 %v1905_v13, %v1905_v13  ;;  %v4804_v19 = vsel %vm1916_vm13, 1.0, %v7640_v54 }
 0x12b   :  { %5150 = vmatprep.subr.mxu0 %v5904_v26  ;;  %5170 = vmatmul.mubr.f32.vlgmr.msra.gmra.mxu1 %v5981_v34  ;;  %v6198_v48 = vsub.f32 %v5958_v12, %v1812_v25  ;;  %v1799_v2 = vcombine.high %v5984_v35, %v5984_v35  ;;  %v1749_v55 = vcombine.high %v6136_v15, %v6136_v15  ;;  %v4803_v35 = vsel %vm1915_vm12, 1.0, %v7640_v54 }
 0x12c   :  { %2396 = vrot.lane.b32.xlu0 %v2331_v20, %s5786_s30  ;;  %5151 = vmatpush3.msra.mxu0 %v5904_v26  ;;  %v1768_v26 = vcombine.high %v6034_v4, %v6034_v4  ;;  %v4826_v4 = vsel %vm1938_vm11, 1.0, %v7640_v54  ;;  %v6207_v50 = vsub.f32 %v5958_v12, %v1820_v33  ;;  %v6224_v60 = vsub.f32 %v5956_v9, %v1820_v33 }
 0x12d   :  { %5158 = vmatprep.mubr.f32.mxu0 %v5993_v45  ;;  %5152 = vmatprep.subr.mxu0 %v5919_v31  ;;  %v4825_v45 = vsel %vm1937_vm10, 1.0, %v7640_v54  ;;  %v1798_v62 = vcombine.high %v6065_v43, %v6065_v43  ;;  %v6235_v5 = vsub.f32 %v6127_v24, %v1243_v29  ;;  %v1848_v10 = vrot.slane %v1799_v2, %v5964_v14 }
 0x12e   :  { %2434 = vrot.lane.b32.xlu1 %v2350_v58, %s5786_s30  ;;  %5153 = vmatpush3.msra.mxu0 %v5919_v31  ;;  %v6210_v31 = vsub.f32 %v5956_v9, %v1812_v25  ;;  %v6230_v53 = vrot.slane %v1768_v26, %v5951_v6  ;;  %v5487_v27 = vpack.i.bf16 %v4826_v4, %v4825_v45  ;;  %v1287_v11 = vand.u32 4294901760, %v1286_v46 }
 0x12f   :  { %5154 = vmatprep.subr.mxu0 %v5931_v36  ;;  %5183 = vmatprep.subr.mxu1 %v6171_v37  ;;  %v1300_v43 = vsub.f32 %v6118_v7, %v6165_v39  ;;  %v5492_v13 = vpack.i.bf16 %v4804_v19, %v4803_v35  ;;  %vm1917_vm14 = vcmp.eq.f32.partialorder %v6198_v48, 0.0  ;;  %v1828_v15 = vrot.slane %v1749_v55, %v5964_v14 }
 0x130   :  { %2432 = vrot.lane.b32.xlu0 %v2349_v44, %s5786_s30  ;;  %5155 = vmatpush3.msra.mxu0 %v5931_v36  ;;  %v1235_v36 = vand.u32 4294901760, %v1234_v41  ;;  %v6246_v20 = vand.u32 4294901760, %v1293_v42  ;;  %vm1921_vm15 = vcmp.eq.f32.partialorder %v6207_v50, 0.0  ;;  %vm1922_vm0 = vcmp.eq.f32.partialorder %v6224_v60, 0.0 }
 0x131   :  { %5156 = vmatprep.subr.mxu0 %v5941_v40  ;;  %vm1918_vm2 = vcmp.eq.f32.partialorder %v6210_v31, 0.0  ;;  %v1719_v25 = vcombine.high %v6100_v63, %v6100_v63  ;;  %v1800_v33 = vcombine.high %v6230_v53, %v6230_v53  ;;  %v1245_v46 = vand.u32 4294901760, %v6235_v5  ;;  %5184 = vmatpush3.msra.mxu1 %v6171_v37 }
 0x132   :  { %2442 = vrot.lane.b32.xlu1 %v2354_v8, %s5786_s30  ;;  %5157 = vmatpush3.msra.mxu0 %v5941_v40  ;;  %v1860_v40 = vrot.slane %v1798_v62, %v5964_v14  ;;  %v2332_v58 = vmul.f32 %v6153_v17, %v6153_v17  ;;  %v2355_v41 = vmul.f32 %v6144_v32, %v6144_v32  ;;  %v4809_v42 = vsel %vm1921_vm15, 1.0, %v7640_v54 }
 0x133   :  { %5159 = vmatmul.mubr.f32.vlgmr.msra.gmra.mxu0 %v5981_v34  ;;  %5172 = vmatprep.subr.mxu0 %v6017_v61  ;;  %v2351_v34 = vmul.f32 %v6046_v16, %v6046_v16  ;;  %v4805_v16 = vsel %vm1917_vm14, 1.0, %v7640_v54  ;;  %v6271_v63 = vsub.f32 %v5958_v12, %v1848_v10  ;;  %v4810_v17 = vsel %vm1922_vm0, 1.0, %v7640_v54 }
 0x134   :  { %5488 = vrot.lane.b32.xlu0 %v5487_v27, %s5786_s30  ;;  %5173 = vmatpush3.msra.mxu0 %v6017_v61  ;;  %v4806_v32 = vsel %vm1918_vm2, 1.0, %v7640_v54  ;;  %v6284_v44 = vsub.f32 %v5958_v12, %v1828_v15  ;;  %v6290_v26 = vsub.f32 %v5956_v9, %v1848_v10  ;;  %v6293_v8 = vsub.f32 %v5956_v9, %v1828_v15 }
 0x135   :  { %5174 = vmatprep.subr.mxu0 %v6053_v22  ;;  %5180 = vmatprep.mubr.f32.mxu0 %v1235_v36  ;;  %v6296_v45 = vsub.f32 %v5958_v12, %v1860_v40  ;;  %v6299_v2 = vsub.f32 %v5956_v9, %v1860_v40  ;;  %v1750_v4 = vcombine.high %v6082_v56, %v6082_v56  ;;  %vm1935_vm8 = vcmp.eq.f32.partialorder %v6271_v63, 0.0 }
 0x136   :  { %5493 = vrot.lane.b32.xlu1 %v5492_v13, %s5786_s30  ;;  %5175 = vmatpush3.msra.mxu0 %v6053_v22  ;;  %v1747_v55 = vrot.slane %v1719_v25, %v5951_v6  ;;  %vm1925_vm3 = vcmp.eq.f32.partialorder %v6284_v44, 0.0  ;;  %v1864_v37 = vrot.slane %v1800_v33, %v5964_v14  ;;  %vm1926_vm4 = vcmp.eq.f32.partialorder %v6293_v8, 0.0 }
 0x137   :  { %5176 = vmatprep.subr.mxu0 %v6073_v51  ;;  %5185 = vmatprep.subr.mxu1 %v1287_v11  ;;  %v6310_v35 = vsel %vm1925_vm3, 1.0, %v7640_v54  ;;  %vm1941_vm5 = vcmp.eq.f32.partialorder %v6296_v45, 0.0  ;;  %vm1942_vm6 = vcmp.eq.f32.partialorder %v6299_v2, 0.0  ;;  %v6316_v6 = vsel %vm1926_vm4, 1.0, %v7640_v54 }
 0x138   :  { %2436 = vrot.lane.b32.xlu0 %v2351_v34, %s5786_s30  ;;  %5177 = vmatpush3.msra.mxu0 %v6073_v51  ;;  %v6319_v56 = vsel %vm1941_vm5, 1.0, %v7640_v54  ;;  %v6322_v19 = vsel %vm1942_vm6, 1.0, %v7640_v54  ;;  %v6325_v62 = vsub.f32 %v5958_v12, %v1864_v37  ;;  %v5502_v36 = vpack.i.bf16 %v4810_v17, %v4809_v42 }
 0x139   :  { %5178 = vmatprep.subr.mxu0 %v6084_v59  ;;  %5186 = vmatpush3.msra.mxu1 %v1287_v11  ;;  %v5532_v5 = vpack.i.bf16 %v6316_v6, %v6310_v35  ;;  %v5517_v27 = vpack.i.bf16 %v6322_v19, %v6319_v56  ;;  %v6334_v10 = vsub.f32 %v5956_v9, %v1864_v37  ;;  %vm1936_vm10 = vcmp.eq.f32.partialorder %v6290_v26, 0.0 }
 0x13a   :  { %2398 = vrot.lane.b32.xlu1 %v2332_v58, %s5786_s30  ;;  %5179 = vmatpush3.msra.mxu0 %v6084_v59  ;;  %v5497_v13 = vpack.i.bf16 %v4806_v32, %v4805_v16  ;;  %vm1943_vm7 = vcmp.eq.f32.partialorder %v6325_v62, 0.0  ;;  %v1751_v15 = vcombine.high %v1747_v55, %v1747_v55  ;;  %v1816_v11 = vrot.slane %v1750_v4, %v5964_v14 }
 0x13b   :  { %5194 = vmatprep.subr.mxu0 %v6057_v38  ;;  %5181 = vmatmul.mubr.f32.vlgmr.msra.gmra.mxu0 %v1245_v46  ;;  %vm1944_vm9 = vcmp.eq.f32.partialorder %v6334_v10, 0.0  ;;  %v6343_v40 = vsel %vm1943_vm7, 1.0, %v7640_v54  ;;  %v1301_v33 = vand.u32 4294901760, %v1300_v43  ;;  %v1856_v46 = vrot.slane %v6230_v53, %v5964_v14 }
 0x13c   :  { %2444 = vrot.lane.b32.xlu0 %v2355_v41, %s5786_s30  ;;  %5195 = vmatpush3.msra.mxu0 %v6057_v38  ;;  %v6348_v34 = vsel %vm1944_vm9, 1.0, %v7640_v54  ;;  %v1832_v25 = vrot.slane %v1751_v15, %v5964_v14  ;;  %v2334_v38 = vmul.f32 %v6198_v48, %v6198_v48  ;;  %v2333_v41 = vmul.f32 %v6156_v18, %v6156_v18 }
 0x13d   :  { %5196 = vmatprep.subr.mxu0 %v6103_v1  ;;  %5187 = vmatprep.subr.mxu1 %v6246_v20  ;;  %v5537_v58 = vpack.i.bf16 %v6348_v34, %v6343_v40  ;;  %v4823_v43 = vsel %vm1935_vm8, 1.0, %v7640_v54  ;;  %v6382_v18 = vsub.f32 %v5958_v12, %v1816_v11  ;;  %v6385_v53 = vsub.f32 %v5956_v9, %v1816_v11  ;;  %v4799_v40 = vld [vmem:[%s7634_s6] ss:$0 sm:$0xff] }
 0x13e   :  { %5503 = vrot.lane.b32.xlu1 %v5502_v36, %s5786_s30  ;;  %5197 = vmatpush3.msra.mxu0 %v6103_v1  ;;  %v6370_v16 = vsub.f32 %v5958_v12, %v1832_v25  ;;  %v6373_v48 = vsub.f32 %v5956_v9, %v1832_v25  ;;  %v4824_v1 = vsel %vm1936_vm10, 1.0, %v7640_v54  ;;  %v1824_v42 = vrot.slane %v1747_v55, %v5964_v14 }
 0x13f   :  { %5198 = vmatprep.subr.mxu0 %v6111_v57  ;;  %5188 = vmatpush3.msra.mxu1 %v6246_v20  ;;  %v2338_v17 = vmul.f32 %v6207_v50, %v6207_v50  ;;  %v6396_v20 = vsub.f32 %v5958_v12, %v1856_v46  ;;  %v6399_v32 = vsub.f32 %v5956_v9, %v1856_v46  ;;  %vm1919_vm13 = vcmp.eq.f32.partialorder %v6382_v18, 0.0 }
 0x140   :  { %5498 = vrot.lane.b32.xlu0 %v5497_v13, %s5786_s30  ;;  %5199 = vmatpush3.msra.mxu0 %v6111_v57  ;;  %vm1927_vm11 = vcmp.eq.f32.partialorder %v6370_v16, 0.0  ;;  %vm1928_vm12 = vcmp.eq.f32.partialorder %v6373_v48, 0.0  ;;  %v5507_v50 = vpack.i.bf16 %v4824_v1, %v4823_v43  ;;  %vm1920_vm14 = vcmp.eq.f32.partialorder %v6385_v53, 0.0 }
 0x141   :  { %5189 = vmatprep.subr.mxu1 %v1301_v33  ;;  %5200 = vmatprep.subr.mxu0 %v6118_v7  ;;  %v6402_v14 = vsel %vm1927_vm11, 1.0, %v7640_v54  ;;  %v6405_v57 = vsel %vm1928_vm12, 1.0, %v7640_v54  ;;  %v1891_v55 = vsub.f32 %v5958_v12, %v1824_v42  ;;  %v6416_v37 = vsub.f32 %v5956_v9, %v1824_v42 }
 0x142   :  { %2402 = vrot.lane.b32.xlu1 %v2334_v38, %s5786_s30  ;;  %5190 = vmatpush3.msra.mxu1 %v1301_v33  ;;  %v5542_v4 = vpack.i.bf16 %v6405_v57, %v6402_v14  ;;  %vm1939_vm15 = vcmp.eq.f32.partialorder %v6396_v20, 0.0  ;;  %vm1940_vm0 = vcmp.eq.f32.partialorder %v6399_v32, 0.0  ;;  %v4807_v9 = vsel %vm1919_vm13, 1.0, %v7640_v54 }
 0x143   :  { %5201 = vmatpush3.msra.mxu0 %v6118_v7  ;;  %5191 = vmatprep.mubr.f32.mxu1 %v6075_v52  ;;  %v2352_v7 = vmul.f32 %v6271_v63, %v6271_v63  ;;  %v4808_v12 = vsel %vm1920_vm14, 1.0, %v7640_v54  ;;  %v2335_v36 = vmul.f32 %v6210_v31, %v6210_v31  ;;  %vm1923_vm2 = vcmp.eq.f32.partialorder %v1891_v55, 0.0 }
 0x144   :  { %2400 = vrot.lane.b32.xlu0 %v2333_v41, %s5786_s30  ;;  %5202 = vmatprep.mubr.f32.mxu0 %v6108_v3  ;;  %vm1924_vm3 = vcmp.eq.f32.partialorder %v6416_v37, 0.0  ;;  %v4827_v63 = vsel %vm1939_vm15, 1.0, %v7640_v54  ;;  %v4828_v13 = vsel %vm1940_vm0, 1.0, %v7640_v54  ;;  %v5522_v15 = vpack.i.bf16 %v4808_v12, %v4807_v9 }
 0x145   :  { %5205 = vmatprep.subr.mxu1 %v6017_v61  ;;  %5216 = vmatprep.subr.mxu0 %v6091_v23  ;;  %v4811_v31 = vsel %vm1923_vm2, 1.0, %v7640_v54  ;;  %v4812_v11 = vsel %vm1924_vm3, 1.0, %v7640_v54  ;;  %v2353_v3 = vmul.f32 %v6290_v26, %v6290_v26  ;;  %vm2137_vm4 = vcmask 56320  }
 0x146   :  { %2410 = vrot.lane.b32.xlu1 %v2338_v17, %s5786_s30  ;;  %5192 = vmatmul.mubr.f32.vlgmr.msra.gmra.mxu1 %v6093_v21  ;;  %v5527_v25 = vpack.i.bf16 %v4812_v11, %v4811_v31  ;;  %vm2745_vm8 = vcmask 130112   ;;  %vm2882_vm11 = vcmask 1041409   ;;  %vm2884_vm14 = vcmask 1042434  }
 0x147   :  { %5203 = vmatmul.mubr.f32.vlgmr.msra.gmra.mxu0 %v6127_v24  ;;  %5206 = vmatpush3.msra.mxu1 %v6017_v61 }
 0x148   :  { %5508 = vrot.lane.b32.xlu0 %v5507_v50, %s5786_s30  ;;  %5217 = vmatpush3.msra.mxu0 %v6091_v23  ;;  %v5512_v23 = vpack.i.bf16 %v4828_v13, %v4827_v63 }
 0x149   :  { %5207 = vmatprep.subr.mxu1 %v6053_v22  ;;  %5218 = vmatprep.subr.mxu0 %v6139_v30 }
 0x14a   :  { %2438 = vrot.lane.b32.xlu1 %v2352_v7, %s5786_s30  ;;  %5208 = vmatpush3.msra.mxu1 %v6053_v22  ;;  %v4800_v7 = vld [vmem:[%s7637_s9] ss:$0 sm:$0xff]  ;;  %s5789_s9 = smov 112  }
 0x14b   :  { %5219 = vmatpush3.msra.mxu0 %v6139_v30  ;;  %5209 = vmatprep.subr.mxu1 %v6073_v51  ;;  %v2339_v30 = vmul.f32 %v6224_v60, %v6224_v60 }
 0x14c   :  { %2404 = vrot.lane.b32.xlu0 %v2335_v36, %s5786_s30  ;;  %5220 = vmatprep.subr.mxu0 %v6148_v0 }
 0x14d   :  { %5210 = vmatpush3.msra.mxu1 %v6073_v51  ;;  %5221 = vmatpush3.msra.mxu0 %v6148_v0  ;;  %v2336_v0 = vmul.f32 %v6382_v18, %v6382_v18 }
 0x14e   :  { %5523 = vrot.lane.b32.xlu1 %v5522_v15, %s5786_s30  ;;  %5211 = vmatprep.subr.mxu1 %v6084_v59 }
 0x14f   :  { %5222 = vmatprep.subr.mxu0 %v6165_v39  ;;  %5212 = vmatpush3.msra.mxu1 %v6084_v59 }
 0x150   :  { %5513 = vrot.lane.b32.xlu0 %v5512_v23, %s5786_s30  ;;  %5223 = vmatpush3.msra.mxu0 %v6165_v39 }
 0x151   :  { %5213 = vmatprep.mubr.f32.mxu1 %v1233_v28  ;;  %5224 = vmatprep.mubr.f32.mxu0 %v6075_v52 }
 0x152   :  { %5528 = vrot.lane.b32.xlu1 %v5527_v25, %s5786_s30  ;;  %5227 = vmatprep.subr.mxu1 %v6017_v61 }
 0x153   :  { %5214 = vmatmul.mubr.f32.vlgmr.msra.gmra.mxu1 %v1243_v29  ;;  %5225 = vmatmul.mubr.f32.vlgmr.msra.gmra.mxu0 %v6093_v21 }
 0x154   :  { %2412 = vrot.lane.b32.xlu0 %v2339_v30, %s5786_s30  ;;  %5228 = vmatpush3.msra.mxu1 %v6017_v61  ;;  %v2340_v61 = vmul.f32 %v1891_v55, %v1891_v55 }
 0x155   :  { %5229 = vmatprep.subr.mxu1 %v6053_v22  ;;  %5235 = vmatprep.mubr.f32.mxu1 %v6075_v52  ;;  %v2343_v52 = vmul.f32 %v6293_v8, %v6293_v8 }
 0x156   :  { %2406 = vrot.lane.b32.xlu1 %v2336_v0, %s5786_s30  ;;  %5230 = vmatpush3.msra.mxu1 %v6053_v22  ;;  %v2337_v22 = vmul.f32 %v6385_v53, %v6385_v53 }
 0x157   :  { %5231 = vmatprep.subr.mxu1 %v6073_v51 }
 0x158   :  { %2440 = vrot.lane.b32.xlu0 %v2353_v3, %s5786_s30  ;;  %5232 = vmatpush3.msra.mxu1 %v6073_v51  ;;  %v2341_v51 = vmul.f32 %v6416_v37, %v6416_v37 }
 0x159   :  { %5233 = vmatprep.subr.mxu1 %v6084_v59 }
 0x15a   :  { %5533 = vrot.lane.b32.xlu1 %v5532_v5, %s5786_s30  ;;  %5234 = vmatpush3.msra.mxu1 %v6084_v59  ;;  %v2342_v59 = vmul.f32 %v6284_v44, %v6284_v44 }
 0x15b   :  { %5236 = vmatmul.mubr.f32.vlgmr.msra.gmra.mxu1 %v6093_v21 }
 0x15c   :  { %5518 = vrot.lane.b32.xlu0 %v5517_v27, %s5786_s30 }
 0x15e   :  { %2414 = vrot.lane.b32.xlu1 %v2340_v61, %s5786_s30 }
 0x160   :  { %2408 = vrot.lane.b32.xlu0 %v2337_v22, %s5786_s30 }
 0x162   :  { %5538 = vrot.lane.b32.xlu1 %v5537_v58, %s5786_s30 }
 0x164   :  { %2416 = vrot.lane.b32.xlu0 %v2341_v51, %s5786_s30 }
 0x166   :  { %2420 = vrot.lane.b32.xlu1 %v2343_v52, %s5786_s30 }
 0x168   :  { %2418 = vrot.lane.b32.xlu0 %v2342_v59, %s5786_s30 }
 0x16a   :  { %5543 = vrot.lane.b32.xlu1 %v5542_v4, %s5786_s30 }
 0x17f   :  { %v6510_v21 = vpop.permute.xlu0 %3101 }
 0x180   :  { %v3121_v24 = vsel %vm2137_vm4, %v6510_v21, 0 }
 0x181   :  { %v6514_v28 = vand.u32 4294901760, %v3121_v24 }
 0x183   :  { %v6516_v29 = vpop.permute.xlu0 %3099  ;;  %5238 = vmatprep.subr.mxu0 %v6514_v28  ;;  %v6520_v39 = vsub.f32 %v3121_v24, %v6514_v28 }
 0x184   :  { %v3119_v60 = vsel %vm2137_vm4, %v6516_v29, 0  ;;  %5239 = vmatpush3.xpose.msra.mxu0 %v6514_v28 }
 0x185   :  { %v6525_v44 = vand.u32 4294901760, %v3119_v60  ;;  %v6528_v26 = vand.u32 4294901760, %v6520_v39 }
 0x187   :  { %5240 = vmatprep.subr.mxu0 %v6525_v44  ;;  %v3302_v8 = vsub.f32 %v6520_v39, %v6528_v26  ;;  %v6534_v35 = vsub.f32 %v3119_v60, %v6525_v44 }
 0x188   :  { %5241 = vmatpush3.xpose.msra.mxu0 %v6525_v44 }
 0x189   :  { %5270 = vmatprep.subr.mxu0 %v6520_v39  ;;  %v3303_v6 = vand.u32 4294901760, %v3302_v8  ;;  %v6539_v56 = vand.u32 4294901760, %v6534_v35  ;;  %v6552_v15 = vpop.permute.xlu0 %2428  ;;  %v2356_v8 = vmul.f32 %v6396_v20, %v6396_v20  ;;  %v2344_v20 = vmul.f32 %v6370_v16, %v6370_v16 }
 0x18a   :  { %v2358_v16 = vmul.f32 %v6296_v45, %v6296_v45  ;;  %v2359_v45 = vmul.f32 %v6299_v2, %v6299_v2 }
 0x18b   :  { %5254 = vmatprep.subr.mxu1 %v3303_v6  ;;  %v3309_v19 = vsub.f32 %v6534_v35, %v6539_v56  ;;  %v6550_v12 = vpop.permute.xlu1 %5468 }
 0x18c   :  { %5255 = vmatpush3.xpose.msra.mxu1 %v3303_v6 }
 0x18d   :  { %v3310_v5 = vand.u32 4294901760, %v3309_v19 }
 0x18e   :  { %v6577_v51 = vpop.permute.xlu0 %5473 }
 0x18f   :  { %5256 = vmatprep.subr.mxu1 %v3310_v5  ;;  %v6566_v0 = vpop.permute.xlu1 %2426 }
 0x190   :  { %5257 = vmatpush3.xpose.msra.mxu1 %v3310_v5 }
 0x191   :  { %5286 = vmatprep.subr.mxu1 %v6514_v28 }
 0x192   :  { %v6602_v5 = vpop.permute.xlu0 %5478 }
 0x196   :  { %v6590_v60 = vpop.permute.xlu1 %2394 }
 0x1d7   :  { %v5127_v34 = vpop.f32.mrf.mxu1 }
 0x1d9   :  { %v800_v41 = vpop.f32.mrf.mxu1 }
 0x1df   :  { %v5149_v1 = vpop.f32.mrf.mxu1 }
 0x1e0   :  { %v5116_v27 = vpop.f32.mrf.mxu0 }
 0x1e1   :  { %v710_v38 = vadd.f32 %v5116_v27, %v4799_v40  ;;  %v970_v14 = vpop.f32.mrf.mxu1 }
 0x1e2   :  { %v699_v33 = vpop.f32.mrf.mxu0 }
 0x1e3   :  { %v700_v46 = vadd.f32 %v4799_v40, %v699_v33  ;;  %v807_v43 = vadd.f32 %v5127_v34, %v710_v38  ;;  %v6611_v34 = vpop.permute.xlu1 %2430  ;;  %v2357_v33 = vmul.f32 %v6399_v32, %v6399_v32  ;;  %v6617_v38 = vpop.permute.xlu0 %5483  ;;  %v2360_v32 = vmul.f32 %v6325_v62, %v6325_v62 }
 0x1e5   :  { %v801_v42 = vadd.f32 %v800_v41, %v700_v46  ;;  %v2345_v46 = vmul.f32 %v6373_v48, %v6373_v48 }
 0x1ea   :  { %v5138_v58 = vpop.f32.mrf.mxu0 }
 0x1eb   :  { %v894_v53 = vadd.f32 %v5138_v58, %v807_v43  ;;  %v5171_v50 = vpop.f32.mrf.mxu1  ;;  %v6627_v58 = vpop.permute.xlu1 %2434 }
 0x1ec   :  { %v886_v18 = vpop.f32.mrf.mxu0 }
 0x1ed   :  { %v887_v17 = vadd.f32 %v886_v18, %v801_v42  ;;  %v979_v57 = vadd.f32 %v5149_v1, %v894_v53  ;;  %v1142_v13 = vpop.f32.mrf.mxu1  ;;  %v5475_v42 = vunpack.i.l.bf16 %v6577_v51 }
 0x1ef   :  { %v971_v37 = vadd.f32 %v970_v14, %v887_v17  ;;  %v6639_v48 = vpop.permute.xlu1 %2442  ;;  %v2138_v14 = vsel %vm2137_vm4, %v5475_v42, 0.0 }
 0x1f3   :  { %v5160_v4 = vpop.f32.mrf.mxu0  ;;  %v5494_v43 = vpop.permute.xlu1 %5493 }
 0x1f4   :  { %v1068_v55 = vadd.f32 %v5160_v4, %v979_v57  ;;  %v5495_v57 = vunpack.i.l.bf16 %v5494_v43 }
 0x1f5   :  { %v1061_v9 = vpop.f32.mrf.mxu0 }
 0x1f6   :  { %v1149_v36 = vadd.f32 %v5171_v50, %v1068_v55  ;;  %v1062_v63 = vadd.f32 %v1061_v9, %v971_v37  ;;  %v2144_v4 = vsel %vm2137_vm4, %v5495_v57, 0.0  ;;  %v5496_v55 = vunpack.i.h.bf16 %v5494_v43 }
 0x1f7   :  { %v6648_v1 = vpop.permute.xlu1 %2398  ;;  %v5480_v57 = vunpack.i.l.bf16 %v6602_v5 }
 0x1f8   :  { %v6554_v31 = vadd.f32 %v4800_v7, %v1149_v36  ;;  %1691 = vst.msk [vmem:[#allocation11 + $0x8] sm:$0xff] %vm617_vm1, %v1149_v36  ;;  %v1143_v11 = vadd.f32 %v1142_v13, %v1062_v63  ;;  %v2147_v9 = vsel %vm2137_vm4, %v5496_v55, 0.0 }
 0x1fa   :  { %v6557_v23 = vadd.f32 %v4800_v7, %v1143_v11  ;;  %1690 = vst.msk [vmem:[#allocation11] sm:$0xff] %vm617_vm1, %v1143_v11  ;;  %2686 = vrot.lane.b32.xlu1 %v6554_v31, %s5788_s2  ;;  %v3105_v25 = vsel %vm2137_vm4, %v6554_v31, 0  ;;  %v5476_v7 = vunpack.i.h.bf16 %v6577_v51 }
 0x1fb   :  { %v6564_v30 = vand.u32 4294901760, %v3105_v25  ;;  %v6652_v53 = vpop.permute.xlu1 %5503 }
 0x1fc   :  { %2690 = vrot.lane.b32.xlu0 %v6557_v23, %s5789_s9  ;;  %v3103_v3 = vsel %vm2137_vm4, %v6557_v23, 0  ;;  %v2141_v11 = vsel %vm2137_vm4, %v5476_v7, 0.0 }
 0x1fd   :  { %v6572_v61 = vand.u32 4294901760, %v3103_v3  ;;  %v6575_v22 = vsub.f32 %v3105_v25, %v6564_v30 }
 0x1fe   :  { %2692 = vrot.lane.b32.xlu1 %v6554_v31, %s5789_s9 }
 0x1ff   :  { %5258 = vmatprep.mubr.f32.mxu1 %v6572_v61  ;;  %v6583_v52 = vsub.f32 %v3103_v3, %v6572_v61  ;;  %v7642_v59 = vand.u32 4294901760, %v6575_v22  ;;  %v6657_v17 = vpop.permute.xlu1 %2402  ;;  %v5182_v3 = vpop.f32.mrf.mxu0 }
 0x200   :  { %2696 = vrot.lane.b32.xlu0 %v6557_v23, %s5790_s14  ;;  %5259 = vmatmul.mubr.f32.vlgmr.msra.gmra.mxu1 %v6564_v30 }
 0x201   :  { %5287 = vmatpush3.xpose.msra.mxu1 %v6514_v28  ;;  %v3192_v24 = vand.u32 4294901760, %v6583_v52  ;;  %v3203_v6 = vsub.f32 %v6575_v22, %v7642_v59 }
 0x202   :  { %5288 = vmatprep.subr.mxu1 %v6525_v44  ;;  %2698 = vrot.lane.b32.xlu1 %v6554_v31, %s5790_s14 }
 0x203   :  { %v3193_v19 = vsub.f32 %v6583_v52, %v3192_v24  ;;  %v3204_v40 = vand.u32 4294901760, %v3203_v6  ;;  %v6660_v50 = vpop.permute.xlu1 %2410 }
 0x204   :  { %2446 = vrot.lane.b32.xlu0 %v2356_v8, %s5786_s30 }
 0x205   :  { %5289 = vmatpush3.xpose.msra.mxu1 %v6525_v44  ;;  %v3194_v27 = vand.u32 4294901760, %v3193_v19  ;;  %v5471_v19 = vunpack.i.h.bf16 %v6550_v12 }
 0x206   :  { %5318 = vmatprep.subr.mxu1 %v6514_v28  ;;  %2684 = vrot.lane.b32.xlu1 %v6557_v23, %s5788_s2  ;;  %v5193_v63 = vpop.f32.mrf.mxu1 }
 0x207   :  { %5242 = vmatprep.mubr.f32.mxu0 %v3194_v27  ;;  %v6667_v13 = vpop.permute.xlu1 %2438  ;;  %v1345_v27 = vadd.f32 %v5193_v63, %v5182_v3 }
 0x208   :  { %2422 = vrot.lane.b32.xlu0 %v2344_v20, %s5786_s30  ;;  %5243 = vmatmul.mubr.f32.vlgmr.msra.gmra.mxu0 %v3204_v40  ;;  %v1338_v51 = vpop.f32.mrf.mxu1  ;;  %v5470_v40 = vunpack.i.l.bf16 %v6550_v12 }
 0x209   :  { %5271 = vmatpush3.xpose.msra.mxu0 %v6520_v39  ;;  %v6633_v39 = vpop.permute.xlu0 %2396 }
 0x20a   :  { %5272 = vmatprep.subr.mxu0 %v6534_v35  ;;  %2448 = vrot.lane.b32.xlu1 %v2357_v33, %s5786_s30  ;;  %v1237_v33 = vpop.f32.mrf.mxu0 }
 0x20c   :  { %2450 = vrot.lane.b32.xlu0 %v2358_v16, %s5786_s30  ;;  %v5524_v16 = vpop.permute.xlu1 %5523  ;;  %v5204_v43 = vpop.f32.mrf.mxu0 }
 0x20d   :  { %5273 = vmatpush3.xpose.msra.mxu0 %v6534_v35  ;;  %v2361_v35 = vmul.f32 %v6334_v10, %v6334_v10  ;;  %v6643_v41 = vpop.permute.xlu0 %2432  ;;  %v5526_v55 = vunpack.i.h.bf16 %v5524_v16  ;;  %v5525_v3 = vunpack.i.l.bf16 %v5524_v16 }
 0x20e   :  { %5302 = vmatprep.subr.mxu0 %v6528_v26  ;;  %2424 = vrot.lane.b32.xlu1 %v2345_v46, %s5786_s30  ;;  %v2189_v46 = vsel %vm2137_vm4, %v5471_v19, 0.0 }
 0x210   :  { %2454 = vrot.lane.b32.xlu0 %v2360_v32, %s5786_s30  ;;  %v5481_v32 = vunpack.i.h.bf16 %v6602_v5  ;;  %v6683_v63 = vpop.permute.xlu1 %5528  ;;  %v2159_v5 = vsel %vm2137_vm4, %v5526_v55, 0.0  ;;  %v2496_v55 = vsel %vm2137_vm4, %v6648_v1, 0.0 }
 0x211   :  { %v6646_v62 = vpop.permute.xlu0 %5488 }
 0x212   :  { %2452 = vrot.lane.b32.xlu1 %v2359_v45, %s5786_s30  ;;  %v1339_v45 = vadd.f32 %v1338_v51, %v1237_v33  ;;  %v2195_v12 = vsel %vm2137_vm4, %v5481_v32, 0.0  ;;  %v5485_v32 = vunpack.i.l.bf16 %v6617_v38 }
 0x214   :  { %v6696_v16 = vpop.permute.xlu1 %2406 }
 0x215   :  { %v6650_v18 = vpop.permute.xlu0 %2436 }
 0x216   :  { %2456 = vrot.lane.b32.xlu1 %v2361_v35, %s5786_s30  ;;  %v5215_v35 = vpop.f32.mrf.mxu1 }
 0x219   :  { %v6654_v2 = vpop.permute.xlu0 %2444 }
 0x21d   :  { %v5499_v10 = vpop.permute.xlu0 %5498 }
 0x21e   :  { %v5501_v36 = vunpack.i.h.bf16 %v5499_v10  ;;  %v5500_v25 = vunpack.i.l.bf16 %v5499_v10  ;;  %v1432_v10 = vadd.f32 %v5204_v43, %v1345_v27  ;;  %v5486_v27 = vunpack.i.h.bf16 %v6617_v38 }
 0x21f   :  { %v2198_v43 = vsel %vm2137_vm4, %v5485_v32, 0.0  ;;  %v2490_v38 = vsel %vm2137_vm4, %v6590_v60, 0.0  ;;  %v2544_v32 = vsel %vm2137_vm4, %v6611_v34, 0.0 }
 0x220   :  { %v2153_v6 = vsel %vm2137_vm4, %v5501_v36, 0.0  ;;  %v2150_v20 = vsel %vm2137_vm4, %v5500_v25, 0.0  ;;  %v1508_v36 = vpop.f32.mrf.mxu1  ;;  %v2192_v25 = vsel %vm2137_vm4, %v5480_v57, 0.0 }
 0x221   :  { %v6663_v37 = vpop.permute.xlu0 %2400 }
 0x225   :  { %v6670_v8 = vpop.permute.xlu0 %5508 }
 0x226   :  { %v5511_v60 = vunpack.i.h.bf16 %v6670_v8 }
 0x229   :  { %v6678_v42 = vpop.permute.xlu0 %2404 }
 0x22d   :  { %v6686_v19 = vpop.permute.xlu0 %5513 }
 0x22f   :  { %2139 = vadd.xlane.f32.xlu0 %v2138_v14  ;;  %v2186_v14 = vsel %vm2137_vm4, %v5470_v40, 0.0  ;;  %v5237_v40 = vpop.f32.mrf.mxu1 }
 0x233   :  { %2145 = vadd.xlane.f32.xlu0 %v2144_v4  ;;  %v1424_v4 = vpop.f32.mrf.mxu0 }
 0x234   :  { %v1425_v7 = vadd.f32 %v1424_v4, %v1339_v45  ;;  %v2201_v45 = vsel %vm2137_vm4, %v5486_v27, 0.0  ;;  %v2499_v4 = vsel %vm2137_vm4, %v6663_v37, 0.0 }
 0x237   :  { %2148 = vadd.xlane.f32.xlu0 %v2147_v9  ;;  %v5791_v9 = vmov 7  }
 0x238   :  { %5547 = vset.pattern.permute.xlu0 %v5791_v9  ;;  %5548 = vset.pattern.permute.xlu1 %v5791_v9 }
 0x23a   :  { %2142 = vadd.xlane.f32.xlu1 %v2141_v11  ;;  %v1517_v11 = vadd.f32 %v5215_v35, %v1432_v10  ;;  %v6699_v35 = vpop.permute.xlu0 %2412  ;;  %v2493_v10 = vsel %vm2137_vm4, %v6633_v39, 0.0  ;;  %v5505_v39 = vunpack.i.l.bf16 %v6652_v53 }
 0x23b   :  { %2154 = vadd.xlane.f32.xlu0 %v2153_v6  ;;  %v5226_v6 = vpop.f32.mrf.mxu0 }
 0x23c   :  { %v1606_v51 = vadd.f32 %v5226_v6, %v1517_v11  ;;  %v2162_v37 = vsel %vm2137_vm4, %v5505_v39, 0.0  ;;  %v5510_v11 = vunpack.i.l.bf16 %v6670_v8  ;;  %v2505_v6 = vsel %vm2137_vm4, %v6678_v42, 0.0 }
 0x23d   :  { %v2541_v8 = vsel %vm2137_vm4, %v6552_v15, 0.0  ;;  %v2547_v42 = vsel %vm2137_vm4, %v6643_v41, 0.0  ;;  %v5530_v15 = vunpack.i.l.bf16 %v6683_v63 }
 0x23e   :  { %2151 = vadd.xlane.f32.xlu1 %v2150_v20  ;;  %v6690_v20 = vadd.f32 %v1508_v36, %v1425_v7  ;;  %v6692_v33 = vadd.f32 %v5237_v40, %v1606_v51  ;;  %v6708_v57 = vpop.permute.xlu0 %2440  ;;  %v2538_v40 = vsel %vm2137_vm4, %v6566_v0, 0.0  ;;  %v5491_v0 = vunpack.i.h.bf16 %v6646_v62 }
 0x23f   :  { %2190 = vadd.xlane.f32.xlu0 %v2189_v46  ;;  %v2156_v46 = vsel %vm2137_vm4, %v5525_v3, 0.0  ;;  %v2168_v41 = vsel %vm2137_vm4, %v5530_v15, 0.0  ;;  %v2550_v15 = vsel %vm2137_vm4, %v6627_v58, 0.0 }
 0x240   :  { %v2213_v34 = vsel %vm2137_vm4, %v5491_v0, 0.0 }
 0x242   :  { %2187 = vadd.xlane.f32.xlu1 %v2186_v14  ;;  %v6704_v14 = vpop.permute.xlu1 %5533  ;;  %v6720_v36 = vpop.permute.xlu0 %5518 }
 0x243   :  { %2196 = vadd.xlane.f32.xlu0 %v2195_v12  ;;  %v5506_v12 = vunpack.i.h.bf16 %v6652_v53  ;;  %v2204_v53 = vsel %vm2137_vm4, %v5510_v11, 0.0 }
 0x245   :  { %v2165_v9 = vsel %vm2137_vm4, %v5506_v12, 0.0 }
 0x246   :  { %2193 = vadd.xlane.f32.xlu1 %v2192_v25  ;;  %v6716_v7 = vpop.permute.xlu1 %2414  ;;  %v2207_v25 = vsel %vm2137_vm4, %v5511_v60, 0.0  ;;  %v2409_v3 = vpop.permute.xlu0 %2408 }
 0x247   :  { %2160 = vadd.xlane.f32.xlu0 %v2159_v5  ;;  %v2502_v5 = vsel %vm2137_vm4, %v6657_v17, 0.0 }
 0x24a   :  { %2157 = vadd.xlane.f32.xlu1 %v2156_v46  ;;  %v6725_v1 = vpop.permute.xlu1 %5538  ;;  %v6736_v51 = vpop.permute.xlu0 %2416  ;;  %v5531_v46 = vunpack.i.h.bf16 %v6683_v63 }
 0x24b   :  { %2202 = vadd.xlane.f32.xlu0 %v2201_v45 }
 0x24e   :  { %2199 = vadd.xlane.f32.xlu1 %v2198_v43  ;;  %v6732_v27 = vpop.permute.xlu1 %2420  ;;  %v6748_v45 = vpop.permute.xlu0 %2418  ;;  %v2171_v43 = vsel %vm2137_vm4, %v5531_v46, 0.0 }
 0x24f   :  { %2494 = vadd.xlane.f32.xlu0 %v2493_v10 }
 0x252   :  { %2491 = vadd.xlane.f32.xlu1 %v2490_v38  ;;  %v6743_v17 = vpop.permute.xlu1 %5543  ;;  %v5490_v38 = vunpack.i.l.bf16 %v6646_v62 }
 0x253   :  { %2500 = vadd.xlane.f32.xlu0 %v2499_v4 }
 0x254   :  { %v2210_v39 = vsel %vm2137_vm4, %v5490_v38, 0.0  ;;  %v5516_v38 = vunpack.i.h.bf16 %v6686_v19 }
 0x256   :  { %2497 = vadd.xlane.f32.xlu1 %v2496_v55 }
 0x257   :  { %2166 = vadd.xlane.f32.xlu0 %v2165_v9  ;;  %v2511_v9 = vsel %vm2137_vm4, %v2409_v3, 0.0  ;;  %v2553_v3 = vsel %vm2137_vm4, %v6650_v18, 0.0 }
 0x25a   :  { %2163 = vadd.xlane.f32.xlu1 %v2162_v37 }
 0x25b   :  { %2208 = vadd.xlane.f32.xlu0 %v2207_v25 }
 0x25e   :  { %2205 = vadd.xlane.f32.xlu1 %v2204_v53  ;;  %v2508_v53 = vsel %vm2137_vm4, %v6696_v16, 0.0 }
 0x25f   :  { %2506 = vadd.xlane.f32.xlu0 %v2505_v6 }
 0x262   :  { %2503 = vadd.xlane.f32.xlu1 %v2502_v5  ;;  %v5536_v5 = vunpack.i.h.bf16 %v6704_v14 }
 0x263   :  { %2542 = vadd.xlane.f32.xlu0 %v2541_v8 }
 0x266   :  { %2539 = vadd.xlane.f32.xlu1 %v2538_v40 }
 0x267   :  { %2548 = vadd.xlane.f32.xlu0 %v2547_v42 }
 0x26a   :  { %2545 = vadd.xlane.f32.xlu1 %v2544_v32 }
 0x26b   :  { %2172 = vadd.xlane.f32.xlu0 %v2171_v43  ;;  %v5535_v43 = vunpack.i.l.bf16 %v6704_v14 }
 0x26c   :  { %v6752_v10 = vpop.permute.xlu1 %2686 }
 0x26d   :  { %v3109_v63 = vsel %vm2137_vm4, %v6752_v10, 0 }
 0x26e   :  { %v6756_v4 = vpop.permute.xlu0 %2690  ;;  %2169 = vadd.xlane.f32.xlu1 %v2168_v41  ;;  %v6767_v62 = vand.u32 4294901760, %v3109_v63  ;;  %v2177_v41 = vsel %vm2137_vm4, %v5536_v5, 0.0 }
 0x26f   :  { %2214 = vadd.xlane.f32.xlu0 %v2213_v34  ;;  %v3111_v55 = vsel %vm2137_vm4, %v6756_v4, 0 }
 0x270   :  { %v6761_v12 = vpop.permute.xlu1 %2692  ;;  %v6771_v37 = vand.u32 4294901760, %v3111_v55  ;;  %v6785_v8 = vsub.f32 %v3109_v63, %v6767_v62 }
 0x271   :  { %v3113_v11 = vsel %vm2137_vm4, %v6761_v12, 0 }
 0x272   :  { %2211 = vadd.xlane.f32.xlu1 %v2210_v39  ;;  %v6769_v60 = vpop.permute.xlu0 %2696  ;;  %v6787_v40 = vand.u32 4294901760, %v3113_v11  ;;  %v6790_v42 = vsub.f32 %v3111_v55, %v6771_v37  ;;  %v3222_v55 = vand.u32 4294901760, %v6785_v8 }
 0x273   :  { %2512 = vadd.xlane.f32.xlu0 %v2511_v9  ;;  %v3115_v6 = vsel %vm2137_vm4, %v6769_v60, 0  ;;  %v2174_v9 = vsel %vm2137_vm4, %v5535_v43, 0.0 }
 0x274   :  { %v6775_v25 = vpop.permute.xlu1 %2698  ;;  %v6796_v32 = vand.u32 4294901760, %v3115_v6  ;;  %v6808_v34 = vsub.f32 %v3113_v11, %v6787_v40  ;;  %v3232_v58 = vand.u32 4294901760, %v6790_v42  ;;  %v5515_v11 = vunpack.i.l.bf16 %v6686_v19 }
 0x275   :  { %v3117_v16 = vsel %vm2137_vm4, %v6775_v25, 0 }
 0x276   :  { %2509 = vadd.xlane.f32.xlu1 %v2508_v53  ;;  %v6810_v63 = vand.u32 4294901760, %v3117_v16  ;;  %v6819_v14 = vsub.f32 %v3115_v6, %v6796_v32  ;;  %v2219_v53 = vsel %vm2137_vm4, %v5516_v38, 0.0  ;;  %v3223_v6 = vsub.f32 %v6785_v8, %v3222_v55 }
 0x277   :  { %2554 = vadd.xlane.f32.xlu0 %v2553_v3  ;;  %v3233_v43 = vsub.f32 %v6790_v42, %v3232_v58  ;;  %v2216_v19 = vsel %vm2137_vm4, %v5515_v11, 0.0  ;;  %v2514_v11 = vsel %vm2137_vm4, %v6660_v50, 0.0  ;;  %v7643_v50 = vand.u32 4294901760, %v6575_v22 }
 0x278   :  { %v6794_v46 = vpop.permute.xlu1 %2684  ;;  %v6828_v5 = vsub.f32 %v3117_v16, %v6810_v63  ;;  %v2517_v16 = vsel %vm2137_vm4, %v6699_v35, 0.0  ;;  %v2559_v35 = vsel %vm2137_vm4, %v6708_v57, 0.0  ;;  %v5521_v57 = vunpack.i.h.bf16 %v6720_v36 }
 0x279   :  { %v3107_v18 = vsel %vm2137_vm4, %v6794_v46, 0  ;;  %v3234_v59 = vand.u32 4294901760, %v3233_v43 }
 0x27a   :  { %v6803_v0 = vand.u32 4294901760, %v3107_v18  ;;  %2551 = vadd.xlane.f32.xlu1 %v2550_v15  ;;  %v3262_v54 = vand.u32 4294901760, %v6828_v5 }
 0x27b   :  { %2178 = vadd.xlane.f32.xlu0 %v2177_v41  ;;  %v3252_v41 = vand.u32 4294901760, %v6819_v14 }
 0x27c   :  { %v6814_v39 = vsub.f32 %v3107_v18, %v6803_v0  ;;  %5261 = vmatprep.mubr.f32.mxu1 %v6803_v0  ;;  %v3242_v18 = vand.u32 4294901760, %v6808_v34  ;;  %v3263_v43 = vsub.f32 %v6828_v5, %v3262_v54 }
 0x27d   :  { %5262 = vmatmul.mubr.f32.gmra.mxu1 %v6767_v62 }
 0x27e   :  { %2175 = vadd.xlane.f32.xlu1 %v2174_v9  ;;  %5264 = vmatprep.mubr.f32.mxu1 %v6771_v37  ;;  %v3212_v3 = vand.u32 4294901760, %v6814_v39  ;;  %v3224_v9 = vand.u32 4294901760, %v3223_v6  ;;  %v5546_v6 = vunpack.i.h.bf16 %v6743_v17 }
 0x27f   :  { %2220 = vadd.xlane.f32.xlu0 %v2219_v53  ;;  %v3243_v53 = vsub.f32 %v6808_v34, %v3242_v18 }
 0x280   :  { %v3213_v15 = vsub.f32 %v6814_v39, %v3212_v3 }
 0x281   :  { %5265 = vmatmul.mubr.f32.gmra.mxu1 %v6787_v40 }
 0x282   :  { %2217 = vadd.xlane.f32.xlu1 %v2216_v19  ;;  %5267 = vmatprep.mubr.f32.mxu1 %v6796_v32  ;;  %v3214_v38 = vand.u32 4294901760, %v3213_v15  ;;  %v3253_v19 = vsub.f32 %v6819_v14, %v3252_v41  ;;  %v3244_v15 = vand.u32 4294901760, %v3243_v53 }
 0x283   :  { %2518 = vadd.xlane.f32.xlu0 %v2517_v16  ;;  %v5545_v16 = vunpack.i.l.bf16 %v6743_v17  ;;  %v5520_v17 = vunpack.i.l.bf16 %v6720_v36  ;;  %v5540_v36 = vunpack.i.l.bf16 %v6725_v1 }
 0x284   :  { %5245 = vmatprep.mubr.f32.mxu0 %v3214_v38  ;;  %v3254_v38 = vand.u32 4294901760, %v3253_v19 }
 0x285   :  { %5246 = vmatmul.mubr.f32.gmra.mxu0 %v3224_v9  ;;  %5268 = vmatmul.mubr.f32.gmra.mxu1 %v6810_v63  ;;  %v3264_v9 = vand.u32 4294901760, %v3263_v43 }
 0x286   :  { %2515 = vadd.xlane.f32.xlu1 %v2514_v11  ;;  %5248 = vmatprep.mubr.f32.mxu0 %v3234_v59  ;;  %v2556_v59 = vsel %vm2137_vm4, %v6667_v13, 0.0  ;;  %v2180_v13 = vsel %vm2137_vm4, %v5545_v16, 0.0 }
 0x287   :  { %5290 = vmatprep.mubr.f32.mxu1 %v3192_v24  ;;  %2560 = vadd.xlane.f32.xlu0 %v2559_v35  ;;  %v2183_v24 = vsel %vm2137_vm4, %v5546_v6, 0.0 }
 0x289   :  { %5249 = vmatmul.mubr.f32.gmra.mxu0 %v3244_v15  ;;  %5291 = vmatmul.mubr.f32.vlgmr.msra.gmra.mxu1 %v7643_v50 }
 0x28a   :  { %5319 = vmatpush3.xpose.msra.mxu1 %v6514_v28  ;;  %2557 = vadd.xlane.f32.xlu1 %v2556_v59  ;;  %v2225_v28 = vsel %vm2137_vm4, %v5521_v57, 0.0 }
 0x28b   :  { %5251 = vmatprep.mubr.f32.mxu0 %v3254_v38  ;;  %5293 = vmatprep.mubr.f32.mxu1 %v3212_v3  ;;  %v2222_v3 = vsel %vm2137_vm4, %v5520_v17, 0.0 }
 0x28c   :  { %5320 = vmatprep.subr.mxu1 %v6525_v44  ;;  %2184 = vadd.xlane.f32.xlu0 %v2183_v24 }
 0x28d   :  { %5252 = vmatmul.mubr.f32.gmra.mxu0 %v3264_v9  ;;  %5294 = vmatmul.mubr.f32.gmra.mxu1 %v3222_v55 }
 0x28e   :  { %5321 = vmatpush3.xpose.msra.mxu1 %v6525_v44  ;;  %2181 = vadd.xlane.f32.xlu1 %v2180_v13  ;;  %v2523_v44 = vsel %vm2137_vm4, %v6736_v51, 0.0  ;;  %v2447_v51 = vpop.permute.xlu0 %2446 }
 0x28f   :  { %5274 = vmatprep.mubr.f32.mxu0 %v6583_v52  ;;  %5296 = vmatprep.mubr.f32.mxu1 %v3232_v58  ;;  %v2565_v52 = vsel %vm2137_vm4, %v6654_v2, 0.0  ;;  %v2228_v2 = vsel %vm2137_vm4, %v5540_v36, 0.0 }
 0x290   :  { %2226 = vadd.xlane.f32.xlu0 %v2225_v28 }
 0x291   :  { %5275 = vmatmul.mubr.f32.vlgmr.msra.gmra.mxu0 %v6575_v22  ;;  %5297 = vmatmul.mubr.f32.gmra.mxu1 %v3242_v18  ;;  %v2520_v22 = vsel %vm2137_vm4, %v6716_v7, 0.0  ;;  %v7644_v18 = vmov 0.0  }
 0x292   :  { %5303 = vmatpush3.xpose.msra.mxu0 %v6528_v26  ;;  %2223 = vadd.xlane.f32.xlu1 %v2222_v3  ;;  %v5541_v26 = vunpack.i.h.bf16 %v6725_v1 }
 0x293   :  { %5277 = vmatprep.mubr.f32.mxu0 %v6814_v39  ;;  %5299 = vmatprep.mubr.f32.mxu1 %v3252_v41 }
 0x294   :  { %5304 = vmatprep.subr.mxu0 %v6539_v56  ;;  %2524 = vadd.xlane.f32.xlu0 %v2523_v44  ;;  %v2231_v7 = vsel %vm2137_vm4, %v5541_v26, 0.0 }
 0x295   :  { %5278 = vmatmul.mubr.f32.gmra.mxu0 %v6785_v8  ;;  %5300 = vmatmul.mubr.f32.gmra.mxu1 %v3262_v54  ;;  %v2562_v54 = vsel %vm2137_vm4, %v6639_v48, 0.0  ;;  %v2529_v48 = vsel %vm2137_vm4, %v6732_v27, 0.0  ;;  %v2526_v8 = vsel %vm2137_vm4, %v6748_v45, 0.0 }
 0x296   :  { %5305 = vmatpush3.xpose.msra.mxu0 %v6539_v56  ;;  %2521 = vadd.xlane.f32.xlu1 %v2520_v22  ;;  %v2449_v56 = vpop.permute.xlu1 %2448 }
 0x297   :  { %5280 = vmatprep.mubr.f32.mxu0 %v6790_v42  ;;  %5322 = vmatprep.mubr.f32.mxu1 %v6572_v61  ;;  %v2423_v42 = vpop.permute.xlu0 %2422 }
 0x298   :  { %2566 = vadd.xlane.f32.xlu0 %v2565_v52 }
 0x299   :  { %5281 = vmatmul.mubr.f32.gmra.mxu0 %v6808_v34  ;;  %5323 = vmatmul.mubr.f32.vlgmr.msra.gmra.mxu1 %v6564_v30 }
 0x29a   :  { %2563 = vadd.xlane.f32.xlu1 %v2562_v54  ;;  %5283 = vmatprep.mubr.f32.mxu0 %v6819_v14  ;;  %v2425_v1 = vpop.permute.xlu1 %2424 }
 0x29b   :  { %5325 = vmatprep.mubr.f32.mxu1 %v6803_v0  ;;  %v2535_v45 = vsel %vm2137_vm4, %v2425_v1, 0.0  ;;  %v2451_v34 = vpop.permute.xlu0 %2450 }
 0x29c   :  { %2232 = vadd.xlane.f32.xlu0 %v2231_v7  ;;  %v2574_v39 = vsel %vm2137_vm4, %v2451_v34, 0.0 }
 0x29d   :  { %5284 = vmatmul.mubr.f32.gmra.mxu0 %v6828_v5  ;;  %5326 = vmatmul.mubr.f32.gmra.mxu1 %v6767_v62 }
 0x29e   :  { %2229 = vadd.xlane.f32.xlu1 %v2228_v2  ;;  %5306 = vmatprep.mubr.f32.mxu0 %v6572_v61  ;;  %v2571_v61 = vsel %vm2137_vm4, %v2449_v56, 0.0  ;;  %v2453_v27 = vpop.permute.xlu1 %2452 }
 0x29f   :  { %5328 = vmatprep.mubr.f32.mxu1 %v6771_v37 }
 0x2a0   :  { %2530 = vadd.xlane.f32.xlu0 %v2529_v48 }
 0x2a1   :  { %5307 = vmatmul.mubr.f32.vlgmr.msra.gmra.mxu0 %v6564_v30  ;;  %5329 = vmatmul.mubr.f32.gmra.mxu1 %v6787_v40  ;;  %v2568_v30 = vsel %vm2137_vm4, %v2447_v51, 0.0 }
 0x2a2   :  { %2527 = vadd.xlane.f32.xlu1 %v2526_v8  ;;  %5309 = vmatprep.mubr.f32.mxu0 %v6803_v0  ;;  %v2532_v0 = vsel %vm2137_vm4, %v2423_v42, 0.0  ;;  %v2457_v55 = vpop.permute.xlu1 %2456 }
 0x2a3   :  { %5331 = vmatprep.mubr.f32.mxu1 %v6796_v32  ;;  %v2583_v58 = vsel %vm2137_vm4, %v2457_v55, 0.0 }
 0x2a4   :  { %2572 = vadd.xlane.f32.xlu0 %v2571_v61 }
 0x2a5   :  { %5310 = vmatmul.mubr.f32.gmra.mxu0 %v6767_v62  ;;  %5332 = vmatmul.mubr.f32.gmra.mxu1 %v6810_v63  ;;  %v2577_v62 = vsel %vm2137_vm4, %v2453_v27, 0.0 }
 0x2a6   :  { %2569 = vadd.xlane.f32.xlu1 %v2568_v30  ;;  %5312 = vmatprep.mubr.f32.mxu0 %v6771_v37  ;;  %v2455_v37 = vpop.permute.xlu0 %2454 }
 0x2a8   :  { %2536 = vadd.xlane.f32.xlu0 %v2535_v45 }
 0x2a9   :  { %5313 = vmatmul.mubr.f32.gmra.mxu0 %v6787_v40  ;;  %v2580_v40 = vsel %vm2137_vm4, %v2455_v37, 0.0 }
 0x2aa   :  { %2533 = vadd.xlane.f32.xlu1 %v2532_v0  ;;  %5315 = vmatprep.mubr.f32.mxu0 %v6796_v32 }
 0x2ac   :  { %2578 = vadd.xlane.f32.xlu0 %v2577_v62 }
 0x2ad   :  { %5316 = vmatmul.mubr.f32.gmra.mxu0 %v6810_v63 }
 0x2ae   :  { %2575 = vadd.xlane.f32.xlu1 %v2574_v39 }
 0x2b0   :  { %2584 = vadd.xlane.f32.xlu0 %v2583_v58 }
 0x2b2   :  { %2581 = vadd.xlane.f32.xlu1 %v2580_v40 }
 0x2b8   :  { %v2140_v14 = vpop.xlane.xlu0 %2139 }
 0x2b9   :  { %vm2234_vm6 = vcmp.eq.f32.partialorder %v2140_v14, 7.0 }
 0x2ba   :  { %v6925_v11 = vsel %vm2234_vm6, 1.0, %v7644_v18 }
 0x2bb   :  { %v2739_v50 = vrot.slane %v6925_v11, %v5947_v47 }
 0x2bc   :  { %v2146_v5 = vpop.xlane.xlu0 %2145 }
 0x2bd   :  { %vm2236_vm5 = vcmp.eq.f32.partialorder %v2146_v5, 7.0 }
 0x2be   :  { %v6918_v41 = vsel %vm2236_vm5, 1.0, %v7644_v18 }
 0x2bf   :  { %v2750_v35 = vrot.slane %v6918_v41, %v5947_v47 }
 0x2c0   :  { %v2149_v32 = vpop.xlane.xlu0 %2148 }
 0x2c1   :  { %vm2237_vm7 = vcmp.eq.f32.partialorder %v2149_v32, 7.0 }
 0x2c2   :  { %v6921_v63 = vsel %vm2237_vm7, 1.0, %v7644_v18  ;;  %vm2886_vm7 = vcmask 1043459  }
 0x2c3   :  { %3946 = vperm.xlu1 %5548, %v6761_v12   ;;  %v2143_v53 = vpop.xlane.xlu1 %2142  ;;  %v2754_v19 = vrot.slane %v6921_v63, %v5949_v49 }
 0x2c4   :  { %vm2235_vm9 = vcmp.eq.f32.partialorder %v2143_v53, 7.0  ;;  %v2155_v6 = vpop.xlane.xlu0 %2154 }
 0x2c5   :  { %vm2239_vm10 = vcmp.eq.f32.partialorder %v2155_v6, 7.0  ;;  %v4834_v15 = vsel %vm2235_vm9, 1.0, %v7644_v18  ;;  %v2755_v43 = vsel %vm2745_vm8, %v2754_v19, %v2750_v35 }
 0x2c6   :  { %3938 = vperm.xlu0 %5547, %v6752_v10   ;;  %v2744_v16 = vrot.slane %v4834_v15, %v5949_v49  ;;  %v6938_v59 = vsel %vm2239_vm10, 1.0, %v7644_v18 }
 0x2c7   :  { %3934 = vperm.xlu1 %5548, %v6794_v46   ;;  %v2152_v38 = vpop.xlane.xlu1 %2151  ;;  %v2763_v57 = vrot.slane %v6938_v59, %v5949_v49 }
 0x2c8   :  { %vm2238_vm12 = vcmp.eq.f32.partialorder %v2152_v38, 7.0  ;;  %v2191_v24 = vpop.xlane.xlu0 %2190  ;;  %v2746_v9 = vsel %vm2745_vm8, %v2744_v16, %v2739_v50 }
 0x2c9   :  { %vm2251_vm13 = vcmp.eq.f32.partialorder %v2191_v24, 7.0  ;;  %v2883_v17 = vsel %vm2882_vm11, %v2755_v43, %v2746_v9  ;;  %v6946_v13 = vsel %vm2238_vm12, 1.0, %v7644_v18 }
 0x2ca   :  { %v2759_v28 = vrot.slane %v6946_v13, %v5947_v47  ;;  %v6951_v3 = vsel %vm2251_vm13, 1.0, %v7644_v18 }
 0x2cb   :  { %3942 = vperm.xlu1 %5548, %v6756_v4   ;;  %v2188_v44 = vpop.xlane.xlu1 %2187  ;;  %v2817_v22 = vrot.slane %v6951_v3, %v5949_v49 }
 0x2cc   :  { %vm2250_vm15 = vcmp.eq.f32.partialorder %v2188_v44, 7.0  ;;  %v2197_v26 = vpop.xlane.xlu0 %2196  ;;  %v2764_v52 = vsel %vm2745_vm8, %v2763_v57, %v2759_v28  ;;  %v3888_v44 = vmul.f32 %v6510_v21, %v6752_v10 }
 0x2cd   :  { %vm2253_vm0 = vcmp.eq.f32.partialorder %v2197_v26, 7.0  ;;  %v2885_v36 = vsel %vm2884_vm14, %v2764_v52, %v2883_v17  ;;  %v6959_v54 = vsel %vm2250_vm15, 1.0, %v7644_v18  ;;  %vm2888_vm15 = vcmask 1044484  }
 0x2ce   :  { %v2813_v56 = vrot.slane %v6959_v54, %v5947_v47  ;;  %v6964_v7 = vsel %vm2253_vm0, 1.0, %v7644_v18 }
 0x2cf   :  { %3950 = vperm.xlu1 %5548, %v6769_v60   ;;  %v2194_v51 = vpop.xlane.xlu1 %2193  ;;  %v2826_v2 = vrot.slane %v6964_v7, %v5949_v49 }
 0x2d0   :  { %vm2252_vm2 = vcmp.eq.f32.partialorder %v2194_v51, 7.0  ;;  %v2161_v48 = vpop.xlane.xlu0 %2160  ;;  %v2818_v1 = vsel %vm2745_vm8, %v2817_v22, %v2813_v56 }
 0x2d1   :  { %vm2241_vm3 = vcmp.eq.f32.partialorder %v2161_v48, 7.0  ;;  %v6971_v8 = vsel %vm2252_vm2, 1.0, %v7644_v18 }
 0x2d2   :  { %v2822_v42 = vrot.slane %v6971_v8, %v5947_v47  ;;  %v6976_v61 = vsel %vm2241_vm3, 1.0, %v7644_v18 }
 0x2d3   :  { %v2158_v30 = vpop.xlane.xlu1 %2157  ;;  %v2772_v27 = vrot.slane %v6976_v61, %v5949_v49 }
 0x2d4   :  { %vm2240_vm5 = vcmp.eq.f32.partialorder %v2158_v30, 7.0  ;;  %v2203_v45 = vpop.xlane.xlu0 %2202  ;;  %v2827_v34 = vsel %vm2745_vm8, %v2826_v2, %v2822_v42  ;;  %v3892_v42 = vmul.f32 %v6510_v21, %v6775_v25 }
 0x2d5   :  { %vm2255_vm6 = vcmp.eq.f32.partialorder %v2203_v45, 7.0  ;;  %v2896_v0 = vsel %vm2882_vm11, %v2827_v34, %v2818_v1  ;;  %v6983_v62 = vsel %vm2240_vm5, 1.0, %v7644_v18 }
 0x2d6   :  { %v2768_v55 = vrot.slane %v6983_v62, %v5947_v47  ;;  %v6988_v39 = vsel %vm2255_vm6, 1.0, %v7644_v18  ;;  %vm2890_vm6 = vcmask 1045509  }
 0x2d7   :  { %v2200_v37 = vpop.xlane.xlu1 %2199  ;;  %v2835_v58 = vrot.slane %v6988_v39, %v5949_v49 }
 0x2d8   :  { %vm2254_vm9 = vcmp.eq.f32.partialorder %v2200_v37, 7.0  ;;  %v2495_v40 = vpop.xlane.xlu0 %2494  ;;  %v2773_v14 = vsel %vm2745_vm8, %v2772_v27, %v2768_v55 }
 0x2d9   :  { %v2587_v5 = vadd.f32 %v4834_v15, %v2495_v40  ;;  %v2887_v32 = vsel %vm2886_vm7, %v2773_v14, %v2885_v36  ;;  %v6995_v53 = vsel %vm2254_vm9, 1.0, %v7644_v18  ;;  %v3902_v36 = vsel %vm2137_vm4, %v3888_v44, 0.0 }
 0x2da   :  { %v2831_v19 = vrot.slane %v6995_v53, %v5947_v47 }
 0x2db   :  { %v2619_v35 = vmax.f32 %v2587_v5, 1e-16  ;;  %v2492_v6 = vpop.xlane.xlu1 %2491 }
 0x2dc   :  { %v2586_v43 = vadd.f32 %v6925_v11, %v2492_v6  ;;  %v2501_v16 = vpop.xlane.xlu0 %2500  ;;  %v2836_v50 = vsel %vm2745_vm8, %v2835_v58, %v2831_v19 }
 0x2dd   :  { %5549 = vrsqrt.f32 %v2619_v35  ;;  %v2589_v38 = vadd.f32 %v6921_v63, %v2501_v16  ;;  %v2897_v15 = vsel %vm2884_vm14, %v2836_v50, %v2896_v0 }
 0x2de   :  { %v2618_v57 = vmax.f32 %v2586_v43, 1e-16 }
 0x2df   :  { %v2621_v24 = vmax.f32 %v2589_v38, 1e-16  ;;  %v2498_v9 = vpop.xlane.xlu1 %2497  ;;  %v3887_v38 = vmul.f32 %v6516_v29, %v6794_v46 }
 0x2e0   :  { %5551 = vrsqrt.f32 %v2618_v57  ;;  %v2588_v17 = vadd.f32 %v6918_v41, %v2498_v9  ;;  %v2167_v28 = vpop.xlane.xlu0 %2166  ;;  %v3890_v41 = vmul.f32 %v6510_v21, %v6761_v12 }
 0x2e1   :  { %5553 = vrsqrt.f32 %v2621_v24  ;;  %vm2243_vm10 = vcmp.eq.f32.partialorder %v2167_v28, 7.0 }
 0x2e2   :  { %v2620_v11 = vmax.f32 %v2588_v17, 1e-16  ;;  %v7007_v22 = vsel %vm2243_vm10, 1.0, %v7644_v18  ;;  %v3908_v12 = vsel %vm2137_vm4, %v3890_v41, 0.0 }
 0x2e3   :  { %v2164_v26 = vpop.xlane.xlu1 %2163  ;;  %v2781_v63 = vrot.slane %v7007_v22, %v5949_v49 }
 0x2e4   :  { %5555 = vrsqrt.f32 %v2620_v11  ;;  %vm2242_vm12 = vcmp.eq.f32.partialorder %v2164_v26, 7.0  ;;  %v2209_v52 = vpop.xlane.xlu0 %2208  ;;  %v3899_v26 = vsel %vm2137_vm4, %v3887_v38, 0.0 }
 0x2e5   :  { %vm2257_vm13 = vcmp.eq.f32.partialorder %v2209_v52, 7.0  ;;  %3903 = vadd.xlane.f32.xlu0 %v3902_v36  ;;  %v7015_v10 = vsel %vm2242_vm12, 1.0, %v7644_v18 }
 0x2e6   :  { %v2777_v56 = vrot.slane %v7015_v10, %v5947_v47  ;;  %v7020_v51 = vsel %vm2257_vm13, 1.0, %v7644_v18 }
 0x2e7   :  { %v2206_v2 = vpop.xlane.xlu1 %2205  ;;  %v2844_v48 = vrot.slane %v7020_v51, %v5949_v49 }
 0x2e8   :  { %vm2256_vm0 = vcmp.eq.f32.partialorder %v2206_v2, 7.0  ;;  %v2507_v1 = vpop.xlane.xlu0 %2506  ;;  %v2782_v30 = vsel %vm2745_vm8, %v2781_v63, %v2777_v56  ;;  %v3889_v63 = vmul.f32 %v6516_v29, %v6756_v4 }
 0x2e9   :  { %v2591_v27 = vadd.f32 %v6938_v59, %v2507_v1  ;;  %3909 = vadd.xlane.f32.xlu0 %v3908_v12  ;;  %v7030_v45 = vsel %vm2888_vm15, %v2782_v30, %v2887_v32  ;;  %v7033_v34 = vsel %vm2256_vm0, 1.0, %v7644_v18  ;;  %v3914_v59 = vsel %vm2137_vm4, %v3892_v42, 0.0 }
 0x2ea   :  { %v5550_v0 = vpop.eup %5549  ;;  %v2840_v55 = vrot.slane %v7033_v34, %v5947_v47  ;;  %v3886_v32 = vmul.f32 %v6510_v21, %v6554_v31  ;;  %v3891_v1 = vmul.f32 %v6516_v29, %v6769_v60  ;;  %vm2892_vm0 = vcmask 1046534  }
 0x2eb   :  { %v2944_v37 = vrot.slane %v5550_v0, %v5949_v49  ;;  %v2623_v58 = vmax.f32 %v2591_v27, 1e-16  ;;  %v2504_v40 = vpop.xlane.xlu1 %2503 }
 0x2ec   :  { %v2590_v14 = vadd.f32 %v6946_v13, %v2504_v40  ;;  %v2543_v5 = vpop.xlane.xlu0 %2542  ;;  %v2845_v19 = vsel %vm2745_vm8, %v2844_v48, %v2840_v55  ;;  %v3905_v48 = vsel %vm2137_vm4, %v3889_v63, 0.0  ;;  %v3911_v0 = vsel %vm2137_vm4, %v3891_v1, 0.0 }
 0x2ed   :  { %v5552_v35 = vpop.eup %5551  ;;  %5557 = vrsqrt.f32 %v2623_v58  ;;  %v2603_v6 = vadd.f32 %v6951_v3, %v2543_v5  ;;  %3915 = vadd.xlane.f32.xlu0 %v3914_v59  ;;  %v7045_v43 = vsel %vm2886_vm7, %v2845_v19, %v2897_v15  ;;  %v3896_v15 = vsel %vm2137_vm4, %v3886_v32, 0.0 }
 0x2ee   :  { %v5554_v16 = vpop.eup %5553  ;;  %v2940_v50 = vrot.slane %v5552_v35, %v5947_v47  ;;  %v2622_v13 = vmax.f32 %v2590_v14, 1e-16 }
 0x2ef   :  { %v2953_v57 = vrot.slane %v5554_v16, %v5949_v49  ;;  %v2635_v21 = vmax.f32 %v2603_v6, 1e-16  ;;  %v2540_v24 = vpop.xlane.xlu1 %2539 }
 0x2f0   :  { %v2945_v9 = vsel %vm2745_vm8, %v2944_v37, %v2940_v50  ;;  %5559 = vrsqrt.f32 %v2622_v13  ;;  %v2602_v3 = vadd.f32 %v6959_v54, %v2540_v24  ;;  %v2549_v17 = vpop.xlane.xlu0 %2548 }
 0x2f1   :  { %v5556_v28 = vpop.eup %5555  ;;  %5561 = vrsqrt.f32 %v2635_v21  ;;  %v2605_v44 = vadd.f32 %v6964_v7, %v2549_v17  ;;  %3897 = vadd.xlane.f32.xlu0 %v3896_v15 }
 0x2f2   :  { %v2949_v11 = vrot.slane %v5556_v28, %v5947_v47  ;;  %v2634_v46 = vmax.f32 %v2602_v3, 1e-16 }
 0x2f3   :  { %v2637_v52 = vmax.f32 %v2605_v44, 1e-16  ;;  %3900 = vadd.xlane.f32.xlu1 %v3899_v26  ;;  %v2546_v36 = vpop.xlane.xlu1 %2545 }
 0x2f4   :  { %v2954_v54 = vsel %vm2745_vm8, %v2953_v57, %v2949_v11  ;;  %5563 = vrsqrt.f32 %v2634_v46  ;;  %v2604_v41 = vadd.f32 %v6971_v8, %v2546_v36  ;;  %v2173_v56 = vpop.xlane.xlu0 %2172 }
 0x2f5   :  { %v3081_v7 = vsel %vm2882_vm11, %v2954_v54, %v2945_v9  ;;  %5565 = vrsqrt.f32 %v2637_v52  ;;  %vm2245_vm2 = vcmp.eq.f32.partialorder %v2173_v56, 7.0 }
 0x2f6   :  { %v2636_v2 = vmax.f32 %v2604_v41, 1e-16  ;;  %v7066_v4 = vsel %vm2245_vm2, 1.0, %v7644_v18 }
 0x2f7   :  { %3906 = vadd.xlane.f32.xlu1 %v3905_v48  ;;  %v2170_v12 = vpop.xlane.xlu1 %2169  ;;  %v2790_v42 = vrot.slane %v7066_v4, %v5949_v49 }
 0x2f8   :  { %5567 = vrsqrt.f32 %v2636_v2  ;;  %vm2244_vm3 = vcmp.eq.f32.partialorder %v2170_v12, 7.0  ;;  %v2215_v8 = vpop.xlane.xlu0 %2214 }
 0x2f9   :  { %vm2259_vm5 = vcmp.eq.f32.partialorder %v2215_v8, 7.0  ;;  %v7071_v30 = vsel %vm2244_vm3, 1.0, %v7644_v18 }
 0x2fa   :  { %v5558_v27 = vpop.eup %5557  ;;  %v2786_v60 = vrot.slane %v7071_v30, %v5947_v47  ;;  %v7078_v58 = vsel %vm2259_vm5, 1.0, %v7644_v18 }
 0x2fb   :  { %v2962_v55 = vrot.slane %v5558_v27, %v5949_v49  ;;  %3912 = vadd.xlane.f32.xlu1 %v3911_v0  ;;  %v2212_v37 = vpop.xlane.xlu1 %2211  ;;  %v2853_v16 = vrot.slane %v7078_v58, %v5949_v49 }
 0x2fc   :  { %vm2258_vm9 = vcmp.eq.f32.partialorder %v2212_v37, 7.0  ;;  %v2513_v40 = vpop.xlane.xlu0 %2512  ;;  %v2791_v14 = vsel %vm2745_vm8, %v2790_v42, %v2786_v60 }
 0x2fd   :  { %v5560_v5 = vpop.eup %5559  ;;  %v2593_v59 = vadd.f32 %v6976_v61, %v2513_v40  ;;  %v7083_v32 = vsel %vm2258_vm9, 1.0, %v7644_v18  ;;  %v2891_v19 = vsel %vm2890_vm6, %v2791_v14, %v7030_v45  ;;  %vm2894_vm9 = vcmask 1047559  }
 0x2fe   :  { %v5562_v35 = vpop.eup %5561  ;;  %v2958_v6 = vrot.slane %v5560_v5, %v5947_v47  ;;  %v2849_v50 = vrot.slane %v7083_v32, %v5947_v47 }
 0x2ff   :  { %v3016_v13 = vrot.slane %v5562_v35, %v5949_v49  ;;  %v2625_v38 = vmax.f32 %v2593_v59, 1e-16  ;;  %v2510_v57 = vpop.xlane.xlu1 %2509 }
 0x300   :  { %v2963_v61 = vsel %vm2745_vm8, %v2962_v55, %v2958_v6  ;;  %v2592_v21 = vadd.f32 %v6983_v62, %v2510_v57  ;;  %v2555_v24 = vpop.xlane.xlu0 %2554  ;;  %v2854_v45 = vsel %vm2745_vm8, %v2853_v16, %v2849_v50 }
 0x301   :  { %v5564_v9 = vpop.eup %5563  ;;  %v7097_v3 = vsel %vm2884_vm14, %v2963_v61, %v3081_v7  ;;  %5569 = vrsqrt.f32 %v2625_v38  ;;  %v2607_v17 = vadd.f32 %v6988_v39, %v2555_v24  ;;  %v2899_v15 = vsel %vm2888_vm15, %v2854_v45, %v7045_v43 }
 0x302   :  { %v5566_v28 = vpop.eup %5565  ;;  %v3012_v44 = vrot.slane %v5564_v9, %v5947_v47  ;;  %v2624_v11 = vmax.f32 %v2592_v21, 1e-16 }
 0x303   :  { %v3025_v46 = vrot.slane %v5566_v28, %v5949_v49  ;;  %v2639_v62 = vmax.f32 %v2607_v17, 1e-16  ;;  %v2552_v26 = vpop.xlane.xlu1 %2551 }
 0x304   :  { %v3017_v63 = vsel %vm2745_vm8, %v3016_v13, %v3012_v44  ;;  %5571 = vrsqrt.f32 %v2624_v11  ;;  %v2606_v52 = vadd.f32 %v6995_v53, %v2552_v26  ;;  %v2179_v36 = vpop.xlane.xlu0 %2178 }
 0x305   :  { %v5568_v54 = vpop.eup %5567  ;;  %5573 = vrsqrt.f32 %v2639_v62  ;;  %vm2247_vm10 = vcmp.eq.f32.partialorder %v2179_v36, 7.0 }
 0x306   :  { %v3021_v39 = vrot.slane %v5568_v54, %v5947_v47  ;;  %v2638_v43 = vmax.f32 %v2606_v52, 1e-16  ;;  %v7109_v56 = vsel %vm2247_vm10, 1.0, %v7644_v18 }
 0x307   :  { %3930 = vperm.xlu0 %5547, %v6554_v31   ;;  %v2176_v41 = vpop.xlane.xlu1 %2175  ;;  %v2799_v1 = vrot.slane %v7109_v56, %v5949_v49 }
 0x308   :  { %v3026_v7 = vsel %vm2745_vm8, %v3025_v46, %v3021_v39  ;;  %5575 = vrsqrt.f32 %v2638_v43  ;;  %vm2246_vm12 = vcmp.eq.f32.partialorder %v2176_v41, 7.0  ;;  %v2221_v2 = vpop.xlane.xlu0 %2220 }
 0x309   :  { %vm2261_vm13 = vcmp.eq.f32.partialorder %v2221_v2, 7.0  ;;  %v7113_v53 = vsel %vm2246_vm12, 1.0, %v7644_v18  ;;  %v3088_v48 = vsel %vm2882_vm11, %v3026_v7, %v3017_v63 }
 0x30a   :  { %v2795_v31 = vrot.slane %v7113_v53, %v5947_v47  ;;  %v7121_v42 = vsel %vm2261_vm13, 1.0, %v7644_v18 }
 0x30b   :  { %v2218_v12 = vpop.xlane.xlu1 %2217  ;;  %v2862_v40 = vrot.slane %v7121_v42, %v5949_v49 }
 0x30c   :  { %vm2260_vm2 = vcmp.eq.f32.partialorder %v2218_v12, 7.0  ;;  %v2519_v8 = vpop.xlane.xlu0 %2518  ;;  %3954 = vperm.xlu1 %5548, %v6775_v25   ;;  %v2800_v27 = vsel %vm2745_vm8, %v2799_v1, %v2795_v31 }
 0x30d   :  { %v2595_v0 = vadd.f32 %v7007_v22, %v2519_v8  ;;  %v7127_v60 = vsel %vm2260_vm2, 1.0, %v7644_v18  ;;  %v2893_v55 = vsel %vm2892_vm0, %v2800_v27, %v2891_v19 }
 0x30e   :  { %v5570_v37 = vpop.eup %5569  ;;  %v2858_v14 = vrot.slane %v7127_v60, %v5947_v47 }
 0x30f   :  { %v2971_v5 = vrot.slane %v5570_v37, %v5949_v49  ;;  %v2627_v59 = vmax.f32 %v2595_v0, 1e-16  ;;  %v2516_v25 = vpop.xlane.xlu1 %2515 }
 0x310   :  { %v2594_v35 = vadd.f32 %v7015_v10, %v2516_v25  ;;  %v2561_v6 = vpop.xlane.xlu0 %2560  ;;  %v2863_v22 = vsel %vm2745_vm8, %v2862_v40, %v2858_v14 }
 0x311   :  { %v5572_v16 = vpop.eup %5571  ;;  %5577 = vrsqrt.f32 %v2627_v59  ;;  %v2609_v19 = vadd.f32 %v7020_v51, %v2561_v6  ;;  %v2900_v50 = vsel %vm2890_vm6, %v2863_v22, %v2899_v15 }
 0x312   :  { %v5574_v13 = vpop.eup %5573  ;;  %v2967_v38 = vrot.slane %v5572_v16, %v5947_v47  ;;  %v2626_v57 = vmax.f32 %v2594_v35, 1e-16 }
 0x313   :  { %v3034_v61 = vrot.slane %v5574_v13, %v5949_v49  ;;  %v2641_v21 = vmax.f32 %v2609_v19, 1e-16  ;;  %v2558_v24 = vpop.xlane.xlu1 %2557 }
 0x314   :  { %v2972_v45 = vsel %vm2745_vm8, %v2971_v5, %v2967_v38  ;;  %5579 = vrsqrt.f32 %v2626_v57  ;;  %v2608_v10 = vadd.f32 %v7033_v34, %v2558_v24 }
 0x315   :  { %v5576_v9 = vpop.eup %5575  ;;  %v3083_v17 = vsel %vm2886_vm7, %v2972_v45, %v7097_v3  ;;  %5581 = vrsqrt.f32 %v2641_v21  ;;  %v2185_v51 = vpop.xlane.xlu0 %2184 }
 0x316   :  { %v3030_v15 = vrot.slane %v5576_v9, %v5947_v47  ;;  %v2640_v28 = vmax.f32 %v2608_v10, 1e-16  ;;  %vm2249_vm11 = vcmp.eq.f32.partialorder %v2185_v51, 7.0  ;;  %v3885_v51 = vmul.f32 %v6516_v29, %v6557_v23 }
 0x317   :  { %v2182_v44 = vpop.xlane.xlu1 %2181  ;;  %v7147_v11 = vsel %vm2249_vm11, 1.0, %v7644_v18 }
 0x318   :  { %v3035_v46 = vsel %vm2745_vm8, %v3034_v61, %v3030_v15  ;;  %5583 = vrsqrt.f32 %v2640_v28  ;;  %vm2248_vm3 = vcmp.eq.f32.partialorder %v2182_v44, 7.0  ;;  %v2808_v26 = vrot.slane %v7147_v11, %v5949_v49 }
 0x319   :  { %v2227_v62 = vpop.xlane.xlu0 %2226  ;;  %v7151_v34 = vsel %vm2248_vm3, 1.0, %v7644_v18  ;;  %v3089_v3 = vsel %vm2884_vm14, %v3035_v46, %v3088_v48 }
 0x31a   :  { %vm2263_vm5 = vcmp.eq.f32.partialorder %v2227_v62, 7.0  ;;  %v2804_v63 = vrot.slane %v7151_v34, %v5947_v47 }
 0x31b   :  { %v2224_v52 = vpop.xlane.xlu1 %2223  ;;  %v7159_v36 = vsel %vm2263_vm5, 1.0, %v7644_v18 }
 0x31c   :  { %vm2262_vm10 = vcmp.eq.f32.partialorder %v2224_v52, 7.0  ;;  %v2809_v54 = vsel %vm2745_vm8, %v2808_v26, %v2804_v63  ;;  %v2871_v48 = vrot.slane %v7159_v36, %v5949_v49  ;;  %v3893_v63 = vsel %vm2137_vm4, %v3885_v51, 0.0 }
 0x31d   :  { %v2525_v39 = vpop.xlane.xlu0 %2524  ;;  %v7163_v43 = vsel %vm2262_vm10, 1.0, %v7644_v18  ;;  %v7166_v41 = vsel %vm2894_vm9, %v2809_v54, %v2893_v55  ;;  %vm4160_vm10 = vcmask 523264  }
 0x31e   :  { %v5578_v7 = vpop.eup %5577  ;;  %v2597_v2 = vadd.f32 %v7066_v4, %v2525_v39  ;;  %v2867_v1 = vrot.slane %v7163_v43, %v5947_v47 }
 0x31f   :  { %v2980_v31 = vrot.slane %v5578_v7, %v5949_v49  ;;  %v2522_v12 = vpop.xlane.xlu1 %2521 }
 0x320   :  { %v2629_v8 = vmax.f32 %v2597_v2, 1e-16  ;;  %v2596_v27 = vadd.f32 %v7071_v30, %v2522_v12  ;;  %v2872_v0 = vsel %vm2745_vm8, %v2871_v48, %v2867_v1  ;;  %v7204_v1 = vpop.f32.mrf.mxu1 }
 0x321   :  { %v5580_v37 = vpop.eup %5579  ;;  %v2567_v55 = vpop.xlane.xlu0 %2566  ;;  %v2901_v40 = vsel %vm2892_vm0, %v2872_v0, %v2900_v50 }
 0x322   :  { %v5582_v14 = vpop.eup %5581  ;;  %v2976_v4 = vrot.slane %v5580_v37, %v5947_v47  ;;  %5585 = vrsqrt.f32 %v2629_v8  ;;  %v2628_v5 = vmax.f32 %v2596_v27, 1e-16  ;;  %v2611_v59 = vadd.f32 %v7078_v58, %v2567_v55 }
 0x323   :  { %v3043_v25 = vrot.slane %v5582_v14, %v5949_v49  ;;  %v2564_v35 = vpop.xlane.xlu1 %2563  ;;  %v7211_v14 = vpop.f32.mrf.mxu1 }
 0x324   :  { %5587 = vrsqrt.f32 %v2628_v5  ;;  %v2643_v6 = vmax.f32 %v2611_v59, 1e-16  ;;  %v2610_v30 = vadd.f32 %v7083_v32, %v2564_v35  ;;  %v2981_v22 = vsel %vm2745_vm8, %v2980_v31, %v2976_v4 }
 0x325   :  { %v5584_v16 = vpop.eup %5583  ;;  %v2233_v19 = vpop.xlane.xlu0 %2232  ;;  %v3084_v50 = vsel %vm2888_vm15, %v2981_v22, %v3083_v17 }
 0x326   :  { %v3039_v13 = vrot.slane %v5584_v16, %v5947_v47  ;;  %5589 = vrsqrt.f32 %v2643_v6  ;;  %v2642_v38 = vmax.f32 %v2610_v30, 1e-16  ;;  %vm2265_vm14 = vcmp.eq.f32.partialorder %v2233_v19, 7.0  ;;  %v7217_v30 = vpop.f32.mrf.mxu0  ;;  %v3347_v19 = vpop.f32.mrf.mxu1 }
 0x327   :  { %v2230_v57 = vpop.xlane.xlu1 %2229  ;;  %v4864_v58 = vsel %vm2265_vm14, 1.0, %v7644_v18 }
 0x328   :  { %5591 = vrsqrt.f32 %v2642_v38  ;;  %vm2264_vm12 = vcmp.eq.f32.partialorder %v2230_v57, 7.0  ;;  %v3044_v61 = vsel %vm2745_vm8, %v3043_v25, %v3039_v13  ;;  %v2880_v10 = vrot.slane %v4864_v58, %v5949_v49 }
 0x329   :  { %v2531_v21 = vpop.xlane.xlu0 %2530  ;;  %v4863_v32 = vsel %vm2264_vm12, 1.0, %v7644_v18  ;;  %v3090_v24 = vsel %vm2886_vm7, %v3044_v61, %v3089_v3 }
 0x32a   :  { %v2599_v45 = vadd.f32 %v7109_v56, %v2531_v21  ;;  %v2876_v9 = vrot.slane %v4863_v32, %v5947_v47 }
 0x32b   :  { %v2528_v17 = vpop.xlane.xlu1 %2527 }
 0x32c   :  { %v2631_v15 = vmax.f32 %v2599_v45, 1e-16  ;;  %v2598_v28 = vadd.f32 %v7113_v53, %v2528_v17  ;;  %v2881_v44 = vsel %vm2745_vm8, %v2880_v10, %v2876_v9  ;;  %v7223_v10 = vpop.f32.mrf.mxu0 }
 0x32d   :  { %v2573_v46 = vpop.xlane.xlu0 %2572  ;;  %v7196_v18 = vsel %vm2894_vm9, %v2881_v44, %v2901_v40 }
 0x32e   :  { %5593 = vrsqrt.f32 %v2631_v15  ;;  %v2630_v62 = vmax.f32 %v2598_v28, 1e-16  ;;  %v2613_v56 = vadd.f32 %v7121_v42, %v2573_v46  ;;  %v3196_v46 = vpop.f32.mrf.mxu0 }
 0x32f   :  { %v5586_v3 = vpop.eup %5585  ;;  %v2570_v26 = vpop.xlane.xlu1 %2569 }
 0x330   :  { %v2989_v52 = vrot.slane %v5586_v3, %v5949_v49  ;;  %5595 = vrsqrt.f32 %v2630_v62  ;;  %v2645_v29 = vmax.f32 %v2613_v56, 1e-16  ;;  %v2612_v53 = vadd.f32 %v7127_v60, %v2570_v26  ;;  %3894 = vadd.xlane.f32.xlu1 %v3893_v63 }
 0x331   :  { %v5588_v54 = vpop.eup %5587  ;;  %v2537_v39 = vpop.xlane.xlu0 %2536 }
 0x332   :  { %v2985_v7 = vrot.slane %v5588_v54, %v5947_v47  ;;  %5597 = vrsqrt.f32 %v2645_v29  ;;  %v2644_v2 = vmax.f32 %v2612_v53, 1e-16  ;;  %v2601_v48 = vadd.f32 %v7147_v11, %v2537_v39 }
 0x333   :  { %v5590_v42 = vpop.eup %5589  ;;  %v2534_v31 = vpop.xlane.xlu1 %2533 }
 0x334   :  { %5599 = vrsqrt.f32 %v2644_v2  ;;  %v2633_v12 = vmax.f32 %v2601_v48, 1e-16  ;;  %v2600_v8 = vadd.f32 %v7151_v34, %v2534_v31  ;;  %v3052_v60 = vrot.slane %v5590_v42, %v5949_v49 }
 0x335   :  { %v5592_v27 = vpop.eup %5591  ;;  %v2579_v0 = vpop.xlane.xlu0 %2578  ;;  %v2990_v37 = vsel %vm2745_vm8, %v2989_v52, %v2985_v7 }
 0x336   :  { %v3048_v55 = vrot.slane %v5592_v27, %v5947_v47  ;;  %5601 = vrsqrt.f32 %v2633_v12  ;;  %v2632_v40 = vmax.f32 %v2600_v8, 1e-16  ;;  %v2615_v11 = vadd.f32 %v7159_v36, %v2579_v0 }
 0x337   :  { %v2576_v4 = vpop.xlane.xlu1 %2575  ;;  %v3085_v5 = vsel %vm2890_vm6, %v2990_v37, %v3084_v50 }
 0x338   :  { %5603 = vrsqrt.f32 %v2632_v40  ;;  %v2647_v59 = vmax.f32 %v2615_v11, 1e-16  ;;  %v2614_v34 = vadd.f32 %v7163_v43, %v2576_v4  ;;  %v3053_v25 = vsel %vm2745_vm8, %v3052_v60, %v3048_v55 }
 0x339   :  { %v2585_v35 = vpop.xlane.xlu0 %2584  ;;  %v3091_v6 = vsel %vm2888_vm15, %v3053_v25, %v3090_v24 }
 0x33a   :  { %5605 = vrsqrt.f32 %v2647_v59  ;;  %v2646_v22 = vmax.f32 %v2614_v34, 1e-16  ;;  %v2617_v16 = vadd.f32 %v4864_v58, %v2585_v35 }
 0x33b   :  { %v5594_v36 = vpop.eup %5593  ;;  %v2582_v13 = vpop.xlane.xlu1 %2581 }
 0x33c   :  { %5607 = vrsqrt.f32 %v2646_v22  ;;  %v2649_v38 = vmax.f32 %v2617_v16, 1e-16  ;;  %v2616_v50 = vadd.f32 %v4863_v32, %v2582_v13  ;;  %v2998_v43 = vrot.slane %v5594_v36, %v5949_v49 }
 0x33d   :  { %v5596_v57 = vpop.eup %5595  ;;  %v7219_v61 = vpop.f32.mrf.mxu1  ;;  %v3348_v16 = vadd.f32 %v3347_v19, %v3196_v46 }
 0x33e   :  { %v2994_v21 = vrot.slane %v5596_v57, %v5947_v47  ;;  %5609 = vrsqrt.f32 %v2649_v38  ;;  %v2648_v24 = vmax.f32 %v2616_v50, 1e-16 }
 0x33f   :  { %v5598_v45 = vpop.eup %5597  ;;  %v7225_v9 = vpop.f32.mrf.mxu1 }
 0x340   :  { %5611 = vrsqrt.f32 %v2648_v24  ;;  %v2999_v58 = vsel %vm2745_vm8, %v2998_v43, %v2994_v21  ;;  %v3061_v15 = vrot.slane %v5598_v45, %v5949_v49 }
 0x341   :  { %v5600_v17 = vpop.eup %5599  ;;  %3926 = vperm.xlu1 %5548, %v6557_v23   ;;  %v5266_v32 = vpop.f32.mrf.mxu1  ;;  %v3086_v51 = vsel %vm2892_vm0, %v2999_v58, %v3085_v5 }
 0x342   :  { %v3057_v28 = vrot.slane %v5600_v17, %v5947_v47 }
 0x343   :  { %v5602_v44 = vpop.eup %5601  ;;  %v7232_v62 = vpop.f32.mrf.mxu1 }
 0x344   :  { %v3062_v56 = vsel %vm2745_vm8, %v3061_v15, %v3057_v28  ;;  %v3007_v29 = vrot.slane %v5602_v44, %v5949_v49 }
 0x345   :  { %v5604_v3 = vpop.eup %5603  ;;  %v5247_v26 = vpop.f32.mrf.mxu0  ;;  %v3092_v52 = vsel %vm2890_vm6, %v3062_v56, %v3091_v6 }
 0x346   :  { %v7235_v63 = vpop.f32.mrf.mxu1  ;;  %v3003_v23 = vrot.slane %v5604_v3, %v5947_v47  ;;  %v3366_v19 = vadd.f32 %v7219_v61, %v5247_v26 }
 0x347   :  { %v5606_v53 = vpop.eup %5605  ;;  %v7240_v54 = vpop.f32.mrf.mxu0 }
 0x348   :  { %v7242_v39 = vpop.f32.mrf.mxu1  ;;  %v3008_v7 = vsel %vm2745_vm8, %v3007_v29, %v3003_v23  ;;  %v3070_v31 = vrot.slane %v5606_v53, %v5949_v49  ;;  %v3947_v23 = vpop.permute.xlu1 %3946 }
 0x349   :  { %v5608_v2 = vpop.eup %5607  ;;  %v5250_v48 = vpop.f32.mrf.mxu0  ;;  %v7246_v42 = vsel %vm2894_vm9, %v3008_v7, %v3086_v51 }
 0x34a   :  { %v3066_v12 = vrot.slane %v5608_v2, %v5947_v47  ;;  %v7250_v8 = vpop.f32.mrf.mxu1  ;;  %v3378_v3 = vadd.f32 %v5266_v32, %v5250_v48  ;;  %v3360_v32 = vadd.f32 %v7225_v9, %v7240_v54 }
 0x34b   :  { %v5610_v27 = vpop.eup %5609  ;;  %v7252_v60 = vpop.f32.mrf.mxu0 }
 0x34c   :  { %v3589_v0 = vpop.f32.mrf.mxu1  ;;  %v3071_v37 = vsel %vm2745_vm8, %v3070_v31, %v3066_v12  ;;  %v3079_v5 = vrot.slane %v5610_v27, %v5949_v49  ;;  %v3939_v27 = vpop.permute.xlu0 %3938 }
 0x34d   :  { %v5612_v55 = vpop.eup %5611  ;;  %v7255_v40 = vpop.f32.mrf.mxu0  ;;  %v3093_v11 = vsel %vm2892_vm0, %v3071_v37, %v3092_v52 }
 0x34e   :  { %v5295_v4 = vpop.f32.mrf.mxu1  ;;  %v3075_v59 = vrot.slane %v5612_v55, %v5947_v47  ;;  %v3935_v61 = vpop.permute.xlu1 %3934 }
 0x34f   :  { %v7260_v34 = vpop.f32.mrf.mxu0 }
 0x350   :  { %v3605_v25 = vpop.f32.mrf.mxu1  ;;  %v3080_v35 = vsel %vm2745_vm8, %v3079_v5, %v3075_v59  ;;  %v3960_v59 = vmul.f32 %v3939_v27, %v7196_v18  ;;  %vm3989_vm8 = vcmask 130048  }
 0x351   :  { %v7263_v6 = vpop.f32.mrf.mxu0  ;;  %v7266_v22 = vsel %vm2894_vm9, %v3080_v35, %v3093_v11  ;;  %v7286_v35 = vld [vmem:[#allocation5 + $0x8] sm:$0xff]  ;;  %vm4130_vm9 = vcmask 392192  }
 0x352   :  { %v5298_v36 = vpop.f32.mrf.mxu1  ;;  %vm3098_vm4 = vcmp.gt.f32.partialorder %v7286_v35, 0.0 }
 0x353   :  { %v3465_v13 = vpop.f32.mrf.mxu0 }
 0x354   :  { %v3466_v38 = vadd.f32 %v3465_v13, %v3348_v16  ;;  %v7268_v50 = vpop.f32.mrf.mxu1 }
 0x355   :  { %v5279_v57 = vpop.f32.mrf.mxu0 }
 0x356   :  { %v3590_v49 = vadd.f32 %v3589_v0, %v3466_v38  ;;  %v7270_v47 = vpop.f32.mrf.mxu1  ;;  %v3487_v28 = vadd.f32 %v5279_v57, %v3366_v19  ;;  %v3943_v57 = vpop.permute.xlu1 %3942 }
 0x357   :  { %v3479_v43 = vpop.f32.mrf.mxu0 }
 0x358   :  { %v7272_v45 = vpop.f32.mrf.mxu1  ;;  %v3614_v7 = vadd.f32 %v5295_v4, %v3487_v28  ;;  %v3480_v16 = vadd.f32 %v3479_v43, %v3360_v32  ;;  %v3354_v28 = vadd.f32 %v7211_v14, %v7223_v10 }
 0x359   :  { %v5282_v21 = vpop.f32.mrf.mxu0 }
 0x35a   :  { %v7276_v51 = vpop.f32.mrf.mxu1  ;;  %v3501_v53 = vadd.f32 %v5282_v21, %v3378_v3  ;;  %v3372_v21 = vadd.f32 %v7232_v62, %v7252_v60  ;;  %v3384_v3 = vadd.f32 %v7242_v39, %v7260_v34  ;;  %v3473_v60 = vadd.f32 %v7263_v6, %v3354_v28  ;;  %v3951_v14 = vpop.permute.xlu1 %3950 }
 0x35b   :  { %v3493_v24 = vpop.f32.mrf.mxu0 }
 0x35c   :  { %v3837_v46 = vpop.f32.mrf.mxu1  ;;  %v3630_v37 = vadd.f32 %v5298_v36, %v3501_v53  ;;  %v3962_v36 = vmul.f32 %v3947_v23, %v7196_v18  ;;  %v3494_v43 = vadd.f32 %v3493_v24, %v3372_v21  ;;  %v3598_v39 = vadd.f32 %v7250_v8, %v3473_v60 }
 0x35d   :  { %v7274_v58 = vpop.f32.mrf.mxu0 }
 0x35e   :  { %v5327_v31 = vpop.f32.mrf.mxu1 }
 0x35f   :  { %v3507_v17 = vpop.f32.mrf.mxu0 }
 0x360   :  { %v3849_v26 = vpop.f32.mrf.mxu1  ;;  %v3508_v10 = vadd.f32 %v3507_v17, %v3384_v3 }
 0x361   :  { %v7279_v15 = vpop.f32.mrf.mxu0 }
 0x362   :  { %v5330_v4 = vpop.f32.mrf.mxu1  ;;  %v3729_v17 = vadd.f32 %v7279_v15, %v3598_v39 }
 0x363   :  { %v3722_v44 = vpop.f32.mrf.mxu0 }
 0x364   :  { %v3723_v56 = vadd.f32 %v3722_v44, %v3590_v49  ;;  %v3606_v44 = vadd.f32 %v3605_v25, %v3480_v16  ;;  %v3861_v24 = vpop.f32.mrf.mxu1 }
 0x365   :  { %v5311_v52 = vpop.f32.mrf.mxu0 }
 0x366   :  { %v7281_v29 = vadd.f32 %v3837_v46, %v3723_v56  ;;  %v3741_v12 = vadd.f32 %v5311_v52, %v3614_v7  ;;  %v3622_v7 = vadd.f32 %v7268_v50, %v3494_v43  ;;  %v7313_v50 = vld [vmem:[#allocation5] sm:$0xff] }
 0x367   :  { %v3734_v2 = vpop.f32.mrf.mxu0  ;;  %vm3097_vm7 = vcmp.gt.f32.partialorder %v7313_v50, 0.0 }
 0x368   :  { %v3856_v11 = vadd.f32 %v5327_v31, %v3741_v12  ;;  %v3735_v52 = vadd.f32 %v3734_v2, %v3606_v44  ;;  %v3390_v31 = vadd.f32 %v7235_v63, %v7255_v40  ;;  %v3638_v2 = vadd.f32 %v7272_v45, %v3508_v10 }
 0x369   :  { %v5314_v0 = vpop.f32.mrf.mxu0  ;;  %v3961_v45 = vmul.f32 %v3943_v57, %v7166_v41 }
 0x36a   :  { %v3753_v55 = vadd.f32 %v5314_v0, %v3630_v37  ;;  %v3850_v27 = vadd.f32 %v3849_v26, %v3735_v52  ;;  %v3515_v6 = vadd.f32 %v7274_v58, %v3390_v31  ;;  %v3959_v37 = vmul.f32 %v3935_v61, %v7166_v41 }
 0x36b   :  { %v3746_v19 = vpop.f32.mrf.mxu0  ;;  %v3844_v61 = vadd.f32 %v7276_v51, %v3729_v17 }
 0x36c   :  { %v3868_v38 = vadd.f32 %v5330_v4, %v3753_v55  ;;  %v3747_v34 = vadd.f32 %v3746_v19, %v3622_v7  ;;  %v5333_v55 = vpop.f32.mrf.mxu1 }
 0x36d   :  { %v5317_v23 = vpop.f32.mrf.mxu0 }
 0x36e   :  { %v3904_v5 = vpop.xlane.xlu0 %3903  ;;  %v3862_v8 = vadd.f32 %v3861_v24, %v3747_v34  ;;  %v3873_v58 = vpop.f32.mrf.mxu1 }
 0x36f   :  { %v3920_v48 = vsub.f32 %v3856_v11, %v3904_v5  ;;  %v3758_v12 = vpop.f32.mrf.mxu0 }
 0x370   :  { %v3759_v5 = vadd.f32 %v3758_v12, %v3638_v2 }
 0x371   :  { %v3968_v13 = vadd.f32 %v3960_v59, %v3920_v48  ;;  %v3646_v59 = vadd.f32 %v7270_v47, %v3515_v6 }
 0x372   :  { %v3910_v49 = vpop.xlane.xlu0 %3909  ;;  %v3874_v16 = vadd.f32 %v3873_v58, %v3759_v5 }
 0x373   :  { %v3976_v9 = vmul.f32 %v3968_v13, %v7266_v22  ;;  %v3922_v54 = vsub.f32 %v3868_v38, %v3910_v49  ;;  %v3765_v48 = vadd.f32 %v5317_v23, %v3646_v59 }
 0x375   :  { %v3970_v46 = vadd.f32 %v3962_v36, %v3922_v54  ;;  %v7297_v56 = vsel %vm3098_vm4, %v3976_v9, -1e+30  ;;  %v3963_v36 = vmul.f32 %v3951_v14, %v7166_v41  ;;  %v3880_v28 = vadd.f32 %v5333_v55, %v3765_v48 }
 0x376   :  { %v3999_v62 = vsel %vm3989_vm8, %v7297_v56, -inf  ;;  %v3916_v25 = vpop.xlane.xlu0 %3915 }
 0x377   :  { %v3978_v53 = vmul.f32 %v3970_v46, %v7266_v22  ;;  %4000 = vmax.xlane.f32.xlu0 %v3999_v62  ;;  %v3924_v62 = vsub.f32 %v3880_v28, %v3916_v25 }
 0x379   :  { %v3986_v54 = vsel %vm3098_vm4, %v3978_v53, -1e+30 }
 0x37a   :  { %v3898_v63 = vpop.xlane.xlu0 %3897  ;;  %v4005_v3 = vsel %vm3989_vm8, %v3986_v54, -inf }
 0x37b   :  { %v3918_v13 = vsub.f32 %v3844_v61, %v3898_v63 }
 0x37c   :  { %v3901_v0 = vpop.xlane.xlu1 %3900 }
 0x37d   :  { %v3919_v11 = vsub.f32 %v3850_v27, %v3901_v0 }
 0x37f   :  { %v3967_v40 = vadd.f32 %v3959_v37, %v3919_v11 }
 0x380   :  { %v3907_v26 = vpop.xlane.xlu1 %3906 }
 0x381   :  { %v3975_v15 = vmul.f32 %v3967_v40, %v7246_v42  ;;  %v3921_v32 = vsub.f32 %v3862_v8, %v3907_v26 }
 0x382   :  { %v3931_v4 = vpop.permute.xlu0 %3930 }
 0x383   :  { %v3969_v38 = vadd.f32 %v3961_v45, %v3921_v32  ;;  %v3958_v49 = vmul.f32 %v3931_v4, %v7196_v18  ;;  %v3983_v47 = vsel %vm3097_vm7, %v3975_v15, -1e+30 }
 0x384   :  { %v3913_v21 = vpop.xlane.xlu1 %3912  ;;  %v3996_v57 = vsel %vm3989_vm8, %v3983_v47, -inf }
 0x385   :  { %v3977_v51 = vmul.f32 %v3969_v38, %v7246_v42  ;;  %v3966_v19 = vadd.f32 %v3958_v49, %v3918_v13  ;;  %v3923_v9 = vsub.f32 %v3874_v16, %v3913_v21  ;;  %3997 = vmax.xlane.f32.xlu1 %v3996_v57 }
 0x387   :  { %v3974_v43 = vmul.f32 %v3966_v19, %v7266_v22  ;;  %v3971_v44 = vadd.f32 %v3963_v36, %v3923_v9  ;;  %v3985_v23 = vsel %vm3097_vm7, %v3977_v51, -1e+30 }
 0x388   :  { %v3955_v46 = vpop.permute.xlu1 %3954  ;;  %v4002_v10 = vsel %vm3989_vm8, %v3985_v23, -inf }
 0x389   :  { %v3979_v60 = vmul.f32 %v3971_v44, %v7246_v42  ;;  %v3964_v52 = vmul.f32 %v3955_v46, %v7196_v18  ;;  %4006 = vmax.xlane.f32.xlu1 %v4005_v3  ;;  %v3982_v31 = vsel %vm3098_vm4, %v3974_v43, -1e+30 }
 0x38a   :  { %v3993_v39 = vsel %vm3989_vm8, %v3982_v31, -inf }
 0x38b   :  { %v3972_v14 = vadd.f32 %v3964_v52, %v3924_v62  ;;  %v3987_v24 = vsel %vm3097_vm7, %v3979_v60, -1e+30 }
 0x38c   :  { %v4008_v18 = vsel %vm3989_vm8, %v3987_v24, -inf }
 0x38d   :  { %v3980_v53 = vmul.f32 %v3972_v14, %v7266_v22  ;;  %4003 = vmax.xlane.f32.xlu1 %v4002_v10  ;;  %v1600_v10 = vadd.f32 %v7217_v30, %v6690_v20 }
 0x38f   :  { %v3988_v25 = vsel %vm3098_vm4, %v3980_v53, -1e+30  ;;  %v7400_v53 = vadd.f32 %v7204_v1, %v1600_v10 }
 0x390   :  { %v4011_v7 = vsel %vm3989_vm8, %v3988_v25, -inf }
 0x391   :  { %4012 = vmax.xlane.f32.xlu0 %v4011_v7  ;;  %4009 = vmax.xlane.f32.xlu1 %v4008_v18 }
 0x395   :  { %3994 = vmax.xlane.f32.xlu0 %v3993_v39 }
 0x3b9   :  { %v3895_v22 = vpop.xlane.xlu1 %3894 }
 0x3ba   :  { %v3917_v12 = vsub.f32 %v7281_v29, %v3895_v22 }
 0x3bd   :  { %v3927_v34 = vpop.permute.xlu1 %3926 }
 0x3be   :  { %v3957_v27 = vmul.f32 %v3927_v34, %v7166_v41 }
 0x3c0   :  { %v3965_v6 = vadd.f32 %v3957_v27, %v3917_v12 }
 0x3c2   :  { %v3973_v2 = vmul.f32 %v3965_v6, %v7246_v42 }
 0x3c4   :  { %v7350_v0 = vsel %vm3097_vm7, %v3973_v2, -1e+30 }
 0x3c5   :  { %v3990_v37 = vsel %vm3989_vm8, %v7350_v0, -inf }
 0x3c6   :  { %3991 = vmax.xlane.f32.xlu1 %v3990_v37 }
 0x400   :  { %v4001_v17 = vpop.xlane.xlu0 %4000 }
 0x401   :  { %v4017_v55 = vsub.f32 %v7297_v56, %v4001_v17 }
 0x403   :  { %v4028_v11 = vmul.f32 1.442695, %v4017_v55 }
 0x405   :  { %5613 = vpow2.f32 %v4028_v11 }
 0x40e   :  { %v3998_v5 = vpop.xlane.xlu1 %3997 }
 0x40f   :  { %v4016_v29 = vsub.f32 %v3983_v47, %v3998_v5 }
 0x411   :  { %v4026_v63 = vmul.f32 1.442695, %v4016_v29 }
 0x412   :  { %v5614_v41 = vpop.eup %5613  ;;  %v4007_v40 = vpop.xlane.xlu1 %4006 }
 0x413   :  { %5615 = vpow2.f32 %v4026_v63  ;;  %v4019_v42 = vsub.f32 %v3986_v54, %v4007_v40  ;;  %v7357_v8 = vsel %vm3098_vm4, %v5614_v41, 0.0 }
 0x414   :  { %v4055_v59 = vsel %vm3989_vm8, %v7357_v8, 0.0 }
 0x415   :  { %v4032_v26 = vmul.f32 1.442695, %v4019_v42  ;;  %4056 = vadd.xlane.f32.xlu0 %v4055_v59 }
 0x416   :  { %v4004_v45 = vpop.xlane.xlu1 %4003 }
 0x417   :  { %5617 = vpow2.f32 %v4032_v26  ;;  %v4018_v56 = vsub.f32 %v3985_v23, %v4004_v45 }
 0x419   :  { %v4030_v58 = vmul.f32 1.442695, %v4018_v56 }
 0x41a   :  { %v4013_v61 = vpop.xlane.xlu0 %4012  ;;  %v4010_v15 = vpop.xlane.xlu1 %4009 }
 0x41b   :  { %5619 = vpow2.f32 %v4030_v58  ;;  %v4021_v32 = vsub.f32 %v3988_v25, %v4013_v61  ;;  %v4020_v48 = vsub.f32 %v3987_v24, %v4010_v15 }
 0x41d   :  { %v4036_v4 = vmul.f32 1.442695, %v4021_v32  ;;  %v4034_v16 = vmul.f32 1.442695, %v4020_v48 }
 0x41e   :  { %v3995_v13 = vpop.xlane.xlu0 %3994 }
 0x41f   :  { %5621 = vpow2.f32 %v4036_v4  ;;  %v4015_v38 = vsub.f32 %v3982_v31, %v3995_v13 }
 0x420   :  { %v5616_v49 = vpop.eup %5615  ;;  %5623 = vpow2.f32 %v4034_v16 }
 0x421   :  { %v4024_v47 = vmul.f32 1.442695, %v4015_v38  ;;  %v7363_v36 = vsel %vm3097_vm7, %v5616_v49, 0.0 }
 0x422   :  { %v4052_v21 = vsel %vm3989_vm8, %v7363_v36, 0.0 }
 0x423   :  { %5625 = vpow2.f32 %v4024_v47  ;;  %4053 = vadd.xlane.f32.xlu1 %v4052_v21 }
 0x424   :  { %v5618_v57 = vpop.eup %5617 }
 0x425   :  { %v7369_v51 = vsel %vm3098_vm4, %v5618_v57, 0.0  ;;  %v7455_v57 = vand.u32 4294901760, %v6692_v33 }
 0x426   :  { %v4061_v19 = vsel %vm3989_vm8, %v7369_v51, 0.0 }
 0x427   :  { %4062 = vadd.xlane.f32.xlu0 %v4061_v19 }
 0x428   :  { %v5620_v9 = vpop.eup %5619 }
 0x429   :  { %v7375_v54 = vsel %vm3097_vm7, %v5620_v9, 0.0 }
 0x42a   :  { %v4058_v28 = vsel %vm3989_vm8, %v7375_v54, 0.0 }
 0x42b   :  { %4059 = vadd.xlane.f32.xlu1 %v4058_v28  ;;  %v7470_v28 = vand.u32 4294901760, %v7400_v53 }
 0x42c   :  { %v5622_v43 = vpop.eup %5621 }
 0x42d   :  { %v5624_v44 = vpop.eup %5623  ;;  %v7381_v46 = vsel %vm3098_vm4, %v5622_v43, 0.0 }
 0x42e   :  { %v4067_v3 = vsel %vm3989_vm8, %v7381_v46, 0.0  ;;  %v7387_v62 = vsel %vm3097_vm7, %v5624_v44, 0.0 }
 0x42f   :  { %4068 = vadd.xlane.f32.xlu0 %v4067_v3  ;;  %v4064_v60 = vsel %vm3989_vm8, %v7387_v62, 0.0 }
 0x430   :  { %v5626_v52 = vpop.eup %5625  ;;  %4065 = vadd.xlane.f32.xlu1 %v4064_v60  ;;  %v7483_v60 = vsub.f32 %v6692_v33, %v7455_v57 }
 0x431   :  { %v7393_v23 = vsel %vm3098_vm4, %v5626_v52, 0.0 }
 0x432   :  { %v4049_v14 = vsel %vm3989_vm8, %v7393_v23, 0.0 }
 0x433   :  { %4050 = vadd.xlane.f32.xlu0 %v4049_v14 }
 0x449   :  { %4147 = vrot.lane.b32.xlu0 %v7400_v53, %s5792_s15 }
 0x44d   :  { %4137 = vrot.lane.b32.xlu0 %v6692_v33, %s5789_s9 }
 0x44f   :  { %v3992_v24 = vpop.xlane.xlu1 %3991 }
 0x450   :  { %v4014_v35 = vsub.f32 %v7350_v0, %v3992_v24 }
 0x451   :  { %4135 = vrot.lane.b32.xlu0 %v7400_v53, %s5789_s9 }
 0x452   :  { %v4022_v25 = vmul.f32 1.442695, %v4014_v35 }
 0x454   :  { %5627 = vpow2.f32 %v4022_v25 }
 0x461   :  { %v5628_v7 = vpop.eup %5627 }
 0x462   :  { %v7410_v20 = vsel %vm3097_vm7, %v5628_v7, 0.0  ;;  %v7504_v7 = vsub.f32 %v7400_v53, %v7470_v28 }
 0x463   :  { %v4046_v1 = vsel %vm3989_vm8, %v7410_v20, 0.0 }
 0x464   :  { %4047 = vadd.xlane.f32.xlu1 %v4046_v1 }
 0x475   :  { %4149 = vrot.lane.b32.xlu1 %v6692_v33, %s5792_s15 }
 0x479   :  { %4143 = vrot.lane.b32.xlu1 %v6692_v33, %s5786_s30 }
 0x47d   :  { %4141 = vrot.lane.b32.xlu1 %v7400_v53, %s5786_s30 }
 0x49e   :  { %v4057_v30 = vpop.xlane.xlu0 %4056 }
 0x49f   :  { %vm4073_vm15 = vcmp.eq.f32.partialorder %v4057_v30, 0.0 }
 0x4a0   :  { %v4081_v18 = vsel %vm4073_vm15, 1.0, %v4057_v30 }
 0x4a1   :  { %5629 = vrcp.f32 %v4081_v18  ;;  %v7513_v18 = vand.u32 4294901760, %v7483_v60 }
 0x4ac   :  { %v4054_v31 = vpop.xlane.xlu1 %4053 }
 0x4ad   :  { %vm4072_vm6 = vcmp.eq.f32.partialorder %v4054_v31, 0.0 }
 0x4ae   :  { %v5630_v50 = vpop.eup %5629  ;;  %v4080_v39 = vsel %vm4072_vm6, 1.0, %v4054_v31 }
 0x4af   :  { %5631 = vrcp.f32 %v4080_v39  ;;  %v4093_v22 = vmul.f32 %v5630_v50, %v7357_v8  ;;  %v7520_v50 = vand.u32 4294901760, %v7504_v7 }
 0x4b0   :  { %v4063_v34 = vpop.xlane.xlu0 %4062 }
 0x4b1   :  { %vm4075_vm13 = vcmp.eq.f32.partialorder %v4063_v34, 0.0  ;;  %4106 = vrot.lane.b32.xlu1 %v4093_v22, %s5793_s16  ;;  %v4322_v22 = vsub.f32 %v7483_v60, %v7513_v18 }
 0x4b2   :  { %v4083_v12 = vsel %vm4075_vm13, 1.0, %v4063_v34 }
 0x4b3   :  { %5633 = vrcp.f32 %v4083_v12  ;;  %v4329_v12 = vsub.f32 %v7504_v7, %v7520_v50 }
 0x4b4   :  { %v4060_v27 = vpop.xlane.xlu1 %4059 }
 0x4b5   :  { %vm4074_vm0 = vcmp.eq.f32.partialorder %v4060_v27, 0.0 }
 0x4b6   :  { %v4082_v6 = vsel %vm4074_vm0, 1.0, %v4060_v27  ;;  %v4323_v27 = vand.u32 4294901760, %v4322_v22 }
 0x4b7   :  { %5635 = vrcp.f32 %v4082_v6  ;;  %v4330_v6 = vand.u32 4294901760, %v4329_v12 }
 0x4b8   :  { %v4069_v2 = vpop.xlane.xlu0 %4068 }
 0x4b9   :  { %vm4077_vm2 = vcmp.eq.f32.partialorder %v4069_v2, 0.0  ;;  %v4066_v0 = vpop.xlane.xlu1 %4065 }
 0x4ba   :  { %v4085_v37 = vsel %vm4077_vm2, 1.0, %v4069_v2  ;;  %vm4076_vm11 = vcmp.eq.f32.partialorder %v4066_v0, 0.0 }
 0x4bb   :  { %5637 = vrcp.f32 %v4085_v37  ;;  %v4084_v17 = vsel %vm4076_vm11, 1.0, %v4066_v0 }
 0x4bc   :  { %v5632_v55 = vpop.eup %5631  ;;  %5639 = vrcp.f32 %v4084_v17  ;;  %v7425_v26 = vpop.xlane.xlu0 %4050 }
 0x4bd   :  { %v4091_v11 = vmul.f32 %v5632_v55, %v7363_v36  ;;  %vm4071_vm3 = vcmp.eq.f32.partialorder %v7425_v26, 0.0 }
 0x4be   :  { %v4079_v2 = vsel %vm4071_vm3, 1.0, %v7425_v26 }
 0x4bf   :  { %4104 = vrot.lane.b32.xlu1 %v4091_v11, %s5793_s16  ;;  %5641 = vrcp.f32 %v4079_v2 }
 0x4c0   :  { %v5634_v5 = vpop.eup %5633  ;;  %v4148_v45 = vpop.permute.xlu0 %4147 }
 0x4c1   :  { %v4097_v29 = vmul.f32 %v5634_v5, %v7369_v51  ;;  %v7427_v56 = vand.u32 4294901760, %v4148_v45 }
 0x4c3   :  { %4114 = vrot.lane.b32.xlu1 %v4097_v29, %s5794_s1  ;;  %v7432_v15 = vsub.f32 %v4148_v45, %v7427_v56 }
 0x4c4   :  { %v5636_v63 = vpop.eup %5635  ;;  %v4138_v58 = vpop.permute.xlu0 %4137 }
 0x4c5   :  { %v4095_v41 = vmul.f32 %v5636_v63, %v7375_v54  ;;  %v7436_v16 = vand.u32 4294901760, %v4138_v58  ;;  %v7443_v38 = vand.u32 4294901760, %v7432_v15 }
 0x4c7   :  { %4112 = vrot.lane.b32.xlu0 %v4095_v41, %s5794_s1  ;;  %v7459_v51 = vsub.f32 %v4138_v58, %v7436_v16  ;;  %v4287_v54 = vsub.f32 %v7432_v15, %v7443_v38 }
 0x4c8   :  { %v5638_v40 = vpop.eup %5637  ;;  %v4136_v4 = vpop.permute.xlu0 %4135 }
 0x4c9   :  { %v5640_v42 = vpop.eup %5639  ;;  %v4101_v8 = vmul.f32 %v5638_v40, %v7381_v46  ;;  %v7446_v47 = vand.u32 4294901760, %v4136_v4  ;;  %v4288_v14 = vand.u32 4294901760, %v4287_v54  ;;  %v7492_v24 = vand.u32 4294901760, %v7459_v51 }
 0x4ca   :  { %v4099_v59 = vmul.f32 %v5640_v42, %v7387_v62 }
 0x4cb   :  { %4122 = vrot.lane.b32.xlu1 %v4101_v8, %s5795_s17  ;;  %v7474_v44 = vsub.f32 %v4136_v4, %v7446_v47  ;;  %v4308_v30 = vsub.f32 %v7459_v51, %v7492_v24 }
 0x4cc   :  { %4120 = vrot.lane.b32.xlu0 %v4099_v59, %s5795_s17  ;;  %v5642_v55 = vpop.eup %5641 }
 0x4cd   :  { %v7500_v25 = vand.u32 4294901760, %v7474_v44  ;;  %v4309_v39 = vand.u32 4294901760, %v4308_v30  ;;  %v4089_v63 = vmul.f32 %v5642_v55, %v7393_v23 }
 0x4cf   :  { %v4315_v31 = vsub.f32 %v7474_v44, %v7500_v25 }
 0x4d1   :  { %v4316_v34 = vand.u32 4294901760, %v4315_v31 }
 0x4ed   :  { %v7429_v61 = vpop.xlane.xlu1 %4047 }
 0x4ee   :  { %vm4070_vm5 = vcmp.eq.f32.partialorder %v7429_v61, 0.0 }
 0x4ef   :  { %v4078_v0 = vsel %vm4070_vm5, 1.0, %v7429_v61 }
 0x4f0   :  { %5643 = vrcp.f32 %v4078_v0 }
 0x4f1   :  { %v4150_v32 = vpop.permute.xlu1 %4149 }
 0x4f2   :  { %v7434_v48 = vand.u32 4294901760, %v4150_v32 }
 0x4f4   :  { %v7439_v13 = vsub.f32 %v4150_v32, %v7434_v48  ;;  %5334 = vmatprep.subr.mxu0 %v7434_v48 }
 0x4f5   :  { %5335 = vmatpush3.msra.mxu0 %v7434_v48  ;;  %v4144_v49 = vpop.permute.xlu1 %4143 }
 0x4f6   :  { %v7448_v36 = vand.u32 4294901760, %v4144_v49  ;;  %5336 = vmatprep.subr.mxu0 %v7427_v56  ;;  %v7452_v21 = vand.u32 4294901760, %v7439_v13 }
 0x4f7   :  { %5337 = vmatpush3.msra.mxu0 %v7427_v56 }
 0x4f8   :  { %v7462_v19 = vsub.f32 %v4144_v49, %v7448_v36  ;;  %5338 = vmatprep.subr.mxu0 %v7448_v36  ;;  %v4280_v9 = vsub.f32 %v7439_v13, %v7452_v21 }
 0x4f9   :  { %5339 = vmatpush3.msra.mxu0 %v7448_v36  ;;  %v4142_v43 = vpop.permute.xlu1 %4141 }
 0x4fa   :  { %v7476_v46 = vand.u32 4294901760, %v4142_v43  ;;  %v4281_v3 = vand.u32 4294901760, %v4280_v9  ;;  %v7479_v62 = vand.u32 4294901760, %v7462_v19 }
 0x4fc   :  { %v7486_v52 = vsub.f32 %v4142_v43, %v7476_v46  ;;  %5340 = vmatprep.subr.mxu0 %v7476_v46  ;;  %5353 = vmatprep.subr.mxu1 %v4281_v3  ;;  %v4294_v10 = vsub.f32 %v7462_v19, %v7479_v62 }
 0x4fd   :  { %5341 = vmatpush3.msra.mxu0 %v7476_v46  ;;  %5354 = vmatpush3.msra.mxu1 %v4281_v3  ;;  %v5644_v11 = vpop.eup %5643 }
 0x4fe   :  { %5342 = vmatprep.subr.mxu0 %v7436_v16  ;;  %5355 = vmatprep.subr.mxu1 %v4288_v14  ;;  %v4295_v33 = vand.u32 4294901760, %v4294_v10  ;;  %v7497_v35 = vand.u32 4294901760, %v7486_v52  ;;  %v4087_v41 = vmul.f32 %v5644_v11, %v7410_v20 }
 0x4ff   :  { %5343 = vmatpush3.msra.mxu0 %v7436_v16  ;;  %5356 = vmatpush3.msra.mxu1 %v4288_v14 }
 0x500   :  { %5344 = vmatprep.subr.mxu0 %v7446_v47  ;;  %5357 = vmatprep.subr.mxu1 %v4295_v33  ;;  %v4301_v1 = vsub.f32 %v7486_v52, %v7497_v35 }
 0x501   :  { %5345 = vmatpush3.msra.mxu0 %v7446_v47  ;;  %5358 = vmatpush3.msra.mxu1 %v4295_v33 }
 0x502   :  { %5346 = vmatprep.subr.mxu0 %v7455_v57  ;;  %v4302_v53 = vand.u32 4294901760, %v4301_v1 }
 0x503   :  { %5347 = vmatpush3.msra.mxu0 %v7455_v57 }
 0x504   :  { %5348 = vmatprep.subr.mxu0 %v7470_v28  ;;  %5359 = vmatprep.subr.mxu1 %v4302_v53 }
 0x505   :  { %5349 = vmatpush3.msra.mxu0 %v7470_v28  ;;  %5360 = vmatpush3.msra.mxu1 %v4302_v53 }
 0x506   :  { %5361 = vmatprep.subr.mxu1 %v4309_v39  ;;  %5372 = vmatprep.subr.mxu0 %v7439_v13 }
 0x507   :  { %5362 = vmatpush3.msra.mxu1 %v4309_v39 }
 0x508   :  { %5363 = vmatprep.subr.mxu1 %v4316_v34 }
 0x509   :  { %5364 = vmatpush3.msra.mxu1 %v4316_v34 }
 0x50a   :  { %5365 = vmatprep.subr.mxu1 %v4323_v27 }
 0x50b   :  { %5366 = vmatpush3.msra.mxu1 %v4323_v27 }
 0x50c   :  { %5367 = vmatprep.subr.mxu1 %v4330_v6 }
 0x50d   :  { %5368 = vmatpush3.msra.mxu1 %v4330_v6 }
 0x50e   :  { %5391 = vmatprep.subr.mxu1 %v7434_v48 }
 0x523   :  { %v4107_v37 = vpop.permute.xlu1 %4106 }
 0x524   :  { %v4127_v40 = vsel %vm3989_vm8, %v4089_v63, %v4107_v37 }
 0x531   :  { %v4105_v17 = vpop.permute.xlu1 %4104 }
 0x532   :  { %v4126_v42 = vsel %vm3989_vm8, %v4087_v41, %v4105_v17 }
 0x535   :  { %v4115_v5 = vpop.permute.xlu1 %4114 }
 0x536   :  { %v4129_v8 = vsel %vm617_vm1, %v4127_v40, %v4115_v5 }
 0x539   :  { %v4113_v29 = vpop.permute.xlu0 %4112 }
 0x53a   :  { %v4128_v26 = vsel %vm617_vm1, %v4126_v42, %v4113_v29 }
 0x53d   :  { %v4123_v59 = vpop.permute.xlu1 %4122 }
 0x53e   :  { %v4121_v45 = vpop.permute.xlu0 %4120  ;;  %v4132_v58 = vsel %vm4130_vm9, %v4129_v8, %v4123_v59 }
 0x53f   :  { %v4131_v61 = vsel %vm4130_vm9, %v4128_v26, %v4121_v45  ;;  %v4165_v32 = vsel %vm4160_vm10, %v4132_v58, 0 }
 0x540   :  { %v4162_v4 = vsel %vm4160_vm10, %v4131_v61, 0  ;;  %v7541_v49 = vand.u32 4294901760, %v4165_v32 }
 0x541   :  { %v4240_v23 = vand.u32 4294901760, %v4162_v4 }
 0x542   :  { %v4251_v20 = vsub.f32 %v4165_v32, %v7541_v49 }
 0x543   :  { %v4241_v9 = vsub.f32 %v4162_v4, %v4240_v23  ;;  %5369 = vmatprep.mubr.f32.mxu1 %v4240_v23 }
 0x544   :  { %v4252_v54 = vand.u32 4294901760, %v4251_v20  ;;  %5370 = vmatmul.mubr.f32.vlgmr.msra.gmra.mxu1 %v7541_v49 }
 0x545   :  { %5392 = vmatpush3.msra.mxu1 %v7434_v48  ;;  %v4242_v43 = vand.u32 4294901760, %v4241_v9 }
 0x546   :  { %v4253_v3 = vsub.f32 %v4251_v20, %v4252_v54  ;;  %5393 = vmatprep.subr.mxu1 %v7427_v56 }
 0x547   :  { %5394 = vmatpush3.msra.mxu1 %v7427_v56  ;;  %5407 = vmatprep.mubr.f32.mxu1 %v4242_v43  ;;  %v4243_v14 = vsub.f32 %v4241_v9, %v4242_v43 }
 0x548   :  { %v4254_v10 = vand.u32 4294901760, %v4253_v3  ;;  %5395 = vmatprep.subr.mxu1 %v7448_v36 }
 0x549   :  { %5396 = vmatpush3.msra.mxu1 %v7448_v36  ;;  %v4244_v33 = vand.u32 4294901760, %v4243_v14 }
 0x54a   :  { %5397 = vmatprep.subr.mxu1 %v7476_v46 }
 0x54b   :  { %5398 = vmatpush3.msra.mxu1 %v7476_v46  ;;  %5350 = vmatprep.mubr.f32.mxu0 %v4244_v33 }
 0x54c   :  { %5399 = vmatprep.subr.mxu1 %v7436_v16  ;;  %5351 = vmatmul.mubr.f32.vlgmr.msra.gmra.mxu0 %v4254_v10 }
 0x54d   :  { %5373 = vmatpush3.msra.mxu0 %v7439_v13  ;;  %5400 = vmatpush3.msra.mxu1 %v7436_v16 }
 0x54e   :  { %5374 = vmatprep.subr.mxu0 %v7432_v15  ;;  %5388 = vmatprep.mubr.f32.mxu0 %v4241_v9 }
 0x54f   :  { %5401 = vmatprep.subr.mxu1 %v7446_v47  ;;  %5375 = vmatpush3.msra.mxu0 %v7432_v15  ;;  %v4865_v15 = vld [vmem:[%s7636_s8] ss:$0 sm:$0xff]  ;;  %s5796_s8 = smov [#allocation11]  }
 0x550   :  { %5402 = vmatpush3.msra.mxu1 %v7446_v47  ;;  %5376 = vmatprep.subr.mxu0 %v7462_v19  ;;  %s4780_s19 = sshll.u32 %s5796_s8, 4  ;;  %s4781_s19 = int_to_ptr.vmem [resolvable:$true] %s4780_s19 }
 0x551   :  { %5403 = vmatprep.subr.mxu1 %v7455_v57  ;;  %5377 = vmatpush3.msra.mxu0 %v7462_v19  ;;  %s5729_s20 = scalar_lea.vmem %s4781_s19, 256  ;;  %p5734_p7 = scmp.lt.s32.totalorder %s4781_s19, %s4781_s19 }
 0x552   :  { %5404 = vmatpush3.msra.mxu1 %v7455_v57  ;;  %5378 = vmatprep.subr.mxu0 %v7486_v52  ;;  %p5730_p6 = scmp.ne.s32.totalorder %s4781_s19, %s5729_s20  ;;  %p5735_p8 = scmp.lt.s32.totalorder %s5729_s20, %s5729_s20 }
 0x553   :  { %5405 = vmatprep.subr.mxu1 %v7470_v28  ;;  %5379 = vmatpush3.msra.mxu0 %v7486_v52 }
 0x554   :  { %5406 = vmatpush3.msra.mxu1 %v7470_v28  ;;  %5380 = vmatprep.subr.mxu0 %v7459_v51  ;;  %p5736_p9 = por %p5735_p8, %p5734_p7 }
 0x555   :  { %5408 = vmatmul.mubr.f32.vlgmr.msra.gmra.mxu1 %v4252_v54  ;;  %5429 = vmatprep.subr.mxu1 %v7434_v48 }
 0x556   :  { %5381 = vmatpush3.msra.mxu0 %v7459_v51  ;;  %5430 = vmatpush3.msra.mxu1 %v7434_v48  ;;  %p5737_p10 = pnand %p5736_p9, %p5730_p6 }
 0x557   :  { %5445 = vmatprep.mubr.f32.mxu1 %v4240_v23  ;;  %5382 = vmatprep.subr.mxu0 %v7474_v44 }
 0x558   :  { %5431 = vmatprep.subr.mxu1 %v7427_v56  ;;  %5383 = vmatpush3.msra.mxu0 %v7474_v44 }
 0x559   :  { %5432 = vmatpush3.msra.mxu1 %v7427_v56  ;;  %5384 = vmatprep.subr.mxu0 %v7483_v60 }
 0x55a   :  { %5433 = vmatprep.subr.mxu1 %v7448_v36  ;;  %5385 = vmatpush3.msra.mxu0 %v7483_v60 }
 0x55b   :  { %5434 = vmatpush3.msra.mxu1 %v7448_v36  ;;  %5386 = vmatprep.subr.mxu0 %v7504_v7 }
 0x55c   :  { %5435 = vmatprep.subr.mxu1 %v7476_v46  ;;  %5387 = vmatpush3.msra.mxu0 %v7504_v7 }
 0x55d   :  { %5436 = vmatpush3.msra.mxu1 %v7476_v46  ;;  %5389 = vmatmul.mubr.f32.vlgmr.msra.gmra.mxu0 %v4251_v20 }
 0x55e   :  { %5410 = vmatprep.subr.mxu0 %v7452_v21  ;;  %5437 = vmatprep.subr.mxu1 %v7436_v16 }
 0x55f   :  { %5411 = vmatpush3.msra.mxu0 %v7452_v21  ;;  %5426 = vmatprep.mubr.f32.mxu0 %v4240_v23 }
 0x560   :  { %5438 = vmatpush3.msra.mxu1 %v7436_v16  ;;  %5412 = vmatprep.subr.mxu0 %v7443_v38 }
 0x561   :  { %5439 = vmatprep.subr.mxu1 %v7446_v47  ;;  %5413 = vmatpush3.msra.mxu0 %v7443_v38 }
 0x562   :  { %5440 = vmatpush3.msra.mxu1 %v7446_v47  ;;  %5414 = vmatprep.subr.mxu0 %v7479_v62 }
 0x563   :  { %5441 = vmatprep.subr.mxu1 %v7455_v57  ;;  %5415 = vmatpush3.msra.mxu0 %v7479_v62 }
 0x564   :  { %5442 = vmatpush3.msra.mxu1 %v7455_v57  ;;  %5416 = vmatprep.subr.mxu0 %v7497_v35 }
 0x565   :  { %5443 = vmatprep.subr.mxu1 %v7470_v28  ;;  %5417 = vmatpush3.msra.mxu0 %v7497_v35 }
 0x566   :  { %5444 = vmatpush3.msra.mxu1 %v7470_v28  ;;  %5418 = vmatprep.subr.mxu0 %v7492_v24 }
 0x567   :  { %5446 = vmatmul.mubr.f32.vlgmr.msra.gmra.mxu1 %v7541_v49  ;;  %5419 = vmatpush3.msra.mxu0 %v7492_v24 }
 0x568   :  { %5420 = vmatprep.subr.mxu0 %v7500_v25 }
 0x569   :  { %5421 = vmatpush3.msra.mxu0 %v7500_v25 }
 0x56a   :  { %5422 = vmatprep.subr.mxu0 %v7513_v18 }
 0x56b   :  { %5423 = vmatpush3.msra.mxu0 %v7513_v18 }
 0x56c   :  { %5424 = vmatprep.subr.mxu0 %v7520_v50 }
 0x56d   :  { %5425 = vmatpush3.msra.mxu0 %v7520_v50 }
 0x56e   :  { %5427 = vmatmul.mubr.f32.vlgmr.msra.gmra.mxu0 %v7541_v49 }
 0x604   :  { %v5371_v48 = vpop.f32.mrf.mxu1 }
 0x606   :  { %v4367_v36 = vpop.f32.mrf.mxu1 }
 0x60c   :  { %v5352_v56 = vpop.f32.mrf.mxu0 }
 0x60d   :  { %v4257_v13 = vadd.f32 %v5352_v56, %v4865_v15 }
 0x60e   :  { %v4246_v16 = vpop.f32.mrf.mxu0 }
 0x60f   :  { %v4247_v47 = vadd.f32 %v4865_v15, %v4246_v16  ;;  %v4374_v21 = vadd.f32 %v5371_v48, %v4257_v13 }
 0x611   :  { %v4368_v28 = vadd.f32 %v4367_v36, %v4247_v47 }
 0x615   :  { %v5409_v57 = vpop.f32.mrf.mxu1 }
 0x617   :  { %v4549_v46 = vpop.f32.mrf.mxu1 }
 0x61d   :  { %v5390_v38 = vpop.f32.mrf.mxu0 }
 0x61e   :  { %v4469_v19 = vadd.f32 %v5390_v38, %v4374_v21 }
 0x61f   :  { %v4461_v51 = vpop.f32.mrf.mxu0 }
 0x620   :  { %v4462_v44 = vadd.f32 %v4461_v51, %v4368_v28  ;;  %v4558_v62 = vadd.f32 %v5409_v57, %v4469_v19 }
 0x622   :  { %v4550_v35 = vadd.f32 %v4549_v46, %v4462_v44 }
 0x627   :  { %v5447_v60 = vpop.f32.mrf.mxu1 }
 0x629   :  { %v4737_v30 = vpop.f32.mrf.mxu1 }
 0x62e   :  { %v5428_v52 = vpop.f32.mrf.mxu0 }
 0x62f   :  { %v4659_v24 = vadd.f32 %v5428_v52, %v4558_v62 }
 0x630   :  { %v4652_v25 = vpop.f32.mrf.mxu0 }
 0x631   :  { %v4744_v7 = vadd.f32 %v5447_v60, %v4659_v24  ;;  %v4653_v1 = vadd.f32 %v4652_v25, %v4550_v35 }
 0x633   :  { %v4738_v18 = vadd.f32 %v4737_v30, %v4653_v1  ;;  %v4748_v53 = vmul.f32 %v4744_v7, %v4744_v7 }
 0x635   :  { %v4752_v31 = vsel %vm3989_vm8, %v4748_v53, 0.0  ;;  %v4747_v50 = vmul.f32 %v4738_v18, %v4738_v18 }
 0x636   :  { %4753 = vadd.xlane.f32.xlu1 %v4752_v31 }
 0x637   :  { %v4749_v39 = vsel %vm3989_vm8, %v4747_v50, 0.0 }
 0x638   :  { %4750 = vadd.xlane.f32.xlu0 %v4749_v39 }
 0x639   :  { %5740 = shalt.err (!%p5737_p10)
}
 0x63a   :  { %4786 = dma.vmem_to_hbm [thread:$0]  %s4781_s19, 256, %s7639_s11, [#allocation12], %s5781_s22, %s5781_s22, %s5782_s23  }
 0x63b   :  { %s5797_s21 = smov [#allocation10]  }
 0x63c   :  { %s4768_s24 = sshll.u32 %s5797_s21, 4  ;;  %s4769_s24 = int_to_ptr.vmem [resolvable:$true] %s4768_s24 }
 0x63d   :  { %s5749_s25 = scalar_lea.vmem %s4769_s24, 256  ;;  %p5754_p12 = scmp.lt.s32.totalorder %s4769_s24, %s4769_s24 }
 0x63e   :  { %p5750_p11 = scmp.ne.s32.totalorder %s4769_s24, %s5749_s25  ;;  %p5755_p13 = scmp.lt.s32.totalorder %s5749_s25, %s5749_s25 }
 0x640   :  { %p5756_p0 = por %p5755_p13, %p5754_p12 }
 0x642   :  { %p5757_p1 = pnand %p5756_p0, %p5750_p11 }
 0x6bf   :  { %v4754_v22 = vpop.xlane.xlu1 %4753 }
 0x6c0   :  { %v4756_v34 = vmax.f32 %v4754_v22, 1e-16 }
 0x6c1   :  { %v4751_v12 = vpop.xlane.xlu0 %4750 }
 0x6c2   :  { %5645 = vrsqrt.f32 %v4756_v34  ;;  %v4755_v27 = vmax.f32 %v4751_v12, 1e-16 }
 0x6c4   :  { %5647 = vrsqrt.f32 %v4755_v27 }
 0x6cf   :  { %v5646_v6 = vpop.eup %5645 }
 0x6d0   :  { %v4760_v2 = vmul.f32 %v5646_v6, %v4744_v7 }
 0x6d1   :  { %v5648_v0 = vpop.eup %5647 }
 0x6d2   :  { %v4759_v37 = vmul.f32 %v5648_v0, %v4738_v18  ;;  %4762 = vst.msk [vmem:[#allocation10 + $0x8] sm:$0xff] %vm3989_vm8, %v4760_v2 }
 0x6d4   :  { %4761 = vst.msk [vmem:[#allocation10] sm:$0xff] %vm3989_vm8, %v4759_v37 }
 0x6d5   :  { %5760 = shalt.err (!%p5757_p1)
}
 0x6d6   :  { %4774 = dma.vmem_to_hbm [thread:$0]  %s4769_s24, 256, %s7638_s10, [#allocation4], %s5781_s22, %s5781_s22, %s5782_s23  }
 0x6d7   :  { %5775 = dma.done.wait [#allocation4], 256  }
 0x6d8   :  { %5776 = vsyncadd [#allocation4], 4294967040 }
 0x6d9   :  { %5777 = dma.done.wait [#allocation12], 256  }
 0x6da   :  { %5778 = vsyncadd [#allocation12], 4294967040 }
 0x6db   :  { %4793 = vsyncpa [#allocation3], 1 }
 0x6dc   :  { %4794 = vsyncpa [#allocation6], 1 }
 0x6dd   :  { %4795 = vsyncpa [#allocation9], 1 }
 0x6de   :  { %4796 = vsyncpa [#allocation4], 1 }
 0x6df   :  { %4797 = vsyncpa [#allocation12], 1 }

</bundles_post_ra>
